<compile_context>
chip_gen: v7x
topology: tpu7x:2x2x1
jax: 0.10.0
libtpu: 0.0.40
codegen_flags: <defaults>
</compile_context>

<pallas_src>
import functools

import jax
import jax.numpy as jnp
from jax.experimental import pallas as pl
from jax.experimental.pallas import tpu as pltpu

EPS = 1e-5
NEG_INF = -1e30
VMEM_LIMIT = 48 * 1024 * 1024   # explicit scoped-VMEM budget (headroom on v7x)


def _layer_norm(v, w, b):
    mean = jnp.mean(v, axis=-1, keepdims=True)
    c = v - mean
    var = jnp.mean(c * c, axis=-1, keepdims=True)
    return c * jax.lax.rsqrt(var + EPS) * w + b


# --------------------------------------------------------------------------- #
# Kernel A: row-wise FF1 (half residual) + LN2 + QKV projection (q pre-scaled).
# --------------------------------------------------------------------------- #
def projector_kernel(x_ref, ln1_w_ref, ln1_b_ref, ff_w1_ref, ff_b1_ref,
                     ff_w2_ref, ff_b2_ref, ln2_w_ref, ln2_b_ref,
                     wqkv_ref, bqkv_ref,
                     x1_ref, q_ref, k_ref, v_ref, *, num_heads, q_scale):
    x = x_ref[0].astype(jnp.float32)                       # (TT, F)
    F = x.shape[-1]
    d = F // num_heads

    # ff1: x1 = 0.5 * FF(LN(x)) + x   (SiLU; dropout = identity)
    y = _layer_norm(x, ln1_w_ref[...], ln1_b_ref[...])
    h = jnp.dot(y.astype(jnp.bfloat16), ff_w1_ref[...],
                preferred_element_type=jnp.float32) + ff_b1_ref[...]
    h = h * jax.nn.sigmoid(h)                              # SiLU
    ff = jnp.dot(h.astype(jnp.bfloat16), ff_w2_ref[...],
                 preferred_element_type=jnp.float32) + ff_b2_ref[...]
    x1 = 0.5 * ff + x
    x1_ref[0] = x1.astype(x1_ref.dtype)

    # MHSA pre-norm + fused QKV projection, head-major bf16.  Q is pre-scaled
    # by 1/sqrt(d) here (one (TT,F) multiply) instead of per KV step.
    y2 = _layer_norm(x1, ln2_w_ref[...], ln2_b_ref[...])
    qkv = jnp.dot(y2.astype(jnp.bfloat16), wqkv_ref[...],
                  preferred_element_type=jnp.float32) + bqkv_ref[...]
    q_all = (qkv[:, :F] * q_scale).astype(jnp.bfloat16)
    k_all = qkv[:, F:2 * F].astype(jnp.bfloat16)
    v_all = qkv[:, 2 * F:].astype(jnp.bfloat16)
    for hd in range(num_heads):
        lo = hd * d
        q_ref[0, hd] = q_all[:, lo:lo + d]
        k_ref[0, hd] = k_all[:, lo:lo + d]
        v_ref[0, hd] = v_all[:, lo:lo + d]


# --------------------------------------------------------------------------- #
# Kernel B: flash-style unified online/offline attention + out-proj + residual.
# --------------------------------------------------------------------------- #
def attention_kernel(q_ref, k_ref, v_ref, x1_ref, kbias_ref,
                     crow_ref, ccol_ref, wo_ref, bo_ref,
                     on_ref, off_ref,
                     m_sc, lon_sc, loff_sc, accon_sc, accoff_sc,
                     *, num_heads, chunk_frames):
    qt = pl.program_id(1)
    kt = pl.program_id(2)

    @pl.when(kt == 0)
    def _():
        m_sc[...] = jnp.full(m_sc.shape, -jnp.inf, m_sc.dtype)
        lon_sc[...] = jnp.zeros(lon_sc.shape, lon_sc.dtype)
        loff_sc[...] = jnp.zeros(loff_sc.shape, loff_sc.dtype)
        accon_sc[...] = jnp.zeros(accon_sc.shape, accon_sc.dtype)
        accoff_sc[...] = jnp.zeros(accoff_sc.shape, accoff_sc.dtype)

    q = q_ref[0]                                           # (H, TQ, d) bf16
    k = k_ref[0]                                           # (H, TK, d) bf16
    v = v_ref[0]                                           # (H, TK, d) bf16
    TQ = q.shape[1]
    TK = k.shape[1]

    # Chunk-causal tile classification from grid scalars (exact for any tile /
    # chunk_frames relation; tiles that are multiples of chunk_frames make
    # only the diagonal tiles "mixed").
    q_chunk_lo = (qt * TQ) // chunk_frames
    q_chunk_hi = ((qt + 1) * TQ - 1) // chunk_frames
    k_chunk_lo = (kt * TK) // chunk_frames
    k_chunk_hi = ((kt + 1) * TK - 1) // chunk_frames
    fully_allowed = k_chunk_hi <= q_chunk_lo
    fully_disallowed = k_chunk_lo > q_chunk_hi
    mixed = jnp.logical_not(jnp.logical_or(fully_allowed, fully_disallowed))

    # ---- offline (key-padding only) stream: computed for every tile ----
    s = jnp.einsum("hqd,hkd->hqk", q, k,
                   preferred_element_type=jnp.float32)     # q pre-scaled
    s = s + kbias_ref[...]                                 # (1,1,TK) key padding

    m_prev = m_sc[...]                                     # (H,TQ,1)
    m_new = jnp.maximum(m_prev, jnp.max(s, axis=-1, keepdims=True))
    alpha = jnp.exp(m_prev - m_new)
    e = jnp.exp(s - m_new)                                 # shared exponentials
    sum_e = jnp.sum(e, axis=-1, keepdims=True)
    e_bf = e.astype(jnp.bfloat16)                          # single bf16 cast
    pv = jnp.einsum("hqk,hkd->hqd", e_bf, v,
                    preferred_element_type=jnp.float32)

    loff_sc[...] = alpha * loff_sc[...] + sum_e
    accoff_sc[...] = alpha * accoff_sc[...] + pv
    m_sc[...] = m_new

    # ---- online (chunk-causal) stream ----
    @pl.when(fully_allowed)                                # reuse offline products
    def _():
        lon_sc[...] = alpha * lon_sc[...] + sum_e
        accon_sc[...] = alpha * accon_sc[...] + pv

    @pl.when(fully_disallowed)                             # rescale only
    def _():
        lon_sc[...] = alpha * lon_sc[...]
        accon_sc[...] = alpha * accon_sc[...]

    @pl.when(mixed)                                        # masked path (diagonal)
    def _():
        chunk_ok = crow_ref[...] >= ccol_ref[...]          # (TQ,TK) bool
        lon_sc[...] = alpha * lon_sc[...] + jnp.sum(
            jnp.where(chunk_ok[None], e, 0.0), axis=-1, keepdims=True)
        e_on = jnp.where(chunk_ok[None], e_bf, jnp.zeros_like(e_bf))
        accon_sc[...] = alpha * accon_sc[...] + jnp.einsum(
            "hqk,hkd->hqd", e_on, v, preferred_element_type=jnp.float32)

    @pl.when(kt == pl.num_programs(2) - 1)
    def _():
        x1 = x1_ref[0]                                     # (TQ, F) f32 residual
        inv_off = pl.reciprocal(jnp.maximum(loff_sc[...], 1e-30), approx=True)
        inv_on = pl.reciprocal(jnp.maximum(lon_sc[...], 1e-30), approx=True)
        ctx_off = accoff_sc[...] * inv_off                 # (H,TQ,d) f32
        ctx_on = accon_sc[...] * inv_on
        # Flatten heads into lanes ((H,TQ,d)->(TQ,F)) and stack both streams
        # along rows: ONE (2*TQ, F) x (F, F) matmul for the out-projection.
        on_flat = jnp.concatenate([ctx_on[h] for h in range(num_heads)], axis=-1)
        off_flat = jnp.concatenate([ctx_off[h] for h in range(num_heads)], axis=-1)
        ctx2 = jnp.concatenate([on_flat, off_flat], axis=0).astype(jnp.bfloat16)
        out = jnp.dot(ctx2, wo_ref[...],
                      preferred_element_type=jnp.float32) + bo_ref[...]
        tq = on_flat.shape[0]
        on_ref[0] = (out[:tq] + x1).astype(on_ref.dtype)
        off_ref[0] = (out[tq:] + x1).astype(off_ref.dtype)


# --------------------------------------------------------------------------- #
# Wrapper
# --------------------------------------------------------------------------- #
def conformer_block_head(x, sequence_mask, params, *, num_heads,
                         row_tile=256, q_tile=256, kv_tile=256):
    """x: [B, N, C+R, F]; sequence_mask: [B, N, C+R] bool (True = valid).
    The online branch uses the chunk-causal attention mask implied by the
    [B, N, C+R, F] layout (frames of chunk n may attend to chunks <= n).
    Returns (on_out, off_out), each [B, T, F] float32.

    Defaults (256 tiles) target the 256-wide MXU of v6e/v7x; use 128 tiles on
    v5e.  For the tile-classification fast path, prefer q_tile/kv_tile that
    are multiples of C+R.  Keep B * (T/q_tile) even on v7x so both
    TensorCores stay busy."""
    B, N, CR, F = x.shape
    T = N * CR
    assert F % num_heads == 0
    d = F // num_heads

    row_tile = min(row_tile, T)
    q_tile = min(q_tile, T)
    kv_tile = min(kv_tile, T)
    assert T % row_tile == 0 and T % q_tile == 0 and T % kv_tile == 0
    assert row_tile % 8 == 0 and q_tile % 8 == 0
    assert kv_tile == T or kv_tile % 128 == 0

    x2 = x.reshape(B, T, F)                      # keep input dtype; cast in-kernel
    seq_mask = sequence_mask.reshape(B, T)
    key_bias = jnp.where(seq_mask, 0.0, NEG_INF).astype(jnp.float32).reshape(B, 1, T)
    chunk_id = (jnp.arange(T, dtype=jnp.int32) // CR).astype(jnp.int32)
    chunk_row = chunk_id.reshape(T, 1)
    chunk_col = chunk_id.reshape(1, T)

    # weights: bf16 for MXU operands, f32 for LN weights / biases.
    bf = lambda a: a.astype(jnp.bfloat16)
    ln1_w, ln1_b = params["ln1_w"], params["ln1_b"]
    ff_w1, ff_b1 = bf(params["ff_w1"]), params["ff_b1"]
    ff_w2, ff_b2 = bf(params["ff_w2"]), params["ff_b2"]
    ln2_w, ln2_b = params["ln2_w"], params["ln2_b"]
    wqkv, bqkv = bf(params["wqkv"]), params["bqkv"]
    wo, bo = bf(params["wo"]), params["bo"]

    # ---- kernel A: row-wise projector ----
    nt = T // row_tile

    def wspec2(a):
        return pl.BlockSpec(a.shape, lambda b, t, _n=a.ndim: (0,) * _n)

    proj_in_specs = [pl.BlockSpec((1, row_tile, F), lambda b, t: (b, t, 0))] + [
        wspec2(a) for a in (ln1_w, ln1_b, ff_w1, ff_b1, ff_w2, ff_b2,
                            ln2_w, ln2_b, wqkv, bqkv)]
    qkv_spec = pl.BlockSpec((1, num_heads, row_tile, d), lambda b, t: (b, 0, t, 0))
    proj_out_specs = (
        pl.BlockSpec((1, row_tile, F), lambda b, t: (b, t, 0)),
        qkv_spec, qkv_spec, qkv_spec,
    )
    proj_out_shape = (
        jax.ShapeDtypeStruct((B, T, F), jnp.float32),
        jax.ShapeDtypeStruct((B, num_heads, T, d), jnp.bfloat16),
        jax.ShapeDtypeStruct((B, num_heads, T, d), jnp.bfloat16),
        jax.ShapeDtypeStruct((B, num_heads, T, d), jnp.bfloat16),
    )
    x1, q, k, v = pl.pallas_call(
        functools.partial(projector_kernel, num_heads=num_heads,
                          q_scale=1.0 / (d ** 0.5)),
        grid=(B, nt),
        in_specs=proj_in_specs,
        out_specs=proj_out_specs,
        out_shape=proj_out_shape,
        compiler_params=pltpu.CompilerParams(
            dimension_semantics=("parallel", "parallel"),
            vmem_limit_bytes=VMEM_LIMIT),
    )(x2, ln1_w, ln1_b, ff_w1, ff_b1, ff_w2, ff_b2, ln2_w, ln2_b, wqkv, bqkv)

    # ---- kernel B: unified online/offline attention ----
    nq, nk = T // q_tile, T // kv_tile

    def wspec3(a):
        return pl.BlockSpec(a.shape, lambda b, qt, kt, _n=a.ndim: (0,) * _n)

    attn_in_specs = [
        pl.BlockSpec((1, num_heads, q_tile, d), lambda b, qt, kt: (b, 0, qt, 0)),   # q
        pl.BlockSpec((1, num_heads, kv_tile, d), lambda b, qt, kt: (b, 0, kt, 0)),  # k
        pl.BlockSpec((1, num_heads, kv_tile, d), lambda b, qt, kt: (b, 0, kt, 0)),  # v
        pl.BlockSpec((1, q_tile, F), lambda b, qt, kt: (b, qt, 0)),                 # x1
        pl.BlockSpec((1, 1, kv_tile), lambda b, qt, kt: (b, 0, kt)),                # key bias
        pl.BlockSpec((q_tile, 1), lambda b, qt, kt: (qt, 0)),                       # chunk row-id
        pl.BlockSpec((1, kv_tile), lambda b, qt, kt: (0, kt)),                      # chunk col-id
        wspec3(wo), wspec3(bo),
    ]
    attn_out_specs = (
        pl.BlockSpec((1, q_tile, F), lambda b, qt, kt: (b, qt, 0)),
        pl.BlockSpec((1, q_tile, F), lambda b, qt, kt: (b, qt, 0)),
    )
    attn_out_shape = (
        jax.ShapeDtypeStruct((B, T, F), jnp.float32),
        jax.ShapeDtypeStruct((B, T, F), jnp.float32),
    )
    scratch = [
        pltpu.VMEM((num_heads, q_tile, 1), jnp.float32),   # running max (shared)
        pltpu.VMEM((num_heads, q_tile, 1), jnp.float32),   # l_on
        pltpu.VMEM((num_heads, q_tile, 1), jnp.float32),   # l_off
        pltpu.VMEM((num_heads, q_tile, d), jnp.float32),   # acc_on
        pltpu.VMEM((num_heads, q_tile, d), jnp.float32),   # acc_off
    ]
    on, off = pl.pallas_call(
        functools.partial(attention_kernel, num_heads=num_heads,
                          chunk_frames=CR),
        grid=(B, nq, nk),
        in_specs=attn_in_specs,
        out_specs=attn_out_specs,
        out_shape=attn_out_shape,
        scratch_shapes=scratch,
        compiler_params=pltpu.CompilerParams(
            dimension_semantics=("parallel", "parallel", "arbitrary"),
            vmem_limit_bytes=VMEM_LIMIT),
    )(q, k, v, x1, key_bias, chunk_row, chunk_col, wo, bo)
    return on, off


def make_params(key, F, ff_dim):
    """Deterministic synthetic weights (f32 masters). Linear weights stored
    pre-transposed (in_features, out_features); biases as (1, out_features)."""
    ks = jax.random.split(key, 6)
    s = 0.05
    return {
        "ln1_w": jnp.ones((1, F), jnp.float32),
        "ln1_b": jnp.zeros((1, F), jnp.float32),
        "ff_w1": s * jax.random.normal(ks[0], (F, ff_dim), jnp.float32),
        "ff_b1": jnp.zeros((1, ff_dim), jnp.float32),
        "ff_w2": s * jax.random.normal(ks[1], (ff_dim, F), jnp.float32),
        "ff_b2": jnp.zeros((1, F), jnp.float32),
        "ln2_w": jnp.ones((1, F), jnp.float32),
        "ln2_b": jnp.zeros((1, F), jnp.float32),
        "wqkv": s * jax.random.normal(ks[2], (F, 3 * F), jnp.float32),
        "bqkv": jnp.zeros((1, 3 * F), jnp.float32),
        "wo": s * jax.random.normal(ks[3], (F, F), jnp.float32),
        "bo": jnp.zeros((1, F), jnp.float32),
    }


def reference(x, sequence_mask, attn_mask, params, *, num_heads):
    """Pure-JAX f32 reference mirroring the PyTorch forward (dropout = identity)."""
    B, N, CR, F = x.shape
    T = N * CR
    x = x.reshape(B, T, F).astype(jnp.float32)
    mask = sequence_mask.reshape(B, T)

    y = _layer_norm(x, params["ln1_w"], params["ln1_b"])
    h = y @ params["ff_w1"] + params["ff_b1"]
    h = h * jax.nn.sigmoid(h)
    x = 0.5 * (h @ params["ff_w2"] + params["ff_b2"]) + x

    y = _layer_norm(x, params["ln2_w"], params["ln2_b"])
    qkv = y @ params["wqkv"] + params["bqkv"]
    d = F // num_heads
    q = qkv[..., :F].reshape(B, T, num_heads, d)
    k = qkv[..., F:2 * F].reshape(B, T, num_heads, d)
    v = qkv[..., 2 * F:].reshape(B, T, num_heads, d)
    s = jnp.einsum("bthd,bshd->bhts", q, k) / (d ** 0.5)
    key_bias = jnp.where(mask, 0.0, NEG_INF)[:, None, None, :]
    attn_bias = jnp.zeros((T, T)) if attn_mask is None else jnp.where(attn_mask, 0.0, NEG_INF)
    p_on = jax.nn.softmax(s + attn_bias[None, None] + key_bias, axis=-1)
    p_off = jax.nn.softmax(s + key_bias, axis=-1)
    on = jnp.einsum("bhts,bshd->bthd", p_on, v).reshape(B, T, F) @ params["wo"] + params["bo"]
    off = jnp.einsum("bhts,bshd->bthd", p_off, v).reshape(B, T, F) @ params["wo"] + params["bo"]
    return on + x, off + x


if __name__ == "__main__":
    B, N, C, R, F = 2, 8, 24, 8, 256
    CR = C + R                     # 32 frames per extended chunk
    T = N * CR                     # 256
    FF_DIM = 512
    NUM_HEADS = 2                  # d_head = 128 (lane-aligned head slices)

    key = jax.random.PRNGKey(0)
    kx, kp = jax.random.split(key)
    x = jax.random.normal(kx, (B, N, CR, F), jnp.float32)

    # sequence mask: True = valid frame; batch 1 has the last 20 frames padded.
    seq_mask = jnp.ones((B, N, CR), dtype=bool)
    seq_mask = seq_mask.at[1, -1, -20:].set(False)

    params = make_params(kp, F, FF_DIM)

    # f32 reference with the chunk-causal online attention mask.
    chunk_id = jnp.arange(T) // CR
    attn_mask = chunk_id[:, None] >= chunk_id[None, :]
    on_ref, off_ref = reference(x, seq_mask, attn_mask, params, num_heads=NUM_HEADS)

    # Two configurations:
    #  * 128 tiles: grid (B,2,2) -> exercises all three chunk-tile classes
    #    (fully allowed / fully disallowed / mixed) of the fast path.
    #  * defaults (256 tiles): the v6e/v7x MXU-filling configuration.
    for tiles in (dict(row_tile=128, q_tile=128, kv_tile=128), dict()):
        on_out, off_out = conformer_block_head(
            x, seq_mask, params, num_heads=NUM_HEADS, **tiles)
        jax.block_until_ready((on_out, off_out))

        assert on_out.shape == (B, T, F) and off_out.shape == (B, T, F)
        # bf16 matmuls (f32 accumulate) vs an all-f32 reference -> relaxed tol.
        assert jnp.allclose(on_out, on_ref, atol=5e-2, rtol=5e-2), \
            float(jnp.max(jnp.abs(on_out - on_ref)))
        assert jnp.allclose(off_out, off_ref, atol=5e-2, rtol=5e-2), \
            float(jnp.max(jnp.abs(off_out - off_ref)))

    print("KERNEL_OK")
</pallas_src>

<mosaic_0001>
module attributes {stable_mosaic.version = 11 : i64} {
  func.func @projector_kernel(%arg0: i32, %arg1: i32, %arg2: memref<1x128x256xf32, #tpu.memory_space<vmem>>, %arg3: memref<1x256xf32, #tpu.memory_space<vmem>>, %arg4: memref<1x256xf32, #tpu.memory_space<vmem>>, %arg5: memref<256x512xbf16, #tpu.memory_space<vmem>>, %arg6: memref<1x512xf32, #tpu.memory_space<vmem>>, %arg7: memref<512x256xbf16, #tpu.memory_space<vmem>>, %arg8: memref<1x256xf32, #tpu.memory_space<vmem>>, %arg9: memref<1x256xf32, #tpu.memory_space<vmem>>, %arg10: memref<1x256xf32, #tpu.memory_space<vmem>>, %arg11: memref<256x768xbf16, #tpu.memory_space<vmem>>, %arg12: memref<1x768xf32, #tpu.memory_space<vmem>>, %arg13: memref<1x128x256xf32, #tpu.memory_space<vmem>>, %arg14: memref<1x2x128x128xbf16, #tpu.memory_space<vmem>>, %arg15: memref<1x2x128x128xbf16, #tpu.memory_space<vmem>>, %arg16: memref<1x2x128x128xbf16, #tpu.memory_space<vmem>>) attributes {dimension_semantics = [#tpu.dimension_semantics<parallel>, #tpu.dimension_semantics<parallel>], iteration_bounds = array<i64: 2, 2>, scalar_prefetch = 0 : i64, scratch_operands = 0 : i64, tpu.core_type = #tpu.core_type<tc>, window_params = [{transform_indices = @transform_0, window_bounds = array<i64: 1, 128, 256>}, {pipeline_mode = #tpu.pipeline_mode<synchronous>, transform_indices = @transform_1, window_bounds = array<i64: 1, 256>}, {pipeline_mode = #tpu.pipeline_mode<synchronous>, transform_indices = @transform_2, window_bounds = array<i64: 1, 256>}, {pipeline_mode = #tpu.pipeline_mode<synchronous>, transform_indices = @transform_3, window_bounds = array<i64: 256, 512>}, {pipeline_mode = #tpu.pipeline_mode<synchronous>, transform_indices = @transform_4, window_bounds = array<i64: 1, 512>}, {pipeline_mode = #tpu.pipeline_mode<synchronous>, transform_indices = @transform_5, window_bounds = array<i64: 512, 256>}, {pipeline_mode = #tpu.pipeline_mode<synchronous>, transform_indices = @transform_6, window_bounds = array<i64: 1, 256>}, {pipeline_mode = #tpu.pipeline_mode<synchronous>, transform_indices = @transform_7, window_bounds = array<i64: 1, 256>}, {pipeline_mode = #tpu.pipeline_mode<synchronous>, transform_indices = @transform_8, window_bounds = array<i64: 1, 256>}, {pipeline_mode = #tpu.pipeline_mode<synchronous>, transform_indices = @transform_9, window_bounds = array<i64: 256, 768>}, {pipeline_mode = #tpu.pipeline_mode<synchronous>, transform_indices = @transform_10, window_bounds = array<i64: 1, 768>}, {transform_indices = @transform_11, window_bounds = array<i64: 1, 128, 256>}, {transform_indices = @transform_12, window_bounds = array<i64: 1, 2, 128, 128>}, {transform_indices = @transform_13, window_bounds = array<i64: 1, 2, 128, 128>}, {transform_indices = @transform_14, window_bounds = array<i64: 1, 2, 128, 128>}]} {
    %c0 = arith.constant 0 : index
    %c0_0 = arith.constant 0 : index
    %c0_1 = arith.constant 0 : index
    %0 = vector.load %arg2[%c0, %c0_0, %c0_1] : memref<1x128x256xf32, #tpu.memory_space<vmem>>, vector<1x128x256xf32>
    %1 = vector.shape_cast %0 : vector<1x128x256xf32> to vector<128x256xf32>
    %c0_2 = arith.constant 0 : index
    %c0_3 = arith.constant 0 : index
    %2 = vector.load %arg3[%c0_2, %c0_3] : memref<1x256xf32, #tpu.memory_space<vmem>>, vector<1x256xf32>
    %c0_4 = arith.constant 0 : index
    %c0_5 = arith.constant 0 : index
    %3 = vector.load %arg4[%c0_4, %c0_5] : memref<1x256xf32, #tpu.memory_space<vmem>>, vector<1x256xf32>
    %cst = arith.constant dense<0.000000e+00> : vector<128xf32>
    %4 = vector.multi_reduction <add>, %1, %cst [1] : vector<128x256xf32> to vector<128xf32>
    %5 = vector.shape_cast %4 : vector<128xf32> to vector<128x1xf32>
    %cst_6 = arith.constant 2.560000e+02 : f32
    %6 = vector.broadcast %cst_6 : f32 to vector<128x1xf32>
    %7 = arith.divf %5, %6 : vector<128x1xf32>
    %8 = vector.broadcast %7 : vector<128x1xf32> to vector<128x256xf32>
    %9 = arith.subf %1, %8 : vector<128x256xf32>
    %10 = arith.mulf %9, %9 : vector<128x256xf32>
    %cst_7 = arith.constant dense<0.000000e+00> : vector<128xf32>
    %11 = vector.multi_reduction <add>, %10, %cst_7 [1] : vector<128x256xf32> to vector<128xf32>
    %12 = vector.shape_cast %11 : vector<128xf32> to vector<128x1xf32>
    %cst_8 = arith.constant 2.560000e+02 : f32
    %13 = vector.broadcast %cst_8 : f32 to vector<128x1xf32>
    %14 = arith.divf %12, %13 : vector<128x1xf32>
    %cst_9 = arith.constant 9.99999974E-6 : f32
    %15 = vector.broadcast %cst_9 : f32 to vector<128x1xf32>
    %16 = arith.addf %14, %15 : vector<128x1xf32>
    %17 = math.rsqrt %16 : vector<128x1xf32>
    %18 = vector.broadcast %17 : vector<128x1xf32> to vector<128x256xf32>
    %19 = arith.mulf %9, %18 : vector<128x256xf32>
    %20 = vector.broadcast %2 : vector<1x256xf32> to vector<128x256xf32>
    %21 = arith.mulf %19, %20 : vector<128x256xf32>
    %22 = vector.broadcast %3 : vector<1x256xf32> to vector<128x256xf32>
    %23 = arith.addf %21, %22 : vector<128x256xf32>
    %24 = arith.truncf %23 : vector<128x256xf32> to vector<128x256xbf16>
    %c0_10 = arith.constant 0 : index
    %c0_11 = arith.constant 0 : index
    %25 = vector.load %arg5[%c0_10, %c0_11] : memref<256x512xbf16, #tpu.memory_space<vmem>>, vector<256x512xbf16>
    %cst_12 = arith.constant dense<0.000000e+00> : vector<128x512xf32>
    %26 = tpu.matmul %24, %25, %cst_12 {dimension_numbers = #tpu.dot_dimension_numbers<[1], [0], [0], [1], [0, 0, 1, 1], [], []>} : vector<128x256xbf16>, vector<256x512xbf16>, vector<128x512xf32> -> vector<128x512xf32>
    %c0_13 = arith.constant 0 : index
    %c0_14 = arith.constant 0 : index
    %27 = vector.load %arg6[%c0_13, %c0_14] : memref<1x512xf32, #tpu.memory_space<vmem>>, vector<1x512xf32>
    %28 = vector.broadcast %27 : vector<1x512xf32> to vector<128x512xf32>
    %29 = arith.addf %26, %28 : vector<128x512xf32>
    %30 = arith.negf %29 : vector<128x512xf32>
    %31 = math.exp %30 : vector<128x512xf32>
    %cst_15 = arith.constant 1.000000e+00 : f32
    %32 = vector.broadcast %cst_15 : f32 to vector<128x512xf32>
    %33 = arith.addf %32, %31 : vector<128x512xf32>
    %34 = arith.divf %32, %33 : vector<128x512xf32>
    %35 = arith.mulf %29, %34 : vector<128x512xf32>
    %36 = arith.truncf %35 : vector<128x512xf32> to vector<128x512xbf16>
    %c0_16 = arith.constant 0 : index
    %c0_17 = arith.constant 0 : index
    %37 = vector.load %arg7[%c0_16, %c0_17] : memref<512x256xbf16, #tpu.memory_space<vmem>>, vector<512x256xbf16>
    %cst_18 = arith.constant dense<0.000000e+00> : vector<128x256xf32>
    %38 = tpu.matmul %36, %37, %cst_18 {dimension_numbers = #tpu.dot_dimension_numbers<[1], [0], [0], [1], [0, 0, 1, 1], [], []>} : vector<128x512xbf16>, vector<512x256xbf16>, vector<128x256xf32> -> vector<128x256xf32>
    %c0_19 = arith.constant 0 : index
    %c0_20 = arith.constant 0 : index
    %39 = vector.load %arg8[%c0_19, %c0_20] : memref<1x256xf32, #tpu.memory_space<vmem>>, vector<1x256xf32>
    %40 = vector.broadcast %39 : vector<1x256xf32> to vector<128x256xf32>
    %41 = arith.addf %38, %40 : vector<128x256xf32>
    %cst_21 = arith.constant 5.000000e-01 : f32
    %42 = vector.broadcast %cst_21 : f32 to vector<128x256xf32>
    %43 = arith.mulf %42, %41 : vector<128x256xf32>
    %44 = arith.addf %43, %1 : vector<128x256xf32>
    %c0_22 = arith.constant 0 : index
    %c0_23 = arith.constant 0 : index
    %c0_24 = arith.constant 0 : index
    %45 = vector.load %arg13[%c0_22, %c0_23, %c0_24] : memref<1x128x256xf32, #tpu.memory_space<vmem>>, vector<1x128x256xf32>
    %46 = vector.shape_cast %45 : vector<1x128x256xf32> to vector<128x256xf32>
    %47 = vector.shape_cast %44 : vector<128x256xf32> to vector<1x128x256xf32>
    tpu.vector_store %arg13[%c0_22, %c0_23, %c0_24], %47 {strides = array<i32>} : memref<1x128x256xf32, #tpu.memory_space<vmem>>, vector<1x128x256xf32>,
    %c0_25 = arith.constant 0 : index
    %c0_26 = arith.constant 0 : index
    %48 = vector.load %arg9[%c0_25, %c0_26] : memref<1x256xf32, #tpu.memory_space<vmem>>, vector<1x256xf32>
    %c0_27 = arith.constant 0 : index
    %c0_28 = arith.constant 0 : index
    %49 = vector.load %arg10[%c0_27, %c0_28] : memref<1x256xf32, #tpu.memory_space<vmem>>, vector<1x256xf32>
    %cst_29 = arith.constant dense<0.000000e+00> : vector<128xf32>
    %50 = vector.multi_reduction <add>, %44, %cst_29 [1] : vector<128x256xf32> to vector<128xf32>
    %51 = vector.shape_cast %50 : vector<128xf32> to vector<128x1xf32>
    %cst_30 = arith.constant 2.560000e+02 : f32
    %52 = vector.broadcast %cst_30 : f32 to vector<128x1xf32>
    %53 = arith.divf %51, %52 : vector<128x1xf32>
    %54 = vector.broadcast %53 : vector<128x1xf32> to vector<128x256xf32>
    %55 = arith.subf %44, %54 : vector<128x256xf32>
    %56 = arith.mulf %55, %55 : vector<128x256xf32>
    %cst_31 = arith.constant dense<0.000000e+00> : vector<128xf32>
    %57 = vector.multi_reduction <add>, %56, %cst_31 [1] : vector<128x256xf32> to vector<128xf32>
    %58 = vector.shape_cast %57 : vector<128xf32> to vector<128x1xf32>
    %cst_32 = arith.constant 2.560000e+02 : f32
    %59 = vector.broadcast %cst_32 : f32 to vector<128x1xf32>
    %60 = arith.divf %58, %59 : vector<128x1xf32>
    %cst_33 = arith.constant 9.99999974E-6 : f32
    %61 = vector.broadcast %cst_33 : f32 to vector<128x1xf32>
    %62 = arith.addf %60, %61 : vector<128x1xf32>
    %63 = math.rsqrt %62 : vector<128x1xf32>
    %64 = vector.broadcast %63 : vector<128x1xf32> to vector<128x256xf32>
    %65 = arith.mulf %55, %64 : vector<128x256xf32>
    %66 = vector.broadcast %48 : vector<1x256xf32> to vector<128x256xf32>
    %67 = arith.mulf %65, %66 : vector<128x256xf32>
    %68 = vector.broadcast %49 : vector<1x256xf32> to vector<128x256xf32>
    %69 = arith.addf %67, %68 : vector<128x256xf32>
    %70 = arith.truncf %69 : vector<128x256xf32> to vector<128x256xbf16>
    %c0_34 = arith.constant 0 : index
    %c0_35 = arith.constant 0 : index
    %71 = vector.load %arg11[%c0_34, %c0_35] : memref<256x768xbf16, #tpu.memory_space<vmem>>, vector<256x768xbf16>
    %cst_36 = arith.constant dense<0.000000e+00> : vector<128x768xf32>
    %72 = tpu.matmul %70, %71, %cst_36 {dimension_numbers = #tpu.dot_dimension_numbers<[1], [0], [0], [1], [0, 0, 1, 1], [], []>} : vector<128x256xbf16>, vector<256x768xbf16>, vector<128x768xf32> -> vector<128x768xf32>
    %c0_37 = arith.constant 0 : index
    %c0_38 = arith.constant 0 : index
    %73 = vector.load %arg12[%c0_37, %c0_38] : memref<1x768xf32, #tpu.memory_space<vmem>>, vector<1x768xf32>
    %74 = vector.broadcast %73 : vector<1x768xf32> to vector<128x768xf32>
    %75 = arith.addf %72, %74 : vector<128x768xf32>
    %76 = vector.extract_strided_slice %75 {offsets = [0, 0], sizes = [128, 256], strides = [1, 1]} : vector<128x768xf32> to vector<128x256xf32>
    %cst_39 = arith.constant 0.0883883461 : f32
    %77 = vector.broadcast %cst_39 : f32 to vector<128x256xf32>
    %78 = arith.mulf %76, %77 : vector<128x256xf32>
    %79 = arith.truncf %78 : vector<128x256xf32> to vector<128x256xbf16>
    %80 = vector.extract_strided_slice %75 {offsets = [0, 256], sizes = [128, 256], strides = [1, 1]} : vector<128x768xf32> to vector<128x256xf32>
    %81 = arith.truncf %80 : vector<128x256xf32> to vector<128x256xbf16>
    %82 = vector.extract_strided_slice %75 {offsets = [0, 512], sizes = [128, 256], strides = [1, 1]} : vector<128x768xf32> to vector<128x256xf32>
    %83 = arith.truncf %82 : vector<128x256xf32> to vector<128x256xbf16>
    %84 = vector.extract_strided_slice %79 {offsets = [0, 0], sizes = [128, 128], strides = [1, 1]} : vector<128x256xbf16> to vector<128x128xbf16>
    %c0_40 = arith.constant 0 : index
    %c0_41 = arith.constant 0 : index
    %c0_42 = arith.constant 0 : index
    %c0_43 = arith.constant 0 : index
    %85 = vector.load %arg14[%c0_40, %c0_41, %c0_42, %c0_43] : memref<1x2x128x128xbf16, #tpu.memory_space<vmem>>, vector<1x1x128x128xbf16>
    %86 = vector.shape_cast %85 : vector<1x1x128x128xbf16> to vector<128x128xbf16>
    %87 = vector.shape_cast %84 : vector<128x128xbf16> to vector<1x1x128x128xbf16>
    tpu.vector_store %arg14[%c0_40, %c0_41, %c0_42, %c0_43], %87 {strides = array<i32>} : memref<1x2x128x128xbf16, #tpu.memory_space<vmem>>, vector<1x1x128x128xbf16>,
    %88 = vector.extract_strided_slice %81 {offsets = [0, 0], sizes = [128, 128], strides = [1, 1]} : vector<128x256xbf16> to vector<128x128xbf16>
    %c0_44 = arith.constant 0 : index
    %c0_45 = arith.constant 0 : index
    %c0_46 = arith.constant 0 : index
    %c0_47 = arith.constant 0 : index
    %89 = vector.load %arg15[%c0_44, %c0_45, %c0_46, %c0_47] : memref<1x2x128x128xbf16, #tpu.memory_space<vmem>>, vector<1x1x128x128xbf16>
    %90 = vector.shape_cast %89 : vector<1x1x128x128xbf16> to vector<128x128xbf16>
    %91 = vector.shape_cast %88 : vector<128x128xbf16> to vector<1x1x128x128xbf16>
    tpu.vector_store %arg15[%c0_44, %c0_45, %c0_46, %c0_47], %91 {strides = array<i32>} : memref<1x2x128x128xbf16, #tpu.memory_space<vmem>>, vector<1x1x128x128xbf16>,
    %92 = vector.extract_strided_slice %83 {offsets = [0, 0], sizes = [128, 128], strides = [1, 1]} : vector<128x256xbf16> to vector<128x128xbf16>
    %c0_48 = arith.constant 0 : index
    %c0_49 = arith.constant 0 : index
    %c0_50 = arith.constant 0 : index
    %c0_51 = arith.constant 0 : index
    %93 = vector.load %arg16[%c0_48, %c0_49, %c0_50, %c0_51] : memref<1x2x128x128xbf16, #tpu.memory_space<vmem>>, vector<1x1x128x128xbf16>
    %94 = vector.shape_cast %93 : vector<1x1x128x128xbf16> to vector<128x128xbf16>
    %95 = vector.shape_cast %92 : vector<128x128xbf16> to vector<1x1x128x128xbf16>
    tpu.vector_store %arg16[%c0_48, %c0_49, %c0_50, %c0_51], %95 {strides = array<i32>} : memref<1x2x128x128xbf16, #tpu.memory_space<vmem>>, vector<1x1x128x128xbf16>,
    %96 = vector.extract_strided_slice %79 {offsets = [0, 128], sizes = [128, 128], strides = [1, 1]} : vector<128x256xbf16> to vector<128x128xbf16>
    %c0_52 = arith.constant 0 : index
    %c1 = arith.constant 1 : index
    %c0_53 = arith.constant 0 : index
    %c0_54 = arith.constant 0 : index
    %97 = vector.load %arg14[%c0_52, %c1, %c0_53, %c0_54] : memref<1x2x128x128xbf16, #tpu.memory_space<vmem>>, vector<1x1x128x128xbf16>
    %98 = vector.shape_cast %97 : vector<1x1x128x128xbf16> to vector<128x128xbf16>
    %99 = vector.shape_cast %96 : vector<128x128xbf16> to vector<1x1x128x128xbf16>
    tpu.vector_store %arg14[%c0_52, %c1, %c0_53, %c0_54], %99 {strides = array<i32>} : memref<1x2x128x128xbf16, #tpu.memory_space<vmem>>, vector<1x1x128x128xbf16>,
    %100 = vector.extract_strided_slice %81 {offsets = [0, 128], sizes = [128, 128], strides = [1, 1]} : vector<128x256xbf16> to vector<128x128xbf16>
    %c0_55 = arith.constant 0 : index
    %c1_56 = arith.constant 1 : index
    %c0_57 = arith.constant 0 : index
    %c0_58 = arith.constant 0 : index
    %101 = vector.load %arg15[%c0_55, %c1_56, %c0_57, %c0_58] : memref<1x2x128x128xbf16, #tpu.memory_space<vmem>>, vector<1x1x128x128xbf16>
    %102 = vector.shape_cast %101 : vector<1x1x128x128xbf16> to vector<128x128xbf16>
    %103 = vector.shape_cast %100 : vector<128x128xbf16> to vector<1x1x128x128xbf16>
    tpu.vector_store %arg15[%c0_55, %c1_56, %c0_57, %c0_58], %103 {strides = array<i32>} : memref<1x2x128x128xbf16, #tpu.memory_space<vmem>>, vector<1x1x128x128xbf16>,
    %104 = vector.extract_strided_slice %83 {offsets = [0, 128], sizes = [128, 128], strides = [1, 1]} : vector<128x256xbf16> to vector<128x128xbf16>
    %c0_59 = arith.constant 0 : index
    %c1_60 = arith.constant 1 : index
    %c0_61 = arith.constant 0 : index
    %c0_62 = arith.constant 0 : index
    %105 = vector.load %arg16[%c0_59, %c1_60, %c0_61, %c0_62] : memref<1x2x128x128xbf16, #tpu.memory_space<vmem>>, vector<1x1x128x128xbf16>
    %106 = vector.shape_cast %105 : vector<1x1x128x128xbf16> to vector<128x128xbf16>
    %107 = vector.shape_cast %104 : vector<128x128xbf16> to vector<1x1x128x128xbf16>
    tpu.vector_store %arg16[%c0_59, %c1_60, %c0_61, %c0_62], %107 {strides = array<i32>} : memref<1x2x128x128xbf16, #tpu.memory_space<vmem>>, vector<1x1x128x128xbf16>,
    return
  }
  func.func @transform_0(%arg0: i32, %arg1: i32) -> (i32, i32, i32) {
    %c0_i32 = arith.constant 0 : i32
    %c0_i32_0 = arith.constant 0 : i32
    return %arg0, %arg1, %c0_i32 : i32, i32, i32
  }
  func.func @transform_1(%arg0: i32, %arg1: i32) -> (i32, i32) {
    %c0_i32 = arith.constant 0 : i32
    %c0_i32_0 = arith.constant 0 : i32
    %c0_i32_1 = arith.constant 0 : i32
    return %c0_i32, %c0_i32_0 : i32, i32
  }
  func.func @transform_2(%arg0: i32, %arg1: i32) -> (i32, i32) {
    %c0_i32 = arith.constant 0 : i32
    %c0_i32_0 = arith.constant 0 : i32
    %c0_i32_1 = arith.constant 0 : i32
    return %c0_i32, %c0_i32_0 : i32, i32
  }
  func.func @transform_3(%arg0: i32, %arg1: i32) -> (i32, i32) {
    %c0_i32 = arith.constant 0 : i32
    %c0_i32_0 = arith.constant 0 : i32
    %c0_i32_1 = arith.constant 0 : i32
    return %c0_i32, %c0_i32_0 : i32, i32
  }
  func.func @transform_4(%arg0: i32, %arg1: i32) -> (i32, i32) {
    %c0_i32 = arith.constant 0 : i32
    %c0_i32_0 = arith.constant 0 : i32
    %c0_i32_1 = arith.constant 0 : i32
    return %c0_i32, %c0_i32_0 : i32, i32
  }
  func.func @transform_5(%arg0: i32, %arg1: i32) -> (i32, i32) {
    %c0_i32 = arith.constant 0 : i32
    %c0_i32_0 = arith.constant 0 : i32
    %c0_i32_1 = arith.constant 0 : i32
    return %c0_i32, %c0_i32_0 : i32, i32
  }
  func.func @transform_6(%arg0: i32, %arg1: i32) -> (i32, i32) {
    %c0_i32 = arith.constant 0 : i32
    %c0_i32_0 = arith.constant 0 : i32
    %c0_i32_1 = arith.constant 0 : i32
    return %c0_i32, %c0_i32_0 : i32, i32
  }
  func.func @transform_7(%arg0: i32, %arg1: i32) -> (i32, i32) {
    %c0_i32 = arith.constant 0 : i32
    %c0_i32_0 = arith.constant 0 : i32
    %c0_i32_1 = arith.constant 0 : i32
    return %c0_i32, %c0_i32_0 : i32, i32
  }
  func.func @transform_8(%arg0: i32, %arg1: i32) -> (i32, i32) {
    %c0_i32 = arith.constant 0 : i32
    %c0_i32_0 = arith.constant 0 : i32
    %c0_i32_1 = arith.constant 0 : i32
    return %c0_i32, %c0_i32_0 : i32, i32
  }
  func.func @transform_9(%arg0: i32, %arg1: i32) -> (i32, i32) {
    %c0_i32 = arith.constant 0 : i32
    %c0_i32_0 = arith.constant 0 : i32
    %c0_i32_1 = arith.constant 0 : i32
    return %c0_i32, %c0_i32_0 : i32, i32
  }
  func.func @transform_10(%arg0: i32, %arg1: i32) -> (i32, i32) {
    %c0_i32 = arith.constant 0 : i32
    %c0_i32_0 = arith.constant 0 : i32
    %c0_i32_1 = arith.constant 0 : i32
    return %c0_i32, %c0_i32_0 : i32, i32
  }
  func.func @transform_11(%arg0: i32, %arg1: i32) -> (i32, i32, i32) {
    %c0_i32 = arith.constant 0 : i32
    %c0_i32_0 = arith.constant 0 : i32
    return %arg0, %arg1, %c0_i32 : i32, i32, i32
  }
  func.func @transform_12(%arg0: i32, %arg1: i32) -> (i32, i32, i32, i32) {
    %c0_i32 = arith.constant 0 : i32
    %c0_i32_0 = arith.constant 0 : i32
    %c0_i32_1 = arith.constant 0 : i32
    return %arg0, %c0_i32, %arg1, %c0_i32_0 : i32, i32, i32, i32
  }
  func.func @transform_13(%arg0: i32, %arg1: i32) -> (i32, i32, i32, i32) {
    %c0_i32 = arith.constant 0 : i32
    %c0_i32_0 = arith.constant 0 : i32
    %c0_i32_1 = arith.constant 0 : i32
    return %arg0, %c0_i32, %arg1, %c0_i32_0 : i32, i32, i32, i32
  }
  func.func @transform_14(%arg0: i32, %arg1: i32) -> (i32, i32, i32, i32) {
    %c0_i32 = arith.constant 0 : i32
    %c0_i32_0 = arith.constant 0 : i32
    %c0_i32_1 = arith.constant 0 : i32
    return %arg0, %c0_i32, %arg1, %c0_i32_0 : i32, i32, i32, i32
  }
}

</mosaic_0001>

<bundles_post_ra>
// kernel: tpu_custom_call.1
= control target key start
LH: loop header
LB: loop body
LE: loop exit
PB: predicated region body
PF: predicated region fallthrough
CT: control target
= control target key end

     0   :  { %s9572_s0 = inlined_call_operand.hbm [shape: f32[2,256,256], index: 0, kind: input, shape index: {}]   ;;  %s9573_s1 = inlined_call_operand.hbm [shape: f32[1,256], index: 1, kind: input, shape index: {}]   ;;  %s9574_s2 = inlined_call_operand.hbm [shape: f32[1,256], index: 2, kind: input, shape index: {}]   ;;  %s9575_s3 = inlined_call_operand.hbm [shape: bf16[256,512], index: 3, kind: input, shape index: {}]   ;;  %s9576_s4 = inlined_call_operand.vmem [shape: f32[1,512], index: 4, kind: input, shape index: {}]   ;;  %s9577_s5 = inlined_call_operand.hbm [shape: bf16[512,256], index: 5, kind: input, shape index: {}]   ;;  %s9578_s6 = inlined_call_operand.vmem [shape: f32[1,256], index: 6, kind: input, shape index: {}]   ;;  %s9579_s7 = inlined_call_operand.vmem [shape: f32[1,256], index: 7, kind: input, shape index: {}]   ;;  %s9580_s8 = inlined_call_operand.vmem [shape: f32[1,256], index: 8, kind: input, shape index: {}]   ;;  %s9581_s9 = inlined_call_operand.hbm [shape: bf16[256,768], index: 9, kind: input, shape index: {}]   ;;  %s9582_s10 = inlined_call_operand.vmem [shape: f32[1,768], index: 10, kind: input, shape index: {}]   ;;  %s9583_s11 = inlined_call_operand.hbm [shape: f32[2,256,256], index: 11, kind: output, shape index: {0}]   ;;  %s9584_s12 = inlined_call_operand.hbm [shape: bf16[2,2,256,128], index: 12, kind: output, shape index: {1}]   ;;  %s9585_s13 = inlined_call_operand.hbm [shape: bf16[2,2,256,128], index: 13, kind: output, shape index: {2}]   ;;  %s9586_s14 = inlined_call_operand.hbm [shape: bf16[2,2,256,128], index: 14, kind: output, shape index: {3}]  }
   0x1   :  { %9627 = sst [smem:[#allocation61_spill]] %s9572_s0 }
   0x2   :  { %9628 = sst [smem:[#allocation62_spill]] %s9573_s1 }
   0x3   :  { %9629 = sst [smem:[#allocation63_spill]] %s9574_s2 }
   0x4   :  { %9630 = sst [smem:[#allocation64_spill]] %s9575_s3 }
   0x5   :  { %9631 = sst [smem:[#allocation65_spill]] %s9576_s4 }
   0x6   :  { %9632 = sst [smem:[#allocation66_spill]] %s9577_s5 }
   0x7   :  { %9633 = sst [smem:[#allocation67_spill]] %s9580_s8 }
   0x8   :  { %9634 = sst [smem:[#allocation68_spill]] %s9581_s9 }
   0x9   :  { %9635 = sst [smem:[#allocation69_spill]] %s9582_s10 }
   0xa   :  { %9636 = sst [smem:[#allocation70_spill]] %s9583_s11 }
   0xb   :  { %9637 = sst [smem:[#allocation71_spill]] %s9584_s12 }
   0xc   :  { %9638 = sst [smem:[#allocation72_spill]] %s9585_s13 }
   0xd   :  { %9639 = sst [smem:[#allocation73_spill]] %s9586_s14 }
   0xe   :  { %20 = vsyncpa [#allocation3], 0 }
   0xf   :  { %22 = vsyncpa [#allocation3 + $0x1], 0 }
  0x10   :  { %23 = vsyncpa [#allocation6], 0 }
  0x11   :  { %24 = vsyncpa [#allocation9], 0 }
  0x12   :  { %25 = vsyncpa [#allocation12], 0 }
  0x13   :  { %26 = vsyncpa [#allocation4], 0 }
  0x14   :  { %28 = vsyncpa [#allocation4 + $0x1], 0 }
  0x15   :  { %29 = vsyncpa [#allocation15], 0 }
  0x16   :  { %31 = vsyncpa [#allocation15 + $0x1], 0 }
  0x17   :  { %32 = vsyncpa [#allocation18], 0 }
  0x18   :  { %34 = vsyncpa [#allocation18 + $0x1], 0  ;;  %s7319_s29 = smov 0   ;;  %s7321_s30 = smov 0  }
  0x19   :  { %s7323_s15 = smov 0   ;;  %s7325_s16 = smov 0  }
  0x1a   :  { %s7327_s17 = smov 0   ;;  %s7329_s18 = smov 0  }
  0x1b   :  { %s7331_s19 = smov 0   ;;  %s7333_s20 = smov 0  }
  0x1c LB: > { %9640 = sst [smem:[#allocation32_spill]] %s7190_s16  ;;  %s7360_s21 = sadd.s32 4294967295, %s7206_s20   ;;  %s7206_s20 = sphi %s7333_s20, %s40_s20   ;;  %s7202_s19 = sphi %s7331_s19, %s9771_s19   ;;  %s7198_s18 = sphi %s7329_s18, %s9770_s18   ;;  %s7194_s17 = sphi %s7327_s17, %s9769_s17   ;;  %s7190_s16 = sphi %s7325_s16, %s9768_s16   ;;  %s7186_s15 = sphi %s7323_s15, %s9767_s15   ;;  %s7182_s30 = sphi %s7321_s30, %s9766_s30   ;;  %s7178_s29 = sphi %s7319_s29, %s9765_s29  }
  0x1d   : > { %9641 = sst [smem:[#allocation33_spill]] %s7194_s17  ;;  %p5073_p0 = scmp.ge.s32.totalorder %s7206_s20, 1 }
  0x1e   : > { %p9590_p1 = scmp.eq.s32.totalorder %s7360_s21, 0  ;;  %p407_p2 = scmp.lt.s32.totalorder %s7206_s20, 5 }
  0x1f   : > { %s7208_s23 = smov [#allocation5]   ;;  %s7209_s25 = smov [#allocation8]  }
  0x20   : > { %p7365_p3 = pnand %p5073_p0, %p407_p2  ;;  %s420_s24 = sshll.u32 %s7208_s23, 4  ;;  %s421_s24 = int_to_ptr.vmem [resolvable:$true] %s420_s24 }
  0x21   : > { %s441_s26 = sshll.u32 %s7209_s25, 4  ;;  %s7210_s28 = smov [#allocation7]   ;;  %s7377_s26 = int_to_ptr.vmem [resolvable:$true] %s441_s26 }
  0x22   : > { %s9642_s22 = scalar_select %p7365_p3, 1, 0 }
  0x23   : > { %p6074_p4 = pneg %p7365_p3  ;;  %s7379_s14 = sshll.u32 %s7210_s28, 4  ;;  %s432_s14 = int_to_ptr.vmem [resolvable:$true] %s7379_s14 }
  0x24   : > { %s9644_s1 = sld [smem:[#allocation62_spill]] }
  0x25   : > { %p7373_p5 = pnand %p6074_p4, %p9590_p1 }
  0x27   : > { %p7389_p7 = pneg %p7373_p5 }
  0x2a   : > { %s6918_s23 = scalar_lea.hbm %s9644_s1, 32 }
  0x2b   : > { %p6919_p6 = scmp.ne.s32.totalorder %s9644_s1, %s6918_s23  ;;  %p6925_p10 = scmp.lt.u32.totalorder %s6918_s23, %s9644_s1 }
  0x2d   : > { %p6921_p8 = pnand %p7389_p7, %p6919_p6 }
  0x2f   : > { %p6922_p9 = pneg %p6921_p8 }
  0x31   : > { %p6927_p11 = pnand %p6925_p10, %p6922_p9 }
  0x33   : > { %6930 = shalt.err (!%p6927_p11)
}
  0x34   : > { %s6931_s12 = scalar_lea.vmem %s421_s24, 32  ;;  %p6939_p2 = scmp.lt.s32.totalorder %s421_s24, %s421_s24 }
  0x35   : > { %p6932_p12 = scmp.ne.s32.totalorder %s421_s24, %s6931_s12  ;;  %p6940_p4 = scmp.lt.s32.totalorder %s6931_s12, %s6931_s12 }
  0x37   : > { %p6934_p13 = pnand %p6932_p12, %p7389_p7  ;;  %p6941_p1 = por %p6940_p4, %p6939_p2 }
  0x39   : > { %p6935_p0 = pneg %p6934_p13 }
  0x3b   : > { %p6942_p3 = pnand %p6941_p1, %p6935_p0 }
  0x3d   : > { %6945 = shalt.err (!%p6942_p3)
}
  0x3e   : > { %6077 = dma.hbm_to_vmem [thread:$0]  (!%p7373_p5), %s9644_s1, 32, %s421_s24, [#allocation6]  }
  0x3f   : > { %s9646_s3 = sld [smem:[#allocation64_spill]] }
  0x45   : > { %s6946_s23 = scalar_lea.hbm %s9646_s3, 8192 }
  0x46   : > { %p6947_p6 = scmp.ne.s32.totalorder %s9646_s3, %s6946_s23  ;;  %p6953_p1 = scmp.lt.u32.totalorder %s6946_s23, %s9646_s3 }
  0x48   : > { %p6949_p8 = pnand %p6947_p6, %p7389_p7 }
  0x4a   : > { %p6950_p9 = pneg %p6949_p8 }
  0x4c   : > { %p6955_p3 = pnand %p6953_p1, %p6950_p9 }
  0x4e   : > { %6958 = shalt.err (!%p6955_p3)
}
  0x4f   : > { %s6959_s24 = scalar_lea.vmem %s7377_s26, 8192  ;;  %p6967_p13 = scmp.lt.s32.totalorder %s7377_s26, %s7377_s26 }
  0x50   : > { %p6960_p10 = scmp.ne.s32.totalorder %s7377_s26, %s6959_s24  ;;  %p6968_p0 = scmp.lt.s32.totalorder %s6959_s24, %s6959_s24 }
  0x52   : > { %p6962_p11 = pnand %p6960_p10, %p7389_p7  ;;  %p6969_p2 = por %p6968_p0, %p6967_p13 }
  0x54   : > { %p6963_p12 = pneg %p6962_p11 }
  0x56   : > { %p6970_p4 = pnand %p6969_p2, %p6963_p12 }
  0x58   : > { %6973 = shalt.err (!%p6970_p4)
}
  0x59   : > { %s9592_s10 = smov 256   ;;  %s9593_s8 = smov 16  }
  0x5a   : > { %6083 = dma.hbm_to_vmem [thread:$0]  (!%p7373_p5), %s9646_s3, 8192, %s7377_s26, [#allocation9], %s9592_s10, %s9592_s10, %s9593_s8  }
  0x5b   : > { %s9647_s2 = sld [smem:[#allocation63_spill]] }
  0x61   : > { %s6974_s23 = scalar_lea.hbm %s9647_s2, 32 }
  0x62   : > { %p6975_p6 = scmp.ne.s32.totalorder %s9647_s2, %s6974_s23  ;;  %p6981_p1 = scmp.lt.u32.totalorder %s6974_s23, %s9647_s2 }
  0x64   : > { %p6977_p8 = pnand %p6975_p6, %p7389_p7 }
  0x66   : > { %p6978_p9 = pneg %p6977_p8 }
  0x68   : > { %p6983_p3 = pnand %p6981_p1, %p6978_p9 }
  0x6a   : > { %6986 = shalt.err (!%p6983_p3)
}
  0x6b   : > { %s6987_s11 = scalar_lea.vmem %s432_s14, 32  ;;  %p6995_p13 = scmp.lt.s32.totalorder %s432_s14, %s432_s14 }
  0x6c   : > { %p6988_p10 = scmp.ne.s32.totalorder %s432_s14, %s6987_s11  ;;  %p6996_p0 = scmp.lt.s32.totalorder %s6987_s11, %s6987_s11 }
  0x6e   : > { %p6990_p11 = pnand %p6988_p10, %p7389_p7  ;;  %p6997_p2 = por %p6996_p0, %p6995_p13 }
  0x70   : > { %p6991_p12 = pneg %p6990_p11 }
  0x72   : > { %p6998_p4 = pnand %p6997_p2, %p6991_p12 }
  0x74   : > { %7001 = shalt.err (!%p6998_p4)
}
  0x75   : > { %6080 = dma.hbm_to_vmem [thread:$0]  (!%p7373_p5), %s9647_s2, 32, %s432_s14, [#allocation6]  }
  0x76   : > { %s7213_s1 = smov [#allocation10]   ;;  %s9648_s5 = sld [smem:[#allocation66_spill]] }
  0x77   : > { %s457_s16 = sshll.u32 %s7213_s1, 4  ;;  %s458_s16 = int_to_ptr.vmem [resolvable:$true] %s457_s16 }
  0x7c   : > { %s7002_s28 = scalar_lea.hbm %s9648_s5, 8192 }
  0x7d   : > { %p7003_p6 = scmp.ne.s32.totalorder %s9648_s5, %s7002_s28  ;;  %p7009_p1 = scmp.lt.u32.totalorder %s7002_s28, %s9648_s5 }
  0x7f   : > { %p7005_p8 = pnand %p7003_p6, %p7389_p7 }
  0x81   : > { %p7006_p9 = pneg %p7005_p8 }
  0x83   : > { %p7011_p3 = pnand %p7009_p1, %p7006_p9 }
  0x85   : > { %7014 = shalt.err (!%p7011_p3)
}
  0x86   : > { %s7015_s14 = scalar_lea.vmem %s458_s16, 8192  ;;  %p7023_p13 = scmp.lt.s32.totalorder %s458_s16, %s458_s16 }
  0x87   : > { %p7016_p10 = scmp.ne.s32.totalorder %s458_s16, %s7015_s14  ;;  %p7024_p0 = scmp.lt.s32.totalorder %s7015_s14, %s7015_s14 }
  0x89   : > { %p7018_p11 = pnand %p7016_p10, %p7389_p7  ;;  %p7025_p2 = por %p7024_p0, %p7023_p13 }
  0x8b   : > { %p7019_p12 = pneg %p7018_p11 }
  0x8d   : > { %p7026_p4 = pnand %p7025_p2, %p7019_p12 }
  0x8f   : > { %7029 = shalt.err (!%p7026_p4)
}
  0x90   : > { %s7214_s26 = smov 128   ;;  %s7215_s13 = smov 8  }
  0x91   : > { %6086 = dma.hbm_to_vmem [thread:$0]  (!%p7373_p5), %s9648_s5, 8192, %s458_s16, [#allocation9], %s7214_s26, %s7214_s26, %s7215_s13  }
  0x92   : > { %s7216_s17 = smov [#allocation11]   ;;  %s9649_s9 = sld [smem:[#allocation68_spill]] }
  0x93   : > { %s479_s23 = sshll.u32 %s7216_s17, 4  ;;  %s480_s23 = int_to_ptr.vmem [resolvable:$true] %s479_s23 }
  0x98   : > { %s7030_s24 = scalar_lea.hbm %s9649_s9, 12288 }
  0x99   : > { %p7031_p6 = scmp.ne.s32.totalorder %s9649_s9, %s7030_s24  ;;  %p7037_p1 = scmp.lt.u32.totalorder %s7030_s24, %s9649_s9 }
  0x9b   : > { %p7033_p8 = pnand %p7031_p6, %p7389_p7 }
  0x9d   : > { %p7034_p9 = pneg %p7033_p8 }
  0x9f   : > { %p7039_p3 = pnand %p7037_p1, %p7034_p9 }
  0xa1   : > { %7042 = shalt.err (!%p7039_p3)
}
  0xa2   : > { %s7043_s16 = scalar_lea.vmem %s480_s23, 12288  ;;  %p7051_p13 = scmp.lt.s32.totalorder %s480_s23, %s480_s23 }
  0xa3   : > { %p7044_p10 = scmp.ne.s32.totalorder %s480_s23, %s7043_s16  ;;  %p7052_p0 = scmp.lt.s32.totalorder %s7043_s16, %s7043_s16 }
  0xa5   : > { %p7046_p11 = pnand %p7044_p10, %p7389_p7  ;;  %p7053_p2 = por %p7052_p0, %p7051_p13 }
  0xa7   : > { %p7047_p12 = pneg %p7046_p11 }
  0xa9   : > { %p7054_p4 = pnand %p7053_p2, %p7047_p12 }
  0xab   : > { %7057 = shalt.err (!%p7054_p4)
}
  0xac   : > { %s7217_s26 = smov 384   ;;  %s7218_s2 = smov 24  }
  0xad   : > { %6089 = dma.hbm_to_vmem [thread:$0]  (!%p7373_p5), %s9649_s9, 12288, %s480_s23, [#allocation12], %s7217_s26, %s7217_s26, %s7218_s2  }
  0xae   : > { %s9594_s13 = sadd.s32 4294967294, %s7206_s20   ;;  %s49_s10 = sadd.s32 1, %s7198_s18 }
  0xaf   : > { %s52_s1 = sadd.s32 1, %s7202_s19  ;;  %p50_p7 = scmp.ge.s32.totalorder %s49_s10, 2 }
  0xb0   : > { %s61_s17 = sadd.s32 1, %s7186_s15  ;;  %p68_p6 = scmp.ne.s32.totalorder %s7186_s15, %s7182_s30 }
  0xb1   : > { %p69_p8 = scmp.eq.s32.totalorder %s7206_s20, 0  ;;  %s9773_s10 = smov (%p50_p7, %s49_s10), 0 }
  0xb2   : > { %s9775_s1 = smov (!%p50_p7, %s52_s1), %s7202_s19  ;;  %s57_s27 = ssub.s32 %s7198_s18, %s9773_s10 }
  0xb3   : > { %p7498_p9 = por %p69_p8, %p68_p6  ;;  %p54_p5 = scmp.ge.s32.totalorder %s9775_s1, 2 }
  0xb4   : > { %p74_p1 = scmp.ne.s32.totalorder %s7182_s30, %s7178_s29  ;;  %p310_p3 = scmp.eq.s32.totalorder %s7360_s21, 3 }
  0xb5   : > { %p316_p10 = scmp.eq.s32.totalorder %s9594_s13, 3  ;;  %s9777_s1 = smov (%p54_p5, %s9775_s1), 0 }
  0xb6   : > { %9651 = sst [smem:[#allocation34_spill]] %s9777_s1  ;;  %p9652_p11 = scmp.eq.s32.totalorder %s7360_s21, 0 }
  0xb7   : > { %p7515_p13 = por %p310_p3, %p68_p6  ;;  %s56_s24 = ssub.s32 %s7202_s19, %s9777_s1 }
  0xb8   : > { %p7511_p12 = por %p9652_p11, %p74_p1  ;;  %p7521_p0 = por %p316_p10, %p74_p1 }
  0xb9   : > { %s9654_s12 = scalar_select %p7515_p13, 1, 0 }
  0xba   : > { %s9655_s11 = scalar_select %p7521_p0, 1, 0 }
  0xbb   : > { %s58_s14 = sor.u32 %s57_s27, %s56_s24  ;;  %p6112_p2 = scmp.lt.s32.totalorder %s7206_s20, 4 }
  0xbc   : > { %p59_p4 = scmp.eq.s32.totalorder %s58_s14, 0  ;;  %s496_s16 = sand.u32 1, %s7186_s15  }
  0xbd   : > { %s5080_s26 = sshll.u32 %s496_s16, 8  ;;  %s5547_s25 = sshll.u32 %s7198_s18, 5 }
  0xbe   : > { %s7528_s2 = scalar_select %p59_p4, %s7186_s15, %s61_s17  }
  0xbf   : > { %s5083_s8 = sshll.u32 %s7202_s19, 6  ;;  %s500_s13 = scalar_lea.vmem [#allocation2], %s5080_s26 }
  0xc0   : > { %s510_s3 = sshll.u32 %s500_s13, 4  ;;  %s507_s5 = sadd.s32 %s5547_s25, %s5083_s8  ;;  %s7532_s3 = int_to_ptr.vmem [resolvable:$true] %s510_s3 }
  0xc1   : > { %s5084_s9 = sshll.u32 %s507_s5, 7  ;;  %p7536_p7 = pnand %p6112_p2, %p7498_p9 }
  0xc2   : > { %s9657_s0 = sld [smem:[#allocation61_spill]]  ;;  %s7545_s13 = scalar_lea.sflag [#allocation3], %s496_s16 }
  0xc3   : > { %p7060_p8 = pneg %p7536_p7 }
  0xc8   : > { %s7543_s17 = scalar_lea.hbm %s9657_s0, %s5084_s9  ;;  %s7063_s26 = scalar_lea.hbm %s9657_s0, 16384 }
  0xc9   : > { %s7058_s14 = scalar_lea.hbm %s7543_s17, 4096  ;;  %p7064_p1 = scmp.lt.u32.totalorder %s7543_s17, %s9657_s0 }
  0xca   : > { %p7059_p6 = scmp.ne.s32.totalorder %s7543_s17, %s7058_s14  ;;  %p7065_p3 = scmp.lt.u32.totalorder %s7063_s26, %s7058_s14 }
  0xcb   : > { %p7067_p11 = scmp.lt.u32.totalorder %s7058_s14, %s7543_s17 }
  0xcc   : > { %p7061_p9 = pnand %p7060_p8, %p7059_p6  ;;  %p7066_p10 = por %p7065_p3, %p7064_p1 }
  0xce   : > { %p7062_p5 = pneg %p7061_p9  ;;  %p7068_p2 = por %p7067_p11, %p7066_p10 }
  0xd0   : > { %p7069_p4 = pnand %p7068_p2, %p7062_p5 }
  0xd2   : > { %7072 = shalt.err (!%p7069_p4)
}
  0xd3   : > { %s7073_s16 = scalar_lea.vmem %s7532_s3, 4096  ;;  %s7219_s8 = smov [#allocation2]  }
  0xd4   : > { %p7074_p6 = scmp.ne.s32.totalorder %s7532_s3, %s7073_s16  ;;  %s7078_s27 = sshll.u32 %s7219_s8, 4  ;;  %s7079_s27 = int_to_ptr.vmem [resolvable:$false] %s7078_s27 }
  0xd5   : > { %s7080_s24 = scalar_lea.vmem %s7079_s27, 8192  ;;  %p7081_p13 = scmp.lt.s32.totalorder %s7532_s3, %s7079_s27 }
  0xd6   : > { %p7076_p9 = pnand %p7074_p6, %p7060_p8  ;;  %p7082_p1 = scmp.lt.s32.totalorder %s7080_s24, %s7073_s16 }
  0xd8   : > { %p7077_p0 = pneg %p7076_p9  ;;  %p7083_p3 = por %p7082_p1, %p7081_p13 }
  0xda   : > { %p7084_p10 = pnand %p7083_p3, %p7077_p0 }
  0xdc   : > { %7087 = shalt.err (!%p7084_p10)
}
  0xdd   : > { %s9658_s14 = smov 16   ;;  %s9659_s5 = smov 256  }
  0xde   : > { %6093 = dma.hbm_to_vmem [thread:$0]  (!%p7536_p7), %s7543_s17, 4096, %s7532_s3, %s7545_s13, %s9659_s5, %s9659_s5, %s9658_s14  }
  0xdf   : > { %p9660_p8 = scmp.ne.s32.totalorder %s9642_s22, 0 }
  0xe1   : > { %522 = sbr.rel (%p9660_p8) target bundleno = 1879 (0x757), region = 64 }
  0xe8   : > { %s7579_s28 = sand.u32 1, %s7182_s30  }
  0xe9   : > { %s5086_s26 = sshll.u32 %s7579_s28, 8  ;;  %s525_s9 = scalar_lea.sflag [#allocation3], %s7579_s28 }
  0xea   : > { %s7585_s1 = scalar_lea.vmem [#allocation2], %s5086_s26 }
  0xeb   : > { %7149 = dma.done.wait (%p7511_p12), %s525_s9, 4096  }
  0xec   : > { %7151 = vsyncadd (%p7511_p12), %s525_s9, 4294963200  ;;  %p9661_p13 = scmp.eq.s32.totalorder %s7360_s21, 0 }
  0xee   : > { %7153 = dma.done.wait (%p9661_p13), [#allocation6], 64   ;;  %p9662_p0 = pmov %p9661_p13 }
  0xf0   : > { %7155 = vsyncadd (%p9662_p0), [#allocation6], 4294967232  ;;  %p9663_p7 = pmov %p9662_p0 }
  0xf1   : > { %p9664_p5 = pmov %p9662_p0 }
  0xf2   : > { %7157 = dma.done.wait (%p9663_p7), [#allocation9], 16384  }
  0xf3   : > { %7159 = vsyncadd (%p9664_p5), [#allocation9], 4294950912  ;;  %p9665_p11 = pmov %p9662_p0 }
  0xf4   : > { %p9666_p2 = pmov %p9662_p0 }
  0xf5   : > { %7161 = dma.done.wait (%p9665_p11), [#allocation12], 12288  }
  0xf6   : > { %7163 = vsyncadd (%p9666_p2), [#allocation12], 4294955008  ;;  %v7604_v0 = vld [vmem:[%s7585_s1] sm:$0xff]  ;;  %v7607_v1 = vld [vmem:[%s7585_s1 + $0x8] sm:$0xff]  ;;  %s9670_s4 = sld [smem:[#allocation65_spill]]  ;;  %s8601_s13 = scalar_lea.vmem [#allocation13], %s5086_s26 }
  0xf7   : > { %v7610_v2 = vld [vmem:[%s7585_s1 + $0x20] sm:$0xff]  ;;  %v647_v3 = vadd.f32 %v7607_v1, %v7604_v0  ;;  %v7615_v4 = vld [vmem:[%s7585_s1 + $0x28] sm:$0xff]  ;;  %v7618_v5 = vld [vmem:[%s7585_s1 + $0x10] sm:$0xff]  ;;  %s9738_s24 = sld [smem:[#allocation67_spill]]  ;;  %s9745_s26 = sld [smem:[#allocation69_spill]] }
  0xf8   : > { %v7621_v6 = vld [vmem:[%s7585_s1 + $0x18] sm:$0xff]  ;;  %v653_v7 = vadd.f32 %v7615_v4, %v7610_v2  ;;  %v7626_v8 = vld [vmem:[%s7585_s1 + $0x30] sm:$0xff]  ;;  %v7636_v12 = vld [vmem:[%s7585_s1 + $0x40] sm:$0xff]  ;;  %s9270_s9 = sshll.u32 %s7579_s28, 7  ;;  %s9749_s22 = sld [smem:[#allocation32_spill]] }
  0xf9   : > { %v7629_v9 = vld [vmem:[%s7585_s1 + $0x38] sm:$0xff]  ;;  %648 = vadd.xlane.f32.xlu0 %v647_v3  ;;  %v650_v10 = vadd.f32 %v7621_v6, %v7618_v5  ;;  %v7639_v13 = vld [vmem:[%s7585_s1 + $0x48] sm:$0xff]  ;;  %v7642_v14 = vld [vmem:[%s7585_s1 + $0x50] sm:$0xff]  ;;  %s9285_s3 = scalar_lea.vmem [#allocation14], %s9270_s9  ;;  %s9750_s23 = sld [smem:[#allocation33_spill]] }
  0xfa   : > { %654 = vadd.xlane.f32.xlu1 %v653_v7  ;;  %v656_v11 = vadd.f32 %v7629_v9, %v7626_v8  ;;  %v7645_v15 = vld [vmem:[%s7585_s1 + $0x58] sm:$0xff]  ;;  %v659_v16 = vadd.f32 %v7639_v13, %v7636_v12  ;;  %v7652_v18 = vld [vmem:[%s7585_s1 + $0x60] sm:$0xff]  ;;  %v7655_v19 = vld [vmem:[%s7585_s1 + $0x68] sm:$0xff]  ;;  %s4690_s27 = sshll.u32 %s8601_s13, 4  ;;  %p9752_p4 = scmp.ne.s32.totalorder %s9654_s12, 0  ;;  %s9338_s27 = int_to_ptr.vmem [resolvable:$true] %s4690_s27 }
  0xfb   : > { %v662_v17 = vadd.f32 %v7645_v15, %v7642_v14  ;;  %v7658_v20 = vld [vmem:[%s7585_s1 + $0x70] sm:$0xff]  ;;  %v7661_v21 = vld [vmem:[%s7585_s1 + $0x78] sm:$0xff]  ;;  %v7664_v22 = vld [vmem:[%s7585_s1 + $0x80] sm:$0xff]  ;;  %v665_v24 = vadd.f32 %v7655_v19, %v7652_v18 }
  0xfc   : > { %v7667_v23 = vld [vmem:[%s7585_s1 + $0x88] sm:$0xff]  ;;  %v7672_v25 = vld [vmem:[%s7585_s1 + $0x90] sm:$0xff]  ;;  %v7675_v26 = vld [vmem:[%s7585_s1 + $0x98] sm:$0xff]  ;;  %v668_v27 = vadd.f32 %v7661_v21, %v7658_v20 }
  0xfd   : > { %651 = vadd.xlane.f32.xlu0 %v650_v10  ;;  %v7680_v28 = vld [vmem:[%s7585_s1 + $0xa0] sm:$0xff]  ;;  %v7683_v29 = vld [vmem:[%s7585_s1 + $0xa8] sm:$0xff]  ;;  %v671_v30 = vadd.f32 %v7667_v23, %v7664_v22  ;;  %v7688_v31 = vld [vmem:[%s7585_s1 + $0xb0] sm:$0xff]  ;;  %v674_v33 = vadd.f32 %v7675_v26, %v7672_v25 }
  0xfe   : > { %657 = vadd.xlane.f32.xlu1 %v656_v11  ;;  %v7691_v32 = vld [vmem:[%s7585_s1 + $0xb8] sm:$0xff]  ;;  %v7696_v34 = vld [vmem:[%s7585_s1 + $0xc0] sm:$0xff]  ;;  %v7699_v35 = vld [vmem:[%s7585_s1 + $0xc8] sm:$0xff]  ;;  %v677_v36 = vadd.f32 %v7683_v29, %v7680_v28  ;;  %s5644_s17 = sshll.u32 %s9749_s22, 5 }
  0xff   : > { %v7704_v37 = vld [vmem:[%s7585_s1 + $0xd0] sm:$0xff]  ;;  %v7707_v38 = vld [vmem:[%s7585_s1 + $0xd8] sm:$0xff]  ;;  %v680_v39 = vadd.f32 %v7691_v32, %v7688_v31  ;;  %v7712_v40 = vld [vmem:[%s7585_s1 + $0xe0] sm:$0xff]  ;;  %v683_v42 = vadd.f32 %v7699_v35, %v7696_v34  ;;  %s9626_s25 = sshll.u32 %s9750_s23, 6 }
 0x100   : > { %v7715_v41 = vld [vmem:[%s7585_s1 + $0xe8] sm:$0xff]  ;;  %v7720_v43 = vld [vmem:[%s7585_s1 + $0xf0] sm:$0xff]  ;;  %v7723_v44 = vld [vmem:[%s7585_s1 + $0xf8] sm:$0xff]  ;;  %v686_v45 = vadd.f32 %v7707_v38, %v7704_v37  ;;  %s4687_s16 = sadd.s32 %s5644_s17, %s9626_s25  ;;  %s7220_s25 = smov [#allocation13]  }
 0x101   : > { %660 = vadd.xlane.f32.xlu0 %v659_v16  ;;  %v689_v46 = vadd.f32 %v7715_v41, %v7712_v40  ;;  %v692_v47 = vadd.f32 %v7723_v44, %v7720_v43  ;;  %v6217_v48 = vld [vmem:[#allocation8 + $0x4] ss:$16 sps:$4 sm:$0xff]   ;;  %v6219_v49 = vld [vmem:[#allocation8 + $0xc] ss:$16 sps:$4 sm:$0xff]   ;;  %v6221_v50 = vld [vmem:[#allocation8] ss:$16 sps:$4 sm:$0xff]  }
 0x102   : > { %663 = vadd.xlane.f32.xlu1 %v662_v17  ;;  %v6222_v51 = vld [vmem:[#allocation8 + $0x8] ss:$16 sps:$4 sm:$0xff]   ;;  %v6223_v52 = vld [vmem:[#allocation8 + $0x24] ss:$16 sps:$4 sm:$0xff]   ;;  %v6225_v53 = vld [vmem:[#allocation8 + $0x2c] ss:$16 sps:$4 sm:$0xff]   ;;  %1412 = vmatprep.subr.bf16.mxu0 %v6217_v48 }
 0x103   : > { %1525 = vmatprep.subr.bf16.mxu1 %v6219_v49  ;;  %1413 = vmatpush1.bf16.msra.mxu0 %v6221_v50  ;;  %v6227_v54 = vld [vmem:[#allocation8 + $0x20] ss:$16 sps:$4 sm:$0xff]   ;;  %v6228_v55 = vld [vmem:[#allocation8 + $0x28] ss:$16 sps:$4 sm:$0xff]   ;;  %v6229_v56 = vld [vmem:[#allocation8 + $0x44] ss:$16 sps:$4 sm:$0xff]  }
 0x104   : > { %1526 = vmatpush1.bf16.msra.mxu1 %v6222_v51  ;;  %1414 = vmatprep.subr.bf16.mxu0 %v6223_v52  ;;  %v6231_v57 = vld [vmem:[#allocation8 + $0x4c] ss:$16 sps:$4 sm:$0xff]   ;;  %v6233_v58 = vld [vmem:[#allocation8 + $0x40] ss:$16 sps:$4 sm:$0xff]   ;;  %v6234_v59 = vld [vmem:[#allocation8 + $0x48] ss:$16 sps:$4 sm:$0xff]  }
 0x105   : > { %666 = vadd.xlane.f32.xlu0 %v665_v24  ;;  %1527 = vmatprep.subr.bf16.mxu1 %v6225_v53  ;;  %v6235_v60 = vld [vmem:[#allocation8 + $0x64] ss:$16 sps:$4 sm:$0xff]   ;;  %v6237_v61 = vld [vmem:[#allocation8 + $0x6c] ss:$16 sps:$4 sm:$0xff]   ;;  %v6239_v62 = vld [vmem:[#allocation8 + $0x60] ss:$16 sps:$4 sm:$0xff]  }
 0x106   : > { %669 = vadd.xlane.f32.xlu1 %v668_v27  ;;  %v6240_v63 = vld [vmem:[#allocation8 + $0x68] ss:$16 sps:$4 sm:$0xff]   ;;  %v6241_v3 = vld [vmem:[#allocation8 + $0x84] ss:$16 sps:$4 sm:$0xff]   ;;  %v6243_v7 = vld [vmem:[#allocation8 + $0x8c] ss:$16 sps:$4 sm:$0xff]  }
 0x107   : > { %1415 = vmatpush1.bf16.msra.mxu0 %v6227_v54  ;;  %v6245_v10 = vld [vmem:[#allocation8 + $0x80] ss:$16 sps:$4 sm:$0xff]   ;;  %v6246_v11 = vld [vmem:[#allocation8 + $0x88] ss:$16 sps:$4 sm:$0xff]   ;;  %v6247_v16 = vld [vmem:[#allocation8 + $0xa4] ss:$16 sps:$4 sm:$0xff]  }
 0x108   : > { %1528 = vmatpush1.bf16.msra.mxu1 %v6228_v55  ;;  %1416 = vmatprep.subr.bf16.mxu0 %v6229_v56  ;;  %v6249_v17 = vld [vmem:[#allocation8 + $0xac] ss:$16 sps:$4 sm:$0xff]   ;;  %v6251_v24 = vld [vmem:[#allocation8 + $0xa0] ss:$16 sps:$4 sm:$0xff]   ;;  %v6252_v27 = vld [vmem:[#allocation8 + $0xa8] ss:$16 sps:$4 sm:$0xff]  }
 0x109   : > { %672 = vadd.xlane.f32.xlu0 %v671_v30  ;;  %1529 = vmatprep.subr.bf16.mxu1 %v6231_v57  ;;  %v6253_v30 = vld [vmem:[#allocation8 + $0xc4] ss:$16 sps:$4 sm:$0xff]   ;;  %v6267_v49 = vld [vmem:[#allocation8 + $0x10c] ss:$16 sps:$4 sm:$0xff]   ;;  %v6269_v50 = vld [vmem:[#allocation8 + $0x100] ss:$16 sps:$4 sm:$0xff]  }
 0x10a   : > { %675 = vadd.xlane.f32.xlu1 %v674_v33  ;;  %v6255_v33 = vld [vmem:[#allocation8 + $0xcc] ss:$16 sps:$4 sm:$0xff]   ;;  %v6265_v48 = vld [vmem:[#allocation8 + $0x104] ss:$16 sps:$4 sm:$0xff]   ;;  %v6270_v51 = vld [vmem:[#allocation8 + $0x108] ss:$16 sps:$4 sm:$0xff]  }
 0x10b   : > { %1417 = vmatpush1.bf16.msra.mxu0 %v6233_v58  ;;  %s5535_s8 = sshll.u32 %s4687_s16, 7  ;;  %s7088_s16 = scalar_lea.vmem %s9338_s27, 4096 }
 0x10c   : > { %1530 = vmatpush1.bf16.msra.mxu1 %v6234_v59  ;;  %1418 = vmatprep.subr.bf16.mxu0 %v6235_v60  ;;  %p7089_p12 = scmp.ne.s32.totalorder %s9338_s27, %s7088_s16  ;;  %s7092_s14 = sshll.u32 %s7220_s25, 4  ;;  %s7093_s14 = int_to_ptr.vmem [resolvable:$false] %s7092_s14 }
 0x10d   : > { %678 = vadd.xlane.f32.xlu0 %v677_v36  ;;  %1531 = vmatprep.subr.bf16.mxu1 %v6237_v61  ;;  %v6257_v36 = vld [vmem:[#allocation8 + $0xc0] ss:$16 sps:$4 sm:$0xff]   ;;  %p7095_p1 = scmp.lt.s32.totalorder %s9338_s27, %s7093_s14 }
 0x10e   : > { %681 = vadd.xlane.f32.xlu1 %v680_v39  ;;  %v6258_v39 = vld [vmem:[#allocation8 + $0xc8] ss:$16 sps:$4 sm:$0xff]   ;;  %p7090_p6 = pnand %p7089_p12, %p9752_p4 }
 0x10f   : > { %1419 = vmatpush1.bf16.msra.mxu0 %v6239_v62 }
 0x110   : > { %1532 = vmatpush1.bf16.msra.mxu1 %v6240_v63  ;;  %1420 = vmatprep.subr.bf16.mxu0 %v6241_v3  ;;  %p7091_p9 = pneg %p7090_p6 }
 0x111   : > { %684 = vadd.xlane.f32.xlu0 %v683_v42  ;;  %1533 = vmatprep.subr.bf16.mxu1 %v6243_v7  ;;  %v6259_v42 = vld [vmem:[#allocation8 + $0xe4] ss:$16 sps:$4 sm:$0xff]  }
 0x112   : > { %687 = vadd.xlane.f32.xlu1 %v686_v45  ;;  %v6261_v45 = vld [vmem:[#allocation8 + $0xec] ss:$16 sps:$4 sm:$0xff]  }
 0x113   : > { %1421 = vmatpush1.bf16.msra.mxu0 %v6245_v10 }
 0x114   : > { %1534 = vmatpush1.bf16.msra.mxu1 %v6246_v11  ;;  %1422 = vmatprep.subr.bf16.mxu0 %v6247_v16 }
 0x115   : > { %690 = vadd.xlane.f32.xlu0 %v689_v46  ;;  %1535 = vmatprep.subr.bf16.mxu1 %v6249_v17  ;;  %v6263_v46 = vld [vmem:[#allocation8 + $0xe0] ss:$16 sps:$4 sm:$0xff]  }
 0x116   : > { %693 = vadd.xlane.f32.xlu1 %v692_v47  ;;  %v6264_v47 = vld [vmem:[#allocation8 + $0xe8] ss:$16 sps:$4 sm:$0xff]  }
 0x117   : > { %1423 = vmatpush1.bf16.msra.mxu0 %v6251_v24 }
 0x118   : > { %1536 = vmatpush1.bf16.msra.mxu1 %v6252_v27  ;;  %1424 = vmatprep.subr.bf16.mxu0 %v6253_v30 }
 0x119   : > { %1537 = vmatprep.subr.bf16.mxu1 %v6255_v33 }
 0x11b   : > { %1425 = vmatpush1.bf16.msra.mxu0 %v6257_v36 }
 0x11c   : > { %1538 = vmatpush1.bf16.msra.mxu1 %v6258_v39  ;;  %1426 = vmatprep.subr.bf16.mxu0 %v6259_v42 }
 0x11d   : > { %1539 = vmatprep.subr.bf16.mxu1 %v6261_v45 }
 0x11f   : > { %1427 = vmatpush1.bf16.msra.mxu0 %v6263_v46 }
 0x120   : > { %1540 = vmatpush1.bf16.msra.mxu1 %v6264_v47  ;;  %1428 = vmatprep.subr.bf16.mxu0 %v6265_v48 }
 0x121   : > { %1541 = vmatprep.subr.bf16.mxu1 %v6267_v49 }
 0x123   : > { %1429 = vmatpush1.bf16.msra.mxu0 %v6269_v50 }
 0x124   : > { %1542 = vmatpush1.bf16.msra.mxu1 %v6270_v51 }
 0x186   : > { %v649_v52 = vpop.xlane.xlu0 %648 }
 0x187   : > { %v696_v53 = vmul.f32 0.00390625, %v649_v52  ;;  %v655_v54 = vpop.xlane.xlu1 %654 }
 0x188   : > { %v698_v55 = vmul.f32 0.00390625, %v655_v54 }
 0x189   : > { %v7732_v56 = vsub.f32 %v7604_v0, %v696_v53  ;;  %v7735_v57 = vsub.f32 %v7607_v1, %v696_v53 }
 0x18a   : > { %v7738_v58 = vsub.f32 %v7610_v2, %v698_v55  ;;  %v7741_v59 = vsub.f32 %v7615_v4, %v698_v55  ;;  %v652_v60 = vpop.xlane.xlu0 %651 }
 0x18b   : > { %v697_v61 = vmul.f32 0.00390625, %v652_v60  ;;  %v658_v62 = vpop.xlane.xlu1 %657  ;;  %v744_v63 = vmul.f32 %v7732_v56, %v7732_v56  ;;  %v745_v3 = vmul.f32 %v7735_v57, %v7735_v57 }
 0x18c   : > { %v699_v0 = vmul.f32 0.00390625, %v658_v62  ;;  %v748_v1 = vmul.f32 %v7738_v58, %v7738_v58  ;;  %v749_v2 = vmul.f32 %v7741_v59, %v7741_v59 }
 0x18d   : > { %v7752_v7 = vsub.f32 %v7618_v5, %v697_v61  ;;  %v7755_v4 = vsub.f32 %v7621_v6, %v697_v61  ;;  %v776_v10 = vadd.f32 %v745_v3, %v744_v63 }
 0x18e   : > { %v7758_v11 = vsub.f32 %v7626_v8, %v699_v0  ;;  %v7761_v16 = vsub.f32 %v7629_v9, %v699_v0  ;;  %v661_v17 = vpop.xlane.xlu0 %660  ;;  %v782_v30 = vadd.f32 %v749_v2, %v748_v1 }
 0x18f   : > { %v700_v24 = vmul.f32 0.00390625, %v661_v17  ;;  %777 = vadd.xlane.f32.xlu0 %v776_v10  ;;  %v664_v27 = vpop.xlane.xlu1 %663  ;;  %v746_v33 = vmul.f32 %v7752_v7, %v7752_v7  ;;  %v747_v5 = vmul.f32 %v7755_v4, %v7755_v4 }
 0x190   : > { %v701_v6 = vmul.f32 0.00390625, %v664_v27  ;;  %v750_v36 = vmul.f32 %v7758_v11, %v7758_v11  ;;  %v751_v8 = vmul.f32 %v7761_v16, %v7761_v16 }
 0x191   : > { %v7772_v9 = vsub.f32 %v7636_v12, %v700_v24  ;;  %v7775_v39 = vsub.f32 %v7639_v13, %v700_v24  ;;  %v779_v42 = vadd.f32 %v747_v5, %v746_v33 }
 0x192   : > { %v7778_v45 = vsub.f32 %v7642_v14, %v701_v6  ;;  %v7781_v46 = vsub.f32 %v7645_v15, %v701_v6  ;;  %v667_v47 = vpop.xlane.xlu0 %666  ;;  %v785_v50 = vadd.f32 %v751_v8, %v750_v36  ;;  %v6271_v6 = vld [vmem:[#allocation8 + $0x124] ss:$16 sps:$4 sm:$0xff]   ;;  %v6273_v36 = vld [vmem:[#allocation8 + $0x12c] ss:$16 sps:$4 sm:$0xff]  }
 0x193   : > { %v702_v48 = vmul.f32 0.00390625, %v667_v47  ;;  %783 = vadd.xlane.f32.xlu0 %v782_v30  ;;  %780 = vadd.xlane.f32.xlu1 %v779_v42  ;;  %v670_v49 = vpop.xlane.xlu1 %669  ;;  %v752_v12 = vmul.f32 %v7772_v9, %v7772_v9  ;;  %v753_v13 = vmul.f32 %v7775_v39, %v7775_v39  ;;  %v6275_v42 = vld [vmem:[#allocation8 + $0x120] ss:$16 sps:$4 sm:$0xff]   ;;  %v6276_v47 = vld [vmem:[#allocation8 + $0x128] ss:$16 sps:$4 sm:$0xff]  }
 0x194   : > { %v703_v51 = vmul.f32 0.00390625, %v670_v49  ;;  %v754_v14 = vmul.f32 %v7778_v45, %v7778_v45  ;;  %v755_v15 = vmul.f32 %v7781_v46, %v7781_v46  ;;  %1430 = vmatprep.subr.bf16.mxu0 %v6271_v6  ;;  %1543 = vmatprep.subr.bf16.mxu1 %v6273_v36  ;;  %v6285_v6 = vld [vmem:[#allocation8 + $0x16c] ss:$16 sps:$4 sm:$0xff]  }
 0x195   : > { %v7792_v52 = vsub.f32 %v7652_v18, %v702_v48  ;;  %v7795_v53 = vsub.f32 %v7655_v19, %v702_v48  ;;  %v788_v54 = vadd.f32 %v753_v13, %v752_v12  ;;  %1431 = vmatpush1.bf16.msra.mxu0 %v6275_v42  ;;  %1544 = vmatpush1.bf16.msra.mxu1 %v6276_v47  ;;  %v6288_v42 = vld [vmem:[#allocation8 + $0x168] ss:$16 sps:$4 sm:$0xff]  }
 0x196   : > { %v7798_v55 = vsub.f32 %v7658_v20, %v703_v51  ;;  %v7801_v60 = vsub.f32 %v7661_v21, %v703_v51  ;;  %v673_v61 = vpop.xlane.xlu0 %672  ;;  %v791_v3 = vadd.f32 %v755_v15, %v754_v14 }
 0x197   : > { %v704_v62 = vmul.f32 0.00390625, %v673_v61  ;;  %786 = vadd.xlane.f32.xlu1 %v785_v50  ;;  %789 = vadd.xlane.f32.xlu0 %v788_v54  ;;  %v676_v63 = vpop.xlane.xlu1 %675  ;;  %v756_v18 = vmul.f32 %v7792_v52, %v7792_v52  ;;  %v757_v19 = vmul.f32 %v7795_v53, %v7795_v53 }
 0x198   : > { %v705_v0 = vmul.f32 0.00390625, %v676_v63  ;;  %v758_v20 = vmul.f32 %v7798_v55, %v7798_v55  ;;  %v759_v21 = vmul.f32 %v7801_v60, %v7801_v60  ;;  %v6279_v63 = vld [vmem:[#allocation8 + $0x14c] ss:$16 sps:$4 sm:$0xff]  }
 0x199   : > { %v7812_v1 = vsub.f32 %v7664_v22, %v704_v62  ;;  %v7815_v2 = vsub.f32 %v7667_v23, %v704_v62  ;;  %v794_v10 = vadd.f32 %v757_v19, %v756_v18  ;;  %v6277_v62 = vld [vmem:[#allocation8 + $0x144] ss:$16 sps:$4 sm:$0xff]   ;;  %1545 = vmatprep.subr.bf16.mxu1 %v6279_v63  ;;  %v6300_v63 = vld [vmem:[#allocation8 + $0x1a8] ss:$16 sps:$4 sm:$0xff]  }
 0x19a   : > { %v7818_v17 = vsub.f32 %v7672_v25, %v705_v0  ;;  %v7821_v24 = vsub.f32 %v7675_v26, %v705_v0  ;;  %v679_v27 = vpop.xlane.xlu0 %678  ;;  %v797_v5 = vadd.f32 %v759_v21, %v758_v20  ;;  %v6281_v0 = vld [vmem:[#allocation8 + $0x140] ss:$16 sps:$4 sm:$0xff]   ;;  %v6282_v20 = vld [vmem:[#allocation8 + $0x148] ss:$16 sps:$4 sm:$0xff]   ;;  %1432 = vmatprep.subr.bf16.mxu0 %v6277_v62 }
 0x19b   : > { %v706_v30 = vmul.f32 0.00390625, %v679_v27  ;;  %792 = vadd.xlane.f32.xlu1 %v791_v3  ;;  %795 = vadd.xlane.f32.xlu0 %v794_v10  ;;  %v682_v33 = vpop.xlane.xlu1 %681  ;;  %v760_v22 = vmul.f32 %v7812_v1, %v7812_v1  ;;  %v761_v23 = vmul.f32 %v7815_v2, %v7815_v2  ;;  %v6299_v62 = vld [vmem:[#allocation8 + $0x1a0] ss:$16 sps:$4 sm:$0xff]  }
 0x19c   : > { %v707_v8 = vmul.f32 0.00390625, %v682_v33  ;;  %v762_v25 = vmul.f32 %v7818_v17, %v7818_v17  ;;  %v763_v26 = vmul.f32 %v7821_v24, %v7821_v24  ;;  %1433 = vmatpush1.bf16.msra.mxu0 %v6281_v0  ;;  %1546 = vmatpush1.bf16.msra.mxu1 %v6282_v20  ;;  %v6303_v0 = vld [vmem:[#allocation8 + $0x1cc] ss:$16 sps:$4 sm:$0xff]   ;;  %v6305_v20 = vld [vmem:[#allocation8 + $0x1c0] ss:$16 sps:$4 sm:$0xff]  }
 0x19d   : > { %v7832_v48 = vsub.f32 %v7680_v28, %v706_v30  ;;  %v7835_v49 = vsub.f32 %v7683_v29, %v706_v30  ;;  %v800_v50 = vadd.f32 %v761_v23, %v760_v22  ;;  %v6283_v23 = vld [vmem:[#allocation8 + $0x164] ss:$16 sps:$4 sm:$0xff]   ;;  %1547 = vmatprep.subr.bf16.mxu1 %v6285_v6 }
 0x19e   : > { %v7838_v12 = vsub.f32 %v7688_v31, %v707_v8  ;;  %v7841_v13 = vsub.f32 %v7691_v32, %v707_v8  ;;  %v685_v51 = vpop.xlane.xlu0 %684  ;;  %v803_v15 = vadd.f32 %v763_v26, %v762_v25  ;;  %v6287_v26 = vld [vmem:[#allocation8 + $0x160] ss:$16 sps:$4 sm:$0xff]   ;;  %1434 = vmatprep.subr.bf16.mxu0 %v6283_v23  ;;  %v905_v23 = vlaneseq }
 0x19f   : > { %v708_v14 = vmul.f32 0.00390625, %v685_v51  ;;  %798 = vadd.xlane.f32.xlu1 %v797_v5  ;;  %801 = vadd.xlane.f32.xlu0 %v800_v50  ;;  %v688_v28 = vpop.xlane.xlu1 %687  ;;  %v764_v29 = vmul.f32 %v7832_v48, %v7832_v48  ;;  %v765_v54 = vmul.f32 %v7835_v49, %v7835_v49 }
 0x1a0   : > { %v709_v61 = vmul.f32 0.00390625, %v688_v28  ;;  %v766_v31 = vmul.f32 %v7838_v12, %v7838_v12  ;;  %v767_v32 = vmul.f32 %v7841_v13, %v7841_v13  ;;  %1435 = vmatpush1.bf16.msra.mxu0 %v6287_v26  ;;  %1548 = vmatpush1.bf16.msra.mxu1 %v6288_v42  ;;  %v6291_v28 = vld [vmem:[#allocation8 + $0x18c] ss:$16 sps:$4 sm:$0xff]  }
 0x1a1   : > { %v7852_v3 = vsub.f32 %v7696_v34, %v708_v14  ;;  %v7855_v18 = vsub.f32 %v7699_v35, %v708_v14  ;;  %v806_v19 = vadd.f32 %v765_v54, %v764_v29  ;;  %v6293_v29 = vld [vmem:[#allocation8 + $0x180] ss:$16 sps:$4 sm:$0xff]   ;;  %v6294_v54 = vld [vmem:[#allocation8 + $0x188] ss:$16 sps:$4 sm:$0xff]   ;;  %1549 = vmatprep.subr.bf16.mxu1 %v6291_v28 }
 0x1a2   : > { %v7858_v21 = vsub.f32 %v7704_v37, %v709_v61  ;;  %v7861_v10 = vsub.f32 %v7707_v38, %v709_v61  ;;  %v691_v27 = vpop.xlane.xlu0 %690  ;;  %v809_v33 = vadd.f32 %v767_v32, %v766_v31  ;;  %v6295_v31 = vld [vmem:[#allocation8 + $0x1a4] ss:$16 sps:$4 sm:$0xff]   ;;  %v6297_v32 = vld [vmem:[#allocation8 + $0x1ac] ss:$16 sps:$4 sm:$0xff]  }
 0x1a3   : > { %v710_v30 = vmul.f32 0.00390625, %v691_v27  ;;  %804 = vadd.xlane.f32.xlu1 %v803_v15  ;;  %807 = vadd.xlane.f32.xlu0 %v806_v19  ;;  %v694_v34 = vpop.xlane.xlu1 %693  ;;  %v768_v35 = vmul.f32 %v7852_v3, %v7852_v3  ;;  %v769_v5 = vmul.f32 %v7855_v18, %v7855_v18  ;;  %v6301_v19 = vld [vmem:[#allocation8 + $0x1c4] ss:$16 sps:$4 sm:$0xff]   ;;  %v6306_v27 = vld [vmem:[#allocation8 + $0x1c8] ss:$16 sps:$4 sm:$0xff]  }
 0x1a4   : > { %v711_v22 = vmul.f32 0.00390625, %v694_v34  ;;  %v770_v37 = vmul.f32 %v7858_v21, %v7858_v21  ;;  %v771_v38 = vmul.f32 %v7861_v10, %v7861_v10  ;;  %1550 = vmatpush1.bf16.msra.mxu1 %v6294_v54  ;;  %v6309_v34 = vld [vmem:[#allocation8 + $0x1ec] ss:$16 sps:$4 sm:$0xff]  }
 0x1a5   : > { %v7872_v36 = vsub.f32 %v7712_v40, %v710_v30  ;;  %v7875_v8 = vsub.f32 %v7715_v41, %v710_v30  ;;  %v812_v25 = vadd.f32 %v769_v5, %v768_v35  ;;  %1551 = vmatprep.subr.bf16.mxu1 %v6297_v32  ;;  %v6307_v30 = vld [vmem:[#allocation8 + $0x1e4] ss:$16 sps:$4 sm:$0xff]   ;;  %v6312_v35 = vld [vmem:[#allocation8 + $0x1e8] ss:$16 sps:$4 sm:$0xff]  }
 0x1a6   : > { %v7878_v47 = vsub.f32 %v7720_v43, %v711_v22  ;;  %v7881_v50 = vsub.f32 %v7723_v44, %v711_v22  ;;  %v815_v51 = vadd.f32 %v771_v38, %v770_v37  ;;  %v6289_v44 = vld [vmem:[#allocation8 + $0x184] ss:$16 sps:$4 sm:$0xff]  }
 0x1a7   : > { %810 = vadd.xlane.f32.xlu1 %v809_v33  ;;  %813 = vadd.xlane.f32.xlu0 %v812_v25  ;;  %v772_v40 = vmul.f32 %v7872_v36, %v7872_v36  ;;  %v773_v41 = vmul.f32 %v7875_v8, %v7875_v8  ;;  %v6311_v33 = vld [vmem:[#allocation8 + $0x1e0] ss:$16 sps:$4 sm:$0xff]   ;;  %v6315_v5 = vld [vmem:[#allocation10 + $0x4] ss:$8 sps:$4 sm:$0xff]  }
 0x1a8   : > { %v774_v14 = vmul.f32 %v7878_v47, %v7878_v47  ;;  %v775_v43 = vmul.f32 %v7881_v50, %v7881_v50  ;;  %1436 = vmatprep.subr.bf16.mxu0 %v6289_v44  ;;  %1552 = vmatpush1.bf16.msra.mxu1 %v6300_v63 }
 0x1a9   : > { %v818_v15 = vadd.f32 %v773_v41, %v772_v40  ;;  %1437 = vmatpush1.bf16.msra.mxu0 %v6293_v29  ;;  %1553 = vmatprep.subr.bf16.mxu1 %v6303_v0  ;;  %v7891_v41 = vshrl.u32 %v905_v23, 7 }
 0x1aa   : > { %v821_v61 = vadd.f32 %v775_v43, %v774_v14  ;;  %1438 = vmatprep.subr.bf16.mxu0 %v6295_v31 }
 0x1ab   : > { %816 = vadd.xlane.f32.xlu1 %v815_v51  ;;  %819 = vadd.xlane.f32.xlu0 %v818_v15  ;;  %9667 = vst [vmem:[#allocation35_spill] sm:$0xff] %v7891_v41  ;;  %v7894_v54 = vsub.s32 0, %v7891_v41 }
 0x1ac   : > { %1554 = vmatpush1.bf16.msra.mxu1 %v6306_v27  ;;  %v646_v27 = vld [vmem:[#allocation7] sm:$0x3] }
 0x1ad   : > { %1439 = vmatpush1.bf16.msra.mxu0 %v6299_v62  ;;  %1555 = vmatprep.subr.bf16.mxu1 %v6309_v34  ;;  %9668 = vst [vmem:[#allocation36_spill] sm:$0xff] %v7894_v54  ;;  %v645_v62 = vld [vmem:[#allocation5] sm:$0x3]  ;;  %v7908_v23 = vrot.slane %v646_v27, %v7894_v54 }
 0x1ae   : > { %1440 = vmatprep.subr.bf16.mxu0 %v6301_v19 }
 0x1af   : > { %822 = vadd.xlane.f32.xlu1 %v821_v61  ;;  %v7897_v61 = vsub.s32 1, %v7891_v41 }
 0x1b0   : > { %1556 = vmatpush1.bf16.msra.mxu1 %v6312_v35 }
 0x1b1   : > { %1441 = vmatpush1.bf16.msra.mxu0 %v6305_v20  ;;  %9669 = vst [vmem:[#allocation37_spill] sm:$0xff] %v7897_v61  ;;  %v7903_v34 = vrot.slane %v645_v62, %v7897_v61 }
 0x1b2   : > { %1442 = vmatprep.subr.bf16.mxu0 %v6307_v30  ;;  %v7900_v30 = vrot.slane %v645_v62, %v7894_v54 }
 0x1b5   : > { %1443 = vmatpush1.bf16.msra.mxu0 %v6311_v33 }
 0x1b6   : > { %2514 = vmatprep.subr.bf16.mxu0 %v6315_v5 }
 0x21c   : > { %v778_v22 = vpop.xlane.xlu0 %777 }
 0x21d   : > { %v824_v37 = vmul.f32 0.00390625, %v778_v22 }
 0x21f   : > { %v840_v38 = vadd.f32 1e-05, %v824_v37 }
 0x220   : > { %v781_v6 = vpop.xlane.xlu1 %780  ;;  %v784_v25 = vpop.xlane.xlu0 %783 }
 0x221   : > { %6553 = vrsqrt.f32 %v840_v38  ;;  %v825_v26 = vmul.f32 0.00390625, %v781_v6  ;;  %v826_v42 = vmul.f32 0.00390625, %v784_v25 }
 0x223   : > { %v841_v51 = vadd.f32 1e-05, %v825_v26  ;;  %v842_v40 = vadd.f32 1e-05, %v826_v42  ;;  %v7912_v42 = vrot.slane %v646_v27, %v7897_v61 }
 0x224   : > { %v787_v14 = vpop.xlane.xlu1 %786  ;;  %v790_v43 = vpop.xlane.xlu0 %789 }
 0x225   : > { %6555 = vrsqrt.f32 %v841_v51  ;;  %v827_v44 = vmul.f32 0.00390625, %v787_v14  ;;  %v828_v28 = vmul.f32 0.00390625, %v790_v43 }
 0x226   : > { %6557 = vrsqrt.f32 %v842_v40 }
 0x227   : > { %v843_v15 = vadd.f32 1e-05, %v827_v44  ;;  %v844_v29 = vadd.f32 1e-05, %v828_v28 }
 0x228   : > { %v793_v31 = vpop.xlane.xlu1 %792  ;;  %v796_v32 = vpop.xlane.xlu0 %795 }
 0x229   : > { %6559 = vrsqrt.f32 %v843_v15  ;;  %v829_v63 = vmul.f32 0.00390625, %v793_v31  ;;  %v830_v19 = vmul.f32 0.00390625, %v796_v32 }
 0x22a   : > { %6561 = vrsqrt.f32 %v844_v29 }
 0x22b   : > { %v6554_v0 = vpop.eup %6553  ;;  %v845_v20 = vadd.f32 1e-05, %v829_v63  ;;  %v846_v33 = vadd.f32 1e-05, %v830_v19 }
 0x22c   : > { %v799_v35 = vpop.xlane.xlu1 %798  ;;  %v873_v5 = vmul.f32 %v6554_v0, %v7735_v57  ;;  %v872_v22 = vmul.f32 %v6554_v0, %v7732_v56  ;;  %v802_v38 = vpop.xlane.xlu0 %801 }
 0x22d   : > { %6563 = vrsqrt.f32 %v845_v20  ;;  %v831_v37 = vmul.f32 0.00390625, %v799_v35  ;;  %v832_v43 = vmul.f32 0.00390625, %v802_v38 }
 0x22e   : > { %v916_v26 = vmul.f32 %v7903_v34, %v873_v5  ;;  %v915_v51 = vmul.f32 %v7900_v30, %v872_v22  ;;  %6565 = vrsqrt.f32 %v846_v33 }
 0x22f   : > { %v6556_v6 = vpop.eup %6555  ;;  %v847_v25 = vadd.f32 1e-05, %v831_v37  ;;  %v848_v33 = vadd.f32 1e-05, %v832_v43 }
 0x230   : > { %v6558_v40 = vpop.eup %6557  ;;  %v805_v57 = vpop.xlane.xlu1 %804  ;;  %v875_v56 = vmul.f32 %v6556_v6, %v7755_v4  ;;  %v874_v14 = vmul.f32 %v6556_v6, %v7752_v7  ;;  %v959_v62 = vadd.f32 %v7912_v42, %v916_v26  ;;  %v958_v63 = vadd.f32 %v7908_v23, %v915_v51  ;;  %v6313_v6 = vld [vmem:[#allocation10] ss:$8 sps:$4 sm:$0xff]  }
 0x231   : > { %6567 = vrsqrt.f32 %v847_v25  ;;  %v833_v44 = vmul.f32 0.00390625, %v805_v57  ;;  %v877_v28 = vmul.f32 %v6558_v40, %v7741_v59  ;;  %v876_v35 = vmul.f32 %v6558_v40, %v7738_v58  ;;  %v808_v5 = vpop.xlane.xlu0 %807 }
 0x232   : > { %v918_v15 = vmul.f32 %v7903_v34, %v875_v56  ;;  %v917_v29 = vmul.f32 %v7900_v30, %v874_v14  ;;  %v834_v56 = vmul.f32 0.00390625, %v808_v5 }
 0x233   : > { %v6560_v31 = vpop.eup %6559  ;;  %v849_v32 = vadd.f32 1e-05, %v833_v44  ;;  %v920_v19 = vmul.f32 %v7903_v34, %v877_v28  ;;  %v919_v14 = vmul.f32 %v7900_v30, %v876_v35 }
 0x234   : > { %v811_v4 = vpop.xlane.xlu1 %810  ;;  %v961_v7 = vadd.f32 %v7912_v42, %v918_v15  ;;  %v960_v0 = vadd.f32 %v7908_v23, %v917_v29  ;;  %v879_v20 = vmul.f32 %v6560_v31, %v7761_v16  ;;  %v878_v59 = vmul.f32 %v6560_v31, %v7758_v11  ;;  %v6562_v27 = vpop.eup %6561  ;;  %v6318_v16 = vld [vmem:[#allocation10 + $0x14] ss:$8 sps:$4 sm:$0xff]   ;;  %v6316_v15 = vld [vmem:[#allocation10 + $0x10] ss:$8 sps:$4 sm:$0xff]  }
 0x235   : > { %6569 = vrsqrt.f32 %v849_v32  ;;  %v835_v26 = vmul.f32 0.00390625, %v811_v4  ;;  %v963_v51 = vadd.f32 %v7912_v42, %v920_v19  ;;  %v881_v58 = vmul.f32 %v6562_v27, %v7775_v39 }
 0x236   : > { %v991_v22 = vpack.c.bf16 %v961_v7, %v959_v62  ;;  %v990_v37 = vpack.c.bf16 %v960_v0, %v958_v63  ;;  %v922_v38 = vmul.f32 %v7903_v34, %v879_v20  ;;  %v921_v57 = vmul.f32 %v7900_v30, %v878_v59  ;;  %v814_v20 = vpop.xlane.xlu0 %813 }
 0x237   : > { %v6564_v25 = vpop.eup %6563  ;;  %6571 = vrsqrt.f32 %v848_v33  ;;  %v924_v28 = vmul.f32 %v7903_v34, %v881_v58  ;;  %v851_v31 = vadd.f32 1e-05, %v835_v26  ;;  %v850_v19 = vadd.f32 1e-05, %v834_v56 }
 0x238   : > { %1444 = vmatprep.mubr.bf16.mxu0 %v991_v22  ;;  %1557 = vmatprep.mubr.bf16.mxu1 %v991_v22  ;;  %v965_v11 = vadd.f32 %v7912_v42, %v922_v38  ;;  %v883_v40 = vmul.f32 %v6564_v25, %v7781_v46  ;;  %v6566_v43 = vpop.eup %6565  ;;  %v964_v32 = vadd.f32 %v7908_v23, %v921_v57  ;;  %v6321_v46 = vld [vmem:[#allocation10 + $0x24] ss:$8 sps:$4 sm:$0xff]   ;;  %v817_v62 = vpop.xlane.xlu1 %816 }
 0x239   : > { %1445 = vmatmul.mubr.bf16.vlgmr.msra.gmra.mrb[0].mxu0 %v990_v37  ;;  %1558 = vmatmul.mubr.bf16.vlgmr.msra.gmra.mrb[0].mxu1 %v990_v37  ;;  %v882_v63 = vmul.f32 %v6564_v25, %v7778_v45  ;;  %v962_v4 = vadd.f32 %v7908_v23, %v919_v14  ;;  %v880_v0 = vmul.f32 %v6562_v27, %v7772_v9  ;;  %6573 = vrsqrt.f32 %v851_v31  ;;  %v6319_v37 = vld [vmem:[#allocation10 + $0x20] ss:$8 sps:$4 sm:$0xff]   ;;  %v6324_v25 = vld [vmem:[#allocation10 + $0x34] ss:$8 sps:$4 sm:$0xff]   ;;  %v6327_v14 = vld [vmem:[#allocation10 + $0x44] ss:$8 sps:$4 sm:$0xff]  }
 0x23a   : > { %v993_v44 = vpack.c.bf16 %v965_v11, %v963_v51  ;;  %2515 = vmatpush1.bf16.msra.mxu0 %v6313_v6  ;;  %v926_v39 = vmul.f32 %v7903_v34, %v883_v40  ;;  %v967_v59 = vadd.f32 %v7912_v42, %v924_v28  ;;  %v885_v33 = vmul.f32 %v6566_v43, %v7795_v53  ;;  %v6322_v11 = vld [vmem:[#allocation10 + $0x30] ss:$8 sps:$4 sm:$0xff]   ;;  %v820_v31 = vpop.xlane.xlu0 %819 }
 0x23b   : > { %v6568_v29 = vpop.eup %6567  ;;  %2516 = vmatprep.subr.bf16.mxu0 %v6318_v16  ;;  %v837_v5 = vmul.f32 0.00390625, %v817_v62  ;;  %v992_v22 = vpack.c.bf16 %v964_v32, %v962_v4  ;;  %v925_v45 = vmul.f32 %v7900_v30, %v882_v63  ;;  %6575 = vrsqrt.f32 %v850_v19  ;;  %v6325_v62 = vld [vmem:[#allocation10 + $0x40] ss:$8 sps:$4 sm:$0xff]   ;;  %v6330_v19 = vld [vmem:[#allocation10 + $0x54] ss:$8 sps:$4 sm:$0xff]  }
 0x23c   : > { %1454 = vmatprep.mubr.bf16.mxu0 %v993_v44  ;;  %1567 = vmatprep.mubr.bf16.mxu1 %v993_v44  ;;  %v969_v7 = vadd.f32 %v7912_v42, %v926_v39  ;;  %v887_v35 = vmul.f32 %v6568_v29, %v7801_v60  ;;  %v836_v27 = vmul.f32 0.00390625, %v814_v20  ;;  %v923_v53 = vmul.f32 %v7900_v30, %v880_v0  ;;  %v823_v58 = vpop.xlane.xlu1 %822 }
 0x23d   : > { %v928_v60 = vmul.f32 %v7903_v34, %v885_v33  ;;  %v853_v51 = vadd.f32 1e-05, %v837_v5  ;;  %v968_v57 = vadd.f32 %v7908_v23, %v925_v45  ;;  %v886_v16 = vmul.f32 %v6568_v29, %v7798_v55  ;;  %v6328_v33 = vld [vmem:[#allocation10 + $0x50] ss:$8 sps:$4 sm:$0xff]  }
 0x23e   : > { %2517 = vmatpush1.bf16.msra.mxu0 %v6316_v15  ;;  %v995_v38 = vpack.c.bf16 %v969_v7, %v967_v59  ;;  %v930_v6 = vmul.f32 %v7903_v34, %v887_v35  ;;  %v852_v44 = vadd.f32 1e-05, %v836_v27  ;;  %v966_v28 = vadd.f32 %v7908_v23, %v923_v53 }
 0x23f   : > { %2518 = vmatprep.subr.bf16.mxu0 %v6321_v46  ;;  %v6570_v9 = vpop.eup %6569  ;;  %v884_v15 = vmul.f32 %v6566_v43, %v7792_v52  ;;  %v971_v32 = vadd.f32 %v7912_v42, %v928_v60  ;;  %6577 = vrsqrt.f32 %v853_v51  ;;  %v839_v55 = vmul.f32 0.00390625, %v823_v58 }
 0x240   : > { %v973_v40 = vadd.f32 %v7912_v42, %v930_v6  ;;  %v891_v56 = vmul.f32 %v6570_v9, %v7821_v24  ;;  %v994_v29 = vpack.c.bf16 %v968_v57, %v966_v28  ;;  %v929_v46 = vmul.f32 %v7900_v30, %v886_v16 }
 0x241   : > { %1455 = vmatmul.mubr.bf16.gmra.mrb[4].mxu0 %v992_v22  ;;  %1568 = vmatmul.mubr.bf16.gmra.mrb[4].mxu1 %v992_v22  ;;  %v6572_v26 = vpop.eup %6571  ;;  %6579 = vrsqrt.f32 %v852_v44  ;;  %v838_v52 = vmul.f32 0.00390625, %v820_v31  ;;  %v927_v43 = vmul.f32 %v7900_v30, %v884_v15  ;;  %v855_v0 = vadd.f32 1e-05, %v839_v55  ;;  %v6333_v22 = vld [vmem:[#allocation10 + $0x64] ss:$8 sps:$4 sm:$0xff]  }
 0x242   : > { %1464 = vmatprep.mubr.bf16.mxu0 %v995_v38  ;;  %1577 = vmatprep.mubr.bf16.mxu1 %v995_v38  ;;  %v889_v39 = vmul.f32 %v6572_v26, %v7815_v2  ;;  %v997_v24 = vpack.c.bf16 %v973_v40, %v971_v32  ;;  %v934_v63 = vmul.f32 %v7903_v34, %v891_v56 }
 0x243   : > { %2519 = vmatpush1.bf16.msra.mxu0 %v6319_v37  ;;  %v6574_v4 = vpop.eup %6573  ;;  %v972_v20 = vadd.f32 %v7908_v23, %v929_v46  ;;  %v890_v59 = vmul.f32 %v6570_v9, %v7818_v17  ;;  %v854_v45 = vadd.f32 1e-05, %v838_v52  ;;  %v970_v37 = vadd.f32 %v7908_v23, %v927_v43  ;;  %v6331_v9 = vld [vmem:[#allocation10 + $0x60] ss:$8 sps:$4 sm:$0xff]  }
 0x244   : > { %2520 = vmatprep.subr.bf16.mxu0 %v6324_v25  ;;  %v932_v2 = vmul.f32 %v7903_v34, %v889_v39  ;;  %v977_v35 = vadd.f32 %v7912_v42, %v934_v63  ;;  %v895_v5 = vmul.f32 %v6574_v4, %v7841_v13  ;;  %v888_v38 = vmul.f32 %v6572_v26, %v7812_v1 }
 0x245   : > { %v6576_v7 = vpop.eup %6575  ;;  %6581 = vrsqrt.f32 %v855_v0  ;;  %v996_v27 = vpack.c.bf16 %v972_v20, %v970_v37  ;;  %v933_v17 = vmul.f32 %v7900_v30, %v890_v59  ;;  %v894_v57 = vmul.f32 %v6574_v4, %v7838_v12  ;;  %v6337_v37 = vld [vmem:[#allocation10 + $0x80] ss:$8 sps:$4 sm:$0xff]  }
 0x246   : > { %v975_v6 = vadd.f32 %v7912_v42, %v932_v2  ;;  %v893_v25 = vmul.f32 %v6576_v7, %v7835_v49  ;;  %v938_v13 = vmul.f32 %v7903_v34, %v895_v5  ;;  %6583 = vrsqrt.f32 %v854_v45  ;;  %v6334_v45 = vld [vmem:[#allocation10 + $0x70] ss:$8 sps:$4 sm:$0xff]  }
 0x247   : > { %2521 = vmatpush1.bf16.msra.mxu0 %v6322_v11  ;;  %v931_v1 = vmul.f32 %v7900_v30, %v888_v38  ;;  %v976_v51 = vadd.f32 %v7908_v23, %v933_v17  ;;  %v892_v40 = vmul.f32 %v6576_v7, %v7832_v48  ;;  %v937_v28 = vmul.f32 %v7900_v30, %v894_v57  ;;  %v6342_v38 = vld [vmem:[#allocation10 + $0x94] ss:$8 sps:$4 sm:$0xff]   ;;  %v6351_v17 = vld [vmem:[#allocation10 + $0xc4] ss:$8 sps:$4 sm:$0xff]  }
 0x248   : > { %2522 = vmatprep.subr.bf16.mxu0 %v6327_v14  ;;  %v999_v53 = vpack.c.bf16 %v977_v35, %v975_v6  ;;  %v936_v49 = vmul.f32 %v7903_v34, %v893_v25  ;;  %v981_v16 = vadd.f32 %v7912_v42, %v938_v13  ;;  %v6340_v6 = vld [vmem:[#allocation10 + $0x90] ss:$8 sps:$4 sm:$0xff]   ;;  %v6343_v25 = vld [vmem:[#allocation10 + $0xa0] ss:$8 sps:$4 sm:$0xff]   ;;  %v9598_v57 = vsub.s32 2, %v7891_v41 }
 0x249   : > { %1465 = vmatmul.mubr.bf16.gmra.mrb[8].mxu0 %v994_v29  ;;  %1578 = vmatmul.mubr.bf16.gmra.mrb[8].mxu1 %v994_v29  ;;  %v6578_v60 = vpop.eup %6577  ;;  %v974_v58 = vadd.f32 %v7908_v23, %v931_v1  ;;  %v935_v32 = vmul.f32 %v7900_v30, %v892_v40  ;;  %v980_v39 = vadd.f32 %v7908_v23, %v937_v28  ;;  %v6352_v13 = vld [vmem:[#allocation10 + $0xd0] ss:$8 sps:$4 sm:$0xff]   ;;  %v6355_v1 = vld [vmem:[#allocation10 + $0xe0] ss:$8 sps:$4 sm:$0xff]  }
 0x24a   : > { %1474 = vmatprep.mubr.bf16.mxu0 %v997_v24  ;;  %1587 = vmatprep.mubr.bf16.mxu1 %v997_v24  ;;  %v899_v11 = vmul.f32 %v6578_v60, %v7861_v10  ;;  %v979_v56 = vadd.f32 %v7912_v42, %v936_v49  ;;  %v6360_v49 = vld [vmem:[#allocation10 + $0xf4] ss:$8 sps:$4 sm:$0xff]  }
 0x24b   : > { %2523 = vmatpush1.bf16.msra.mxu0 %v6325_v62  ;;  %v6580_v26 = vpop.eup %6579  ;;  %v998_v44 = vpack.c.bf16 %v976_v51, %v974_v58  ;;  %v978_v46 = vadd.f32 %v7908_v23, %v935_v32  ;;  %v6363_v51 = vld [vmem:[#allocation10 + $0x104] ss:$8 sps:$4 sm:$0xff]  }
 0x24c   : > { %2524 = vmatprep.subr.bf16.mxu0 %v6330_v19  ;;  %v897_v14 = vmul.f32 %v6580_v26, %v7855_v18  ;;  %v1001_v15 = vpack.c.bf16 %v981_v16, %v979_v56  ;;  %v942_v31 = vmul.f32 %v7903_v34, %v899_v11  ;;  %v898_v18 = vmul.f32 %v6578_v60, %v7858_v21  ;;  %v6357_v60 = vld [vmem:[#allocation10 + $0xe4] ss:$8 sps:$4 sm:$0xff]   ;;  %v1070_v16 = vld [vmem:[%s9670_s4] sm:$0xf] }
 0x24d   : > { %v896_v62 = vmul.f32 %v6580_v26, %v7852_v3  ;;  %v1000_v19 = vpack.c.bf16 %v980_v39, %v978_v46  ;;  %v6358_v26 = vld [vmem:[#allocation10 + $0xf0] ss:$8 sps:$4 sm:$0xff]   ;;  %v9597_v11 = vsub.s32 3, %v7891_v41  ;;  %v8013_v58 = vrot.slane %v1070_v16, %v7894_v54 }
 0x24e   : > { %v940_v10 = vmul.f32 %v7903_v34, %v897_v14  ;;  %v985_v55 = vadd.f32 %v7912_v42, %v942_v31  ;;  %v941_v4 = vmul.f32 %v7900_v30, %v898_v18  ;;  %v8017_v40 = vrot.slane %v1070_v16, %v9598_v57 }
 0x24f   : > { %2525 = vmatpush1.bf16.msra.mxu0 %v6328_v33  ;;  %v6582_v12 = vpop.eup %6581  ;;  %v939_v21 = vmul.f32 %v7900_v30, %v896_v62  ;;  %v8020_v56 = vrot.slane %v1070_v16, %v7897_v61  ;;  %v8024_v14 = vrot.slane %v1070_v16, %v9597_v11 }
 0x250   : > { %2526 = vmatprep.subr.bf16.mxu0 %v6333_v22  ;;  %v6584_v48 = vpop.eup %6583  ;;  %v903_v29 = vmul.f32 %v6582_v12, %v7881_v50  ;;  %v983_v24 = vadd.f32 %v7912_v42, %v940_v10  ;;  %v984_v3 = vadd.f32 %v7908_v23, %v941_v4  ;;  %v902_v2 = vmul.f32 %v6582_v12, %v7878_v47 }
 0x251   : > { %1475 = vmatmul.mubr.bf16.gmra.mrb[12].mxu0 %v996_v27  ;;  %1588 = vmatmul.mubr.bf16.gmra.mrb[12].mxu1 %v996_v27  ;;  %v901_v63 = vmul.f32 %v6584_v48, %v7875_v8  ;;  %v982_v7 = vadd.f32 %v7908_v23, %v939_v21  ;;  %v900_v0 = vmul.f32 %v6584_v48, %v7872_v36  ;;  %v6336_v36 = vld [vmem:[#allocation10 + $0x74] ss:$8 sps:$4 sm:$0xff]   ;;  %v6346_v27 = vld [vmem:[#allocation10 + $0xb0] ss:$8 sps:$4 sm:$0xff]  }
 0x252   : > { %1484 = vmatprep.mubr.bf16.mxu0 %v999_v53  ;;  %1597 = vmatprep.mubr.bf16.mxu1 %v999_v53  ;;  %v1003_v52 = vpack.c.bf16 %v985_v55, %v983_v24  ;;  %v946_v43 = vmul.f32 %v7903_v34, %v903_v29  ;;  %v945_v33 = vmul.f32 %v7900_v30, %v902_v2  ;;  %v6354_v53 = vld [vmem:[#allocation10 + $0xd4] ss:$8 sps:$4 sm:$0xff]  }
 0x253   : > { %2527 = vmatpush1.bf16.msra.mxu0 %v6331_v9  ;;  %v944_v50 = vmul.f32 %v7903_v34, %v901_v63  ;;  %v1002_v59 = vpack.c.bf16 %v984_v3, %v982_v7  ;;  %v943_v34 = vmul.f32 %v7900_v30, %v900_v0  ;;  %v6345_v30 = vld [vmem:[#allocation10 + $0xa4] ss:$8 sps:$4 sm:$0xff]   ;;  %v6349_v9 = vld [vmem:[#allocation10 + $0xc0] ss:$8 sps:$4 sm:$0xff]  }
 0x254   : > { %v989_v8 = vadd.f32 %v7912_v42, %v946_v43  ;;  %v988_v47 = vadd.f32 %v7908_v23, %v945_v33  ;;  %2528 = vmatprep.subr.bf16.mxu0 %v6336_v36 }
 0x255   : > { %v987_v20 = vadd.f32 %v7912_v42, %v944_v50  ;;  %v986_v5 = vadd.f32 %v7908_v23, %v943_v34  ;;  %v6339_v42 = vld [vmem:[#allocation10 + $0x84] ss:$8 sps:$4 sm:$0xff]   ;;  %v6348_v23 = vld [vmem:[#allocation10 + $0xb4] ss:$8 sps:$4 sm:$0xff]  }
 0x257   : > { %v1005_v35 = vpack.c.bf16 %v989_v8, %v987_v20  ;;  %v1004_v22 = vpack.c.bf16 %v988_v47, %v986_v5  ;;  %2529 = vmatpush1.bf16.msra.mxu0 %v6334_v45 }
 0x258   : > { %2530 = vmatprep.subr.bf16.mxu0 %v6339_v42 }
 0x259   : > { %1485 = vmatmul.mubr.bf16.gmra.mrb[16].mxu0 %v998_v44  ;;  %1598 = vmatmul.mubr.bf16.gmra.mrb[16].mxu1 %v998_v44 }
 0x25a   : > { %1494 = vmatprep.mubr.bf16.mxu0 %v1001_v15  ;;  %1607 = vmatprep.mubr.bf16.mxu1 %v1001_v15 }
 0x25b   : > { %2531 = vmatpush1.bf16.msra.mxu0 %v6337_v37 }
 0x25c   : > { %2532 = vmatprep.subr.bf16.mxu0 %v6342_v38 }
 0x25f   : > { %2533 = vmatpush1.bf16.msra.mxu0 %v6340_v6 }
 0x260   : > { %2534 = vmatprep.subr.bf16.mxu0 %v6345_v30 }
 0x261   : > { %1495 = vmatmul.mubr.bf16.gmra.mrb[20].mxu0 %v1000_v19  ;;  %1608 = vmatmul.mubr.bf16.gmra.mrb[20].mxu1 %v1000_v19 }
 0x262   : > { %1504 = vmatprep.mubr.bf16.mxu0 %v1003_v52  ;;  %1617 = vmatprep.mubr.bf16.mxu1 %v1003_v52 }
 0x263   : > { %2535 = vmatpush1.bf16.msra.mxu0 %v6343_v25 }
 0x264   : > { %2536 = vmatprep.subr.bf16.mxu0 %v6348_v23 }
 0x267   : > { %2537 = vmatpush1.bf16.msra.mxu0 %v6346_v27 }
 0x268   : > { %2538 = vmatprep.subr.bf16.mxu0 %v6351_v17 }
 0x269   : > { %1505 = vmatmul.mubr.bf16.gmra.mrb[24].mxu0 %v1002_v59  ;;  %1618 = vmatmul.mubr.bf16.gmra.mrb[24].mxu1 %v1002_v59 }
 0x26a   : > { %1514 = vmatprep.mubr.bf16.mxu0 %v1005_v35  ;;  %1627 = vmatprep.mubr.bf16.mxu1 %v1005_v35 }
 0x26b   : > { %2539 = vmatpush1.bf16.msra.mxu0 %v6349_v9 }
 0x26c   : > { %2540 = vmatprep.subr.bf16.mxu0 %v6354_v53 }
 0x26f   : > { %2541 = vmatpush1.bf16.msra.mxu0 %v6352_v13 }
 0x270   : > { %2542 = vmatprep.subr.bf16.mxu0 %v6357_v60 }
 0x271   : > { %1515 = vmatmul.mubr.bf16.gmra.mrb[28].mxu0 %v1004_v22  ;;  %1628 = vmatmul.mubr.bf16.gmra.mrb[28].mxu1 %v1004_v22 }
 0x273   : > { %2543 = vmatpush1.bf16.msra.mxu0 %v6355_v1 }
 0x274   : > { %2544 = vmatprep.subr.bf16.mxu0 %v6360_v49 }
 0x277   : > { %2545 = vmatpush1.bf16.msra.mxu0 %v6358_v26 }
 0x278   : > { %2627 = vmatprep.subr.bf16.mxu0 %v6363_v51 }
 0x30c   : > { %v1446_v44 = vpop.f32.mrb[0].mxu0  ;;  %v1559_v28 = vpop.f32.mrb[0].mxu1 }
 0x30d   : > { %v8027_v15 = vadd.f32 %v1446_v44, %v8013_v58  ;;  %v8030_v31 = vadd.f32 %v1559_v28, %v8017_v40  ;;  %v1448_v12 = vpop.f32.mrb[1].mxu0  ;;  %v1561_v32 = vpop.f32.mrb[1].mxu1 }
 0x30e   : > { %v8033_v10 = vadd.f32 %v1448_v12, %v8020_v56  ;;  %v8036_v48 = vadd.f32 %v1561_v32, %v8024_v14  ;;  %v1450_v39 = vpop.f32.mrb[2].mxu0  ;;  %v1563_v18 = vpop.f32.mrb[2].mxu1 }
 0x30f   : > { %v5160_v55 = vmul.f32 -1.442695, %v8027_v15  ;;  %v5162_v29 = vmul.f32 -1.442695, %v8030_v31  ;;  %v8041_v46 = vadd.f32 %v1450_v39, %v8013_v58  ;;  %v8044_v62 = vadd.f32 %v1563_v18, %v8017_v40  ;;  %v1452_v24 = vpop.f32.mrb[3].mxu0  ;;  %v1565_v63 = vpop.f32.mrb[3].mxu1 }
 0x310   : > { %v5161_v19 = vmul.f32 -1.442695, %v8033_v10  ;;  %v5163_v4 = vmul.f32 -1.442695, %v8036_v48  ;;  %v8049_v52 = vadd.f32 %v1452_v24, %v8020_v56  ;;  %v8052_v43 = vadd.f32 %v1565_v63, %v8024_v14 }
 0x311   : > { %6585 = vpow2.f32 %v5160_v55  ;;  %v5164_v21 = vmul.f32 -1.442695, %v8041_v46  ;;  %v5166_v50 = vmul.f32 -1.442695, %v8044_v62 }
 0x312   : > { %6587 = vpow2.f32 %v5162_v29  ;;  %v5165_v3 = vmul.f32 -1.442695, %v8049_v52  ;;  %v5167_v2 = vmul.f32 -1.442695, %v8052_v43 }
 0x313   : > { %6589 = vpow2.f32 %v5161_v19 }
 0x314   : > { %6591 = vpow2.f32 %v5163_v4  ;;  %v1456_v8 = vpop.f32.mrb[4].mxu0  ;;  %v1569_v7 = vpop.f32.mrb[4].mxu1 }
 0x315   : > { %6593 = vpow2.f32 %v5164_v21  ;;  %v8059_v0 = vadd.f32 %v1456_v8, %v8013_v58  ;;  %v8062_v20 = vadd.f32 %v1569_v7, %v8017_v40  ;;  %v1458_v59 = vpop.f32.mrb[5].mxu0  ;;  %v1571_v33 = vpop.f32.mrb[5].mxu1 }
 0x316   : > { %6595 = vpow2.f32 %v5166_v50  ;;  %v8065_v35 = vadd.f32 %v1458_v59, %v8020_v56  ;;  %v8068_v34 = vadd.f32 %v1571_v33, %v8024_v14  ;;  %v1460_v47 = vpop.f32.mrb[6].mxu0  ;;  %v1573_v5 = vpop.f32.mrb[6].mxu1 }
 0x317   : > { %6597 = vpow2.f32 %v5165_v3  ;;  %v5168_v22 = vmul.f32 -1.442695, %v8059_v0  ;;  %v5170_v36 = vmul.f32 -1.442695, %v8062_v20  ;;  %v8073_v45 = vadd.f32 %v1460_v47, %v8013_v58  ;;  %v1462_v42 = vpop.f32.mrb[7].mxu0  ;;  %v1575_v37 = vpop.f32.mrb[7].mxu1 }
 0x318   : > { %6599 = vpow2.f32 %v5167_v2  ;;  %v5169_v38 = vmul.f32 -1.442695, %v8065_v35  ;;  %v5171_v6 = vmul.f32 -1.442695, %v8068_v34  ;;  %v8079_v19 = vadd.f32 %v1573_v5, %v8017_v40 }
 0x319   : > { %6601 = vpow2.f32 %v5168_v22  ;;  %v5172_v30 = vmul.f32 -1.442695, %v8073_v45  ;;  %v8082_v2 = vadd.f32 %v1462_v42, %v8020_v56  ;;  %v8085_v33 = vadd.f32 %v1575_v37, %v8024_v14 }
 0x31a   : > { %6603 = vpow2.f32 %v5170_v36 }
 0x31b   : > { %v6586_v25 = vpop.eup %6585  ;;  %6605 = vpow2.f32 %v5169_v38  ;;  %v5174_v38 = vmul.f32 -1.442695, %v8079_v19 }
 0x31c   : > { %v6588_v23 = vpop.eup %6587  ;;  %v1830_v27 = vadd.f32 1.0, %v6586_v25  ;;  %6607 = vpow2.f32 %v5171_v6  ;;  %v1466_v17 = vpop.f32.mrb[8].mxu0 }
 0x31d   : > { %v1579_v9 = vpop.f32.mrb[8].mxu1  ;;  %v6590_v53 = vpop.eup %6589  ;;  %v1832_v13 = vadd.f32 1.0, %v6588_v23  ;;  %6609 = vpow2.f32 %v5172_v30  ;;  %v8091_v6 = vadd.f32 %v1466_v17, %v8013_v58 }
 0x31e   : > { %v1468_v60 = vpop.f32.mrb[9].mxu0  ;;  %v1581_v1 = vpop.f32.mrb[9].mxu1  ;;  %6611 = vrcp.f32 %v1830_v27  ;;  %v1831_v26 = vadd.f32 1.0, %v6590_v53  ;;  %v8098_v37 = vadd.f32 %v1579_v9, %v8017_v40  ;;  %v5175_v9 = vmul.f32 -1.442695, %v8085_v33 }
 0x31f   : > { %v6592_v49 = vpop.eup %6591  ;;  %v1470_v51 = vpop.f32.mrb[10].mxu0  ;;  %6613 = vrcp.f32 %v1832_v13  ;;  %v8101_v27 = vadd.f32 %v1468_v60, %v8020_v56 }
 0x320   : > { %v1583_v16 = vpop.f32.mrb[10].mxu1  ;;  %v6594_v44 = vpop.eup %6593  ;;  %v1833_v28 = vadd.f32 1.0, %v6592_v49  ;;  %6615 = vrcp.f32 %v1831_v26  ;;  %v5173_v26 = vmul.f32 -1.442695, %v8082_v2  ;;  %v8115_v60 = vadd.f32 %v1470_v51, %v8013_v58 }
 0x321   : > { %v1472_v12 = vpop.f32.mrb[11].mxu0  ;;  %v6596_v32 = vpop.eup %6595  ;;  %v1834_v39 = vadd.f32 1.0, %v6594_v44  ;;  %v8109_v44 = vadd.f32 %v1581_v1, %v8024_v14  ;;  %v5177_v1 = vmul.f32 -1.442695, %v8101_v27 }
 0x322   : > { %v1585_v18 = vpop.f32.mrb[11].mxu1  ;;  %v6598_v55 = vpop.eup %6597  ;;  %6617 = vrcp.f32 %v1833_v28  ;;  %v1836_v29 = vadd.f32 1.0, %v6596_v32  ;;  %v8127_v51 = vadd.f32 %v1472_v12, %v8020_v56 }
 0x323   : > { %v6600_v24 = vpop.eup %6599  ;;  %6619 = vrcp.f32 %v1834_v39  ;;  %v1835_v63 = vadd.f32 1.0, %v6598_v55  ;;  %v5176_v55 = vmul.f32 -1.442695, %v8091_v6 }
 0x324   : > { %v6602_v4 = vpop.eup %6601  ;;  %6621 = vrcp.f32 %v1836_v29  ;;  %v1837_v21 = vadd.f32 1.0, %v6600_v24  ;;  %v1476_v8 = vpop.f32.mrb[12].mxu0  ;;  %v5178_v24 = vmul.f32 -1.442695, %v8098_v37 }
 0x325   : > { %v6604_v50 = vpop.eup %6603  ;;  %6623 = vrcp.f32 %v1835_v63  ;;  %v1838_v3 = vadd.f32 1.0, %v6602_v4  ;;  %v1589_v47 = vpop.f32.mrb[12].mxu1  ;;  %v8123_v63 = vadd.f32 %v1583_v16, %v8017_v40 }
 0x326   : > { %v6606_v7 = vpop.eup %6605  ;;  %6625 = vrcp.f32 %v1837_v21  ;;  %v1840_v59 = vadd.f32 1.0, %v6604_v50  ;;  %v8087_v22 = vpop.f32.mrb[13].mxu0  ;;  %v5179_v21 = vmul.f32 -1.442695, %v8109_v44  ;;  %v8130_v50 = vadd.f32 %v1585_v18, %v8024_v14 }
 0x327   : > { %v6608_v5 = vpop.eup %6607  ;;  %6627 = vrcp.f32 %v1838_v3  ;;  %v1839_v36 = vadd.f32 1.0, %v6606_v7  ;;  %v8093_v42 = vpop.f32.mrb[13].mxu1 }
 0x328   : > { %v8095_v30 = vpop.f32.mrb[14].mxu0  ;;  %v6610_v25 = vpop.eup %6609  ;;  %6629 = vrcp.f32 %v1840_v59  ;;  %v1841_v23 = vadd.f32 1.0, %v6608_v5 }
 0x329   : > { %v8103_v53 = vpop.f32.mrb[14].mxu1  ;;  %v8105_v13 = vpop.f32.mrb[15].mxu0  ;;  %6631 = vrcp.f32 %v1839_v36  ;;  %v1842_v17 = vadd.f32 1.0, %v6610_v25  ;;  %v5180_v36 = vmul.f32 -1.442695, %v8115_v60 }
 0x32a   : > { %v6612_v49 = vpop.eup %6611  ;;  %v8111_v28 = vpop.f32.mrb[15].mxu1  ;;  %6633 = vrcp.f32 %v1841_v23 }
 0x32b   : > { %v6614_v32 = vpop.eup %6613  ;;  %6635 = vrcp.f32 %v1842_v17  ;;  %v8137_v5 = vmul.f32 %v6612_v49, %v8027_v15  ;;  %v8154_v15 = vadd.f32 %v1476_v8, %v8013_v58 }
 0x32c   : > { %v6616_v39 = vpop.eup %6615  ;;  %6637 = vpow2.f32 %v5174_v38  ;;  %v8132_v3 = vpop.f32.mrb[16].mxu0  ;;  %v8148_v25 = vmul.f32 %v6614_v32, %v8030_v31  ;;  %v5182_v31 = vmul.f32 -1.442695, %v8123_v63  ;;  %v8166_v32 = vadd.f32 %v1589_v47, %v8017_v40 }
 0x32d   : > { %v8118_v29 = vpop.eup %6617  ;;  %6639 = vpow2.f32 %v5173_v26  ;;  %v8134_v7 = vpop.f32.mrb[16].mxu1  ;;  %9673 = vst [vmem:[#allocation40_spill] sm:$0xff] %v8154_v15 }
 0x32e   : > { %v6620_v4 = vpop.eup %6619  ;;  %6641 = vpow2.f32 %v5175_v9  ;;  %v8143_v38 = vpop.f32.mrb[17].mxu0  ;;  %9671 = vst [vmem:[#allocation38_spill] sm:$0xff] %v8148_v25  ;;  %9674 = vst [vmem:[#allocation41_spill] sm:$0xff] %v8166_v32  ;;  %v5186_v57 = vmul.f32 -1.442695, %v8166_v32 }
 0x32f   : > { %v6622_v59 = vpop.eup %6621  ;;  %v8140_v16 = vmul.f32 %v6620_v4, %v8041_v46  ;;  %v8145_v12 = vpop.f32.mrb[17].mxu1  ;;  %6643 = vpow2.f32 %v5176_v55  ;;  %v5181_v4 = vmul.f32 -1.442695, %v8127_v51  ;;  %v2023_v55 = vmul.f32 %v6616_v39, %v8033_v10 }
 0x330   : > { %v6624_v18 = vpop.eup %6623  ;;  %v8151_v23 = vmul.f32 %v6622_v59, %v8044_v62  ;;  %v8156_v46 = vpop.f32.mrb[18].mxu0  ;;  %6645 = vpow2.f32 %v5178_v24  ;;  %v5183_v24 = vmul.f32 -1.442695, %v8130_v50 }
 0x331   : > { %v8158_v49 = vpop.f32.mrb[18].mxu1  ;;  %v8160_v17 = vpop.eup %6625  ;;  %v2086_v26 = vpack.c.bf16 %v8140_v16, %v8137_v5  ;;  %6647 = vpow2.f32 %v5177_v1  ;;  %v2027_v47 = vmul.f32 %v6624_v18, %v8049_v52  ;;  %v5184_v16 = vmul.f32 -1.442695, %v8154_v15 }
 0x332   : > { %9672 = vst [vmem:[#allocation39_spill] sm:$0xff] %v8151_v23  ;;  %v8168_v62 = vpop.f32.mrb[19].mxu0  ;;  %v8170_v9 = vpop.f32.mrb[19].mxu1  ;;  %6649 = vpow2.f32 %v5179_v21  ;;  %v6361_v23 = vld [vmem:[#allocation10 + $0x100] ss:$8 sps:$4 sm:$0xff]  }
 0x333   : > { %9675 = vst [vmem:[#allocation42_spill] sm:$0xff] %v8170_v9  ;;  %v6628_v8 = vpop.eup %6627  ;;  %6651 = vpow2.f32 %v5180_v36  ;;  %v2087_v18 = vpack.c.bf16 %v2027_v47, %v2023_v55  ;;  %v8202_v47 = vadd.f32 %v8087_v22, %v8020_v56  ;;  %v6369_v22 = vld [vmem:[#allocation10 + $0x124] ss:$8 sps:$4 sm:$0xff]  }
 0x334   : > { %v8175_v59 = vpop.eup %6629  ;;  %6653 = vpow2.f32 %v5182_v31  ;;  %v1496_v41 = vpop.f32.mrb[20].mxu0 }
 0x335   : > { %v8178_v5 = vpop.eup %6631  ;;  %6655 = vpow2.f32 %v5181_v4  ;;  %v8186_v21 = vpop.f32.mrb[20].mxu1  ;;  %v8191_v31 = vadd.f32 %v1496_v41, %v8013_v58  ;;  %v6366_v4 = vld [vmem:[#allocation10 + $0x114] ss:$8 sps:$4 sm:$0xff]   ;;  %2546 = vmatprep.mubr.bf16.mxu0 %v2087_v18  ;;  %9678 = vst [vmem:[#allocation45_spill] sm:$0xff] %v8202_v47 }
 0x336   : > { %v8182_v11 = vpop.eup %6633  ;;  %9676 = vst [vmem:[#allocation43_spill] sm:$0xff] %v8186_v21  ;;  %6657 = vpow2.f32 %v5183_v24  ;;  %v1498_v54 = vpop.f32.mrb[21].mxu0  ;;  %2547 = vmatmul.mubr.bf16.vlgmr.msra.gmra.mrb[32].mxu0 %v2086_v26 }
 0x337   : > { %v6636_v1 = vpop.eup %6635  ;;  %v8188_v25 = vpop.f32.mrb[21].mxu1  ;;  %6659 = vpow2.f32 %v5184_v16  ;;  %2628 = vmatpush1.bf16.msra.mxu0 %v6361_v23 }
 0x338   : > { %v6638_v61 = vpop.eup %6637  ;;  %9677 = vst [vmem:[#allocation44_spill] sm:$0xff] %v8188_v25  ;;  %v1500_v32 = vpop.f32.mrb[22].mxu0  ;;  %6661 = vpow2.f32 %v5186_v57  ;;  %v8205_v16 = vmul.f32 %v6636_v1, %v8073_v45  ;;  %2629 = vmatprep.subr.bf16.mxu0 %v6366_v4  ;;  %v8215_v45 = vmul.f32 %v6628_v8, %v8059_v0  ;;  %v8225_v4 = vadd.f32 %v8095_v30, %v8013_v58 }
 0x339   : > { %v6640_v52 = vpop.eup %6639  ;;  %v1844_v36 = vadd.f32 1.0, %v6638_v61  ;;  %v8193_v15 = vpop.f32.mrb[22].mxu1  ;;  %v8198_v61 = vadd.f32 %v1498_v54, %v8020_v56  ;;  %v8208_v18 = vadd.f32 %v1500_v32, %v8013_v58  ;;  %v6367_v32 = vld [vmem:[#allocation10 + $0x120] ss:$8 sps:$4 sm:$0xff]  }
 0x33a   : > { %v6642_v10 = vpop.eup %6641  ;;  %v1843_v39 = vadd.f32 1.0, %v6640_v52  ;;  %v1502_v21 = vpop.f32.mrb[23].mxu0 }
 0x33b   : > { %v8195_v24 = vpop.f32.mrb[23].mxu1  ;;  %v6644_v9 = vpop.eup %6643  ;;  %6663 = vrcp.f32 %v1844_v36  ;;  %v1845_v25 = vadd.f32 1.0, %v6642_v10  ;;  %v6364_v36 = vld [vmem:[#allocation10 + $0x110] ss:$8 sps:$4 sm:$0xff]   ;;  %v8218_v23 = vadd.f32 %v1502_v21, %v8020_v56 }
 0x33c   : > { %v6646_v55 = vpop.eup %6645  ;;  %6665 = vrcp.f32 %v1843_v39  ;;  %v1846_v41 = vadd.f32 1.0, %v6644_v9  ;;  %v8212_v9 = vadd.f32 %v8093_v42, %v8024_v14  ;;  %v1506_v1 = vpop.f32.mrb[24].mxu0  ;;  %v5185_v42 = vmul.f32 -1.442695, %v8202_v47  ;;  %2630 = vmatpush1.bf16.msra.mxu0 %v6364_v36 }
 0x33d   : > { %v6648_v57 = vpop.eup %6647  ;;  %6667 = vrcp.f32 %v1845_v25  ;;  %v1848_v52 = vadd.f32 1.0, %v6646_v55  ;;  %9679 = vst [vmem:[#allocation46_spill] sm:$0xff] %v8218_v23  ;;  %v8220_v39 = vpop.f32.mrb[24].mxu1  ;;  %2631 = vmatprep.subr.bf16.mxu0 %v6369_v22  ;;  %v5188_v22 = vmul.f32 -1.442695, %v8225_v4 }
 0x33e   : > { %v6650_v54 = vpop.eup %6649  ;;  %6669 = vrcp.f32 %v1846_v41  ;;  %v1847_v10 = vadd.f32 1.0, %v6648_v57  ;;  %9680 = vst [vmem:[#allocation47_spill] sm:$0xff] %v8220_v39  ;;  %v1508_v0 = vpop.f32.mrb[25].mxu0 }
 0x33f   : > { %v6652_v26 = vpop.eup %6651  ;;  %6671 = vrcp.f32 %v1848_v52  ;;  %v1849_v25 = vadd.f32 1.0, %v6650_v54  ;;  %v8227_v8 = vpop.f32.mrb[25].mxu1  ;;  %v8231_v52 = vadd.f32 %v8103_v53, %v8017_v40  ;;  %v8245_v54 = vadd.f32 %v8105_v13, %v8020_v56 }
 0x340   : > { %v6654_v55 = vpop.eup %6653  ;;  %6673 = vrcp.f32 %v1847_v10  ;;  %v1850_v41 = vadd.f32 1.0, %v6652_v26  ;;  %9681 = vst [vmem:[#allocation48_spill] sm:$0xff] %v8227_v8  ;;  %v6372_v10 = vld [vmem:[#allocation10 + $0x134] ss:$8 sps:$4 sm:$0xff]   ;;  %v1510_v26 = vpop.f32.mrb[26].mxu0  ;;  %2632 = vmatpush1.bf16.msra.mxu0 %v6367_v32  ;;  %v2031_v32 = vmul.f32 %v8178_v5, %v8065_v35  ;;  %v8290_v35 = vadd.f32 %v8145_v12, %v8024_v14 }
 0x341   : > { %v6656_v57 = vpop.eup %6655  ;;  %6675 = vrcp.f32 %v1849_v25  ;;  %v1852_v21 = vadd.f32 1.0, %v6654_v55  ;;  %v8235_v47 = vpop.f32.mrb[26].mxu1  ;;  %v5187_v8 = vmul.f32 -1.442695, %v8212_v9  ;;  %v8239_v25 = vadd.f32 %v1506_v1, %v8013_v58  ;;  %2633 = vmatprep.subr.bf16.mxu0 %v6372_v10 }
 0x342   : > { %9682 = vst [vmem:[#allocation49_spill] sm:$0xff] %v8235_v47  ;;  %v6658_v30 = vpop.eup %6657  ;;  %6677 = vrcp.f32 %v1850_v41  ;;  %v1851_v39 = vadd.f32 1.0, %v6656_v57  ;;  %v1512_v55 = vpop.f32.mrb[27].mxu0  ;;  %v8248_v47 = vadd.f32 %v1508_v0, %v8020_v56  ;;  %v8253_v1 = vadd.f32 %v8111_v28, %v8024_v14  ;;  %9689 = vst [vmem:[#allocation56_spill] sm:$0xff] %v8290_v35 }
 0x343   : > { %v8241_v53 = vpop.f32.mrb[27].mxu1  ;;  %v6660_v36 = vpop.eup %6659  ;;  %6679 = vrcp.f32 %v1852_v21  ;;  %v1853_v23 = vadd.f32 1.0, %v6658_v30  ;;  %v8259_v21 = vmul.f32 %v8118_v29, %v8036_v48  ;;  %v5190_v0 = vmul.f32 -1.442695, %v8231_v52  ;;  %v6370_v30 = vld [vmem:[#allocation10 + $0x130] ss:$8 sps:$4 sm:$0xff]  }
 0x344   : > { %9683 = vst [vmem:[#allocation50_spill] sm:$0xff] %v8241_v53  ;;  %9684 = vst [vmem:[#allocation51_spill] sm:$0xff] %v8248_v47  ;;  %v6662_v41 = vpop.eup %6661  ;;  %6681 = vrcp.f32 %v1851_v39  ;;  %v1854_v57 = vadd.f32 1.0, %v6660_v36  ;;  %v8264_v36 = vadd.f32 %v8132_v3, %v8013_v58  ;;  %v8268_v28 = vadd.f32 %v8134_v7, %v8017_v40  ;;  %v6375_v29 = vld [vmem:[#allocation10 + $0x144] ss:$8 sps:$4 sm:$0xff]   ;;  %v8281_v47 = vpop.f32.mrb[28].mxu1  ;;  %2634 = vmatpush1.bf16.msra.mxu0 %v6370_v30 }
 0x345   : > { %v8255_v53 = vpop.eup %6663  ;;  %6683 = vrcp.f32 %v1853_v23  ;;  %v1856_v13 = vadd.f32 1.0, %v6662_v41  ;;  %v8271_v48 = vadd.f32 %v1510_v26, %v8013_v58  ;;  %v8279_v3 = vadd.f32 %v1512_v55, %v8020_v56  ;;  %9688 = vst [vmem:[#allocation55_spill] sm:$0xff] %v8281_v47  ;;  %v8292_v5 = vpop.f32.mrb[29].mxu1  ;;  %2635 = vmatprep.subr.bf16.mxu0 %v6375_v29 }
 0x346   : > { %v6666_v39 = vpop.eup %6665  ;;  %6685 = vrcp.f32 %v1854_v57  ;;  %9685 = vst [vmem:[#allocation52_spill] sm:$0xff] %v8264_v36  ;;  %v1516_v57 = vpop.f32.mrb[28].mxu0  ;;  %v5189_v10 = vmul.f32 -1.442695, %v8245_v54  ;;  %v8286_v26 = vadd.f32 %v8143_v38, %v8020_v56  ;;  %9690 = vst [vmem:[#allocation57_spill] sm:$0xff] %v8292_v5  ;;  %v8306_v5 = vadd.f32 %v8158_v49, %v8017_v40 }
 0x347   : > { %9686 = vst [vmem:[#allocation53_spill] sm:$0xff] %v8271_v48  ;;  %v8273_v23 = vpop.eup %6667  ;;  %v2035_v41 = vmul.f32 %v6666_v39, %v8082_v2  ;;  %6687 = vrcp.f32 %v1856_v13  ;;  %9687 = vst [vmem:[#allocation54_spill] sm:$0xff] %v8279_v3  ;;  %v1518_v2 = vpop.f32.mrb[29].mxu0  ;;  %v5191_v13 = vmul.f32 -1.442695, %v8253_v1  ;;  %v8320_v49 = vadd.f32 %v1516_v57, %v8013_v58 }
 0x348   : > { %v6670_v7 = vpop.eup %6669  ;;  %6689 = vpow2.f32 %v5185_v42  ;;  %v8299_v42 = vadd.f32 %v8156_v46, %v8013_v58  ;;  %v6373_v38 = vld [vmem:[#allocation10 + $0x140] ss:$8 sps:$4 sm:$0xff]   ;;  %v1520_v47 = vpop.f32.mrb[30].mxu0  ;;  %v5192_v48 = vmul.f32 -1.442695, %v8264_v36 }
 0x349   : > { %v8294_v55 = vpop.eup %6671  ;;  %6691 = vpow2.f32 %v5187_v8  ;;  %v2091_v39 = vpack.c.bf16 %v2035_v41, %v2031_v32  ;;  %v8301_v3 = vpop.f32.mrb[30].mxu1  ;;  %v8310_v8 = vadd.f32 %v8168_v62, %v8020_v56  ;;  %v6378_v46 = vld [vmem:[#allocation10 + $0x154] ss:$8 sps:$4 sm:$0xff]   ;;  %9693 = vst [vmem:[#allocation60_spill] sm:$0xff] %v8320_v49  ;;  %v5193_v62 = vmul.f32 -1.442695, %v8286_v26  ;;  %2636 = vmatpush1.bf16.msra.mxu0 %v6373_v38 }
 0x34a   : > { %9691 = vst [vmem:[#allocation58_spill] sm:$0xff] %v8301_v3  ;;  %v6674_v12 = vpop.eup %6673  ;;  %6693 = vpow2.f32 %v5188_v22  ;;  %v1522_v32 = vpop.f32.mrb[31].mxu0  ;;  %v8316_v3 = vmul.f32 %v8160_v17, %v8052_v43  ;;  %v5194_v22 = vmul.f32 -1.442695, %v8268_v28  ;;  %v5195_v29 = vmul.f32 -1.442695, %v8290_v35  ;;  %2637 = vmatprep.subr.bf16.mxu0 %v6378_v46 }
 0x34b   : > { %v8312_v30 = vpop.f32.mrb[31].mxu1  ;;  %v6676_v41 = vpop.eup %6675  ;;  %6695 = vpow2.f32 %v5190_v0  ;;  %2556 = vmatprep.mubr.bf16.mxu0 %v2091_v39  ;;  %v8328_v43 = vadd.f32 %v1518_v2, %v8020_v56  ;;  %v2038_v0 = vmul.f32 %v6670_v7, %v8091_v6  ;;  %v5196_v57 = vmul.f32 -1.442695, %v8299_v42  ;;  %v6381_v2 = vld [vmem:[#allocation10 + $0x164] ss:$8 sps:$4 sm:$0xff]  }
 0x34c   : > { %9692 = vst [vmem:[#allocation59_spill] sm:$0xff] %v8312_v30  ;;  %v6678_v36 = vpop.eup %6677  ;;  %6697 = vpow2.f32 %v5189_v10  ;;  %v9694_v30 = vpack.c.bf16 %v8205_v16, %v8215_v45  ;;  %v6376_v10 = vld [vmem:[#allocation10 + $0x150] ss:$8 sps:$4 sm:$0xff]   ;;  %v2039_v35 = vmul.f32 %v6674_v12, %v8101_v27  ;;  %v5198_v16 = vmul.f32 -1.442695, %v8306_v5 }
 0x34d   : > { %v6680_v17 = vpop.eup %6679  ;;  %v2042_v39 = vmul.f32 %v6678_v36, %v8115_v60  ;;  %6699 = vpow2.f32 %v5191_v13  ;;  %v5197_v45 = vmul.f32 -1.442695, %v8310_v8  ;;  %v8338_v36 = vadd.f32 %v1520_v47, %v8013_v58  ;;  %2638 = vmatpush1.bf16.msra.mxu0 %v6376_v10  ;;  %v6382_v46 = vld [vmem:[#allocation10 + $0x170] ss:$8 sps:$4 sm:$0xff]  }
 0x34e   : > { %2557 = vmatmul.mubr.bf16.gmra.mrb[36].mxu0 %v9694_v30  ;;  %v6682_v49 = vpop.eup %6681  ;;  %6701 = vpow2.f32 %v5192_v48  ;;  %v8344_v27 = vmul.f32 %v8255_v53, %v8079_v19  ;;  %v8348_v48 = vmul.f32 %v8273_v23, %v8085_v33  ;;  %v8351_v13 = vadd.f32 %v1522_v32, %v8020_v56  ;;  %v6379_v53 = vld [vmem:[#allocation10 + $0x160] ss:$8 sps:$4 sm:$0xff]   ;;  %2639 = vmatprep.subr.bf16.mxu0 %v6381_v2 }
 0x34f   : > { %v6684_v30 = vpop.eup %6683  ;;  %v2043_v6 = vmul.f32 %v6682_v49, %v8127_v51  ;;  %6703 = vpow2.f32 %v5194_v22  ;;  %v2094_v60 = vpack.c.bf16 %v2042_v39, %v2038_v0  ;;  %v8357_v58 = vmul.f32 %v8175_v59, %v8062_v20  ;;  %v6384_v20 = vld [vmem:[#allocation10 + $0x174] ss:$8 sps:$4 sm:$0xff]   ;;  %v6387_v49 = vld [vmem:[#allocation10 + $0x184] ss:$8 sps:$4 sm:$0xff]  }
 0x350   : > { %v8340_v7 = vpop.eup %6685  ;;  %6705 = vpow2.f32 %v5193_v62  ;;  %v8360_v47 = vmul.f32 %v6684_v30, %v8130_v50  ;;  %v8364_v33 = vmul.f32 %v8182_v11, %v8068_v34  ;;  %v8368_v56 = vmul.f32 %v8294_v55, %v8098_v37  ;;  %v9695_v30 = vld [vmem:[#allocation42_spill] sm:$0xff] }
 0x351   : > { %v8353_v51 = vpop.eup %6687  ;;  %6707 = vpow2.f32 %v5195_v29  ;;  %v2095_v19 = vpack.c.bf16 %v2043_v6, %v2039_v35  ;;  %v8371_v23 = vmul.f32 %v6680_v17, %v8123_v63  ;;  %v8374_v59 = vmul.f32 %v6676_v41, %v8109_v44  ;;  %2640 = vmatpush1.bf16.msra.mxu0 %v6379_v53 }
 0x352   : > { %v6690_v38 = vpop.eup %6689  ;;  %6709 = vpow2.f32 %v5196_v57  ;;  %2641 = vmatprep.subr.bf16.mxu0 %v6384_v20  ;;  %v8388_v6 = vadd.f32 %v9695_v30, %v8024_v14  ;;  %v5204_v30 = vmul.f32 -1.442695, %v8208_v18  ;;  %v5221_v11 = vmul.f32 -1.442695, %v8351_v13 }
 0x353   : > { %v6692_v50 = vpop.eup %6691  ;;  %v1855_v35 = vadd.f32 1.0, %v6690_v38  ;;  %6711 = vpow2.f32 %v5198_v16  ;;  %2566 = vmatprep.mubr.bf16.mxu0 %v2095_v19  ;;  %v6385_v16 = vld [vmem:[#allocation10 + $0x180] ss:$8 sps:$4 sm:$0xff]  }
 0x354   : > { %v6694_v34 = vpop.eup %6693  ;;  %v1857_v12 = vadd.f32 1.0, %v6692_v50  ;;  %6713 = vpow2.f32 %v5197_v45  ;;  %v9696_v50 = vld [vmem:[#allocation43_spill] sm:$0xff] }
 0x355   : > { %v6696_v55 = vpop.eup %6695  ;;  %6715 = vrcp.f32 %v1855_v35  ;;  %v1858_v44 = vadd.f32 1.0, %v6694_v34  ;;  %2642 = vmatpush1.bf16.msra.mxu0 %v6382_v46  ;;  %v8392_v35 = vadd.f32 %v9696_v50, %v8017_v40  ;;  %v9697_v34 = vld [vmem:[#allocation44_spill] sm:$0xff]  ;;  %v8400_v46 = vadd.f32 %v8193_v15, %v8017_v40 }
 0x356   : > { %2567 = vmatmul.mubr.bf16.gmra.mrb[40].mxu0 %v2094_v60  ;;  %v6698_v41 = vpop.eup %6697  ;;  %6717 = vrcp.f32 %v1857_v12  ;;  %v1860_v22 = vadd.f32 1.0, %v6696_v55  ;;  %2643 = vmatprep.subr.bf16.mxu0 %v6387_v49  ;;  %v6390_v60 = vld [vmem:[#allocation10 + $0x194] ss:$8 sps:$4 sm:$0xff]   ;;  %v8396_v12 = vadd.f32 %v9697_v34, %v8024_v14  ;;  %v5201_v15 = vmul.f32 -1.442695, %v8198_v61 }
 0x357   : > { %v6700_v29 = vpop.eup %6699  ;;  %6719 = vrcp.f32 %v1858_v44  ;;  %v1859_v17 = vadd.f32 1.0, %v6698_v41  ;;  %v6388_v41 = vld [vmem:[#allocation10 + $0x190] ss:$8 sps:$4 sm:$0xff]  }
 0x358   : > { %v6702_v0 = vpop.eup %6701  ;;  %6721 = vrcp.f32 %v1860_v22  ;;  %v1861_v39 = vadd.f32 1.0, %v6700_v29  ;;  %v5199_v29 = vmul.f32 -1.442695, %v8388_v6 }
 0x359   : > { %v6704_v57 = vpop.eup %6703  ;;  %6723 = vrcp.f32 %v1859_v17  ;;  %v1862_v10 = vadd.f32 1.0, %v6702_v0  ;;  %2644 = vmatpush1.bf16.msra.mxu0 %v6385_v16  ;;  %v6393_v17 = vld [vmem:[#allocation10 + $0x1a4] ss:$8 sps:$4 sm:$0xff]   ;;  %v5203_v16 = vmul.f32 -1.442695, %v8396_v12 }
 0x35a   : > { %v6706_v45 = vpop.eup %6705  ;;  %6725 = vrcp.f32 %v1861_v39  ;;  %v1864_v2 = vadd.f32 1.0, %v6704_v57  ;;  %2645 = vmatprep.subr.bf16.mxu0 %v6390_v60  ;;  %v5200_v57 = vmul.f32 -1.442695, %v8191_v31  ;;  %v5206_v60 = vmul.f32 -1.442695, %v8400_v46 }
 0x35b   : > { %v6708_v19 = vpop.eup %6707  ;;  %6727 = vrcp.f32 %v1862_v10  ;;  %v1863_v53 = vadd.f32 1.0, %v6706_v45  ;;  %v5202_v45 = vmul.f32 -1.442695, %v8392_v35 }
 0x35c   : > { %v6710_v38 = vpop.eup %6709  ;;  %6729 = vrcp.f32 %v1864_v2  ;;  %v1865_v20 = vadd.f32 1.0, %v6708_v19  ;;  %v8411_v19 = vadd.f32 %v8195_v24, %v8024_v14 }
 0x35d   : > { %v6712_v55 = vpop.eup %6711  ;;  %6731 = vrcp.f32 %v1863_v53  ;;  %v1866_v44 = vadd.f32 1.0, %v6710_v38  ;;  %2646 = vmatpush1.bf16.msra.mxu0 %v6388_v41  ;;  %v6391_v53 = vld [vmem:[#allocation10 + $0x1a0] ss:$8 sps:$4 sm:$0xff]  }
 0x35e   : > { %v6714_v22 = vpop.eup %6713  ;;  %6733 = vrcp.f32 %v1865_v20  ;;  %v1868_v49 = vadd.f32 1.0, %v6712_v55  ;;  %v9698_v20 = vld [vmem:[#allocation40_spill] sm:$0xff]  ;;  %v9699_v55 = vld [vmem:[#allocation46_spill] sm:$0xff]  ;;  %2647 = vmatprep.subr.bf16.mxu0 %v6393_v17  ;;  %v9701_v41 = vld [vmem:[#allocation47_spill] sm:$0xff] }
 0x35f   : > { %v6716_v0 = vpop.eup %6715  ;;  %6735 = vrcp.f32 %v1866_v44  ;;  %v1867_v39 = vadd.f32 1.0, %v6714_v22  ;;  %v2046_v50 = vmul.f32 %v8340_v7, %v9698_v20  ;;  %v5205_v44 = vmul.f32 -1.442695, %v9699_v55  ;;  %v6396_v22 = vld [vmem:[#allocation10 + $0x1b4] ss:$8 sps:$4 sm:$0xff]  }
 0x360   : > { %v6718_v10 = vpop.eup %6717  ;;  %6737 = vrcp.f32 %v1868_v49  ;;  %v8426_v32 = vadd.f32 %v9701_v41, %v8017_v40  ;;  %v9705_v41 = vld [vmem:[#allocation52_spill] sm:$0xff] }
 0x361   : > { %v6720_v2 = vpop.eup %6719  ;;  %6739 = vrcp.f32 %v1867_v39  ;;  %v9700_v39 = vld [vmem:[#allocation41_spill] sm:$0xff]  ;;  %v8431_v63 = vmul.f32 %v6718_v10, %v8212_v9  ;;  %2648 = vmatpush1.bf16.msra.mxu0 %v6391_v53  ;;  %v6399_v10 = vld [vmem:[#allocation10 + $0x1c4] ss:$8 sps:$4 sm:$0xff]  }
 0x362   : > { %v6722_v38 = vpop.eup %6721  ;;  %v2050_v34 = vmul.f32 %v6720_v2, %v8225_v4  ;;  %6741 = vpow2.f32 %v5199_v29  ;;  %v8419_v62 = vmul.f32 %v8353_v51, %v9700_v39  ;;  %v9702_v4 = vld [vmem:[#allocation45_spill] sm:$0xff]  ;;  %2649 = vmatprep.subr.bf16.mxu0 %v6396_v22 }
 0x363   : > { %v6724_v49 = vpop.eup %6723  ;;  %v8422_v24 = vmul.f32 %v6722_v38, %v8231_v52  ;;  %6743 = vpow2.f32 %v5200_v57  ;;  %v2047_v29 = vmul.f32 %v6716_v0, %v9702_v4  ;;  %v5207_v0 = vmul.f32 -1.442695, %v8411_v19 }
 0x364   : > { %v6726_v7 = vpop.eup %6725  ;;  %v2051_v2 = vmul.f32 %v6724_v49, %v8245_v54  ;;  %6745 = vpow2.f32 %v5202_v45  ;;  %v2098_v17 = vpack.c.bf16 %v2050_v34, %v2046_v50  ;;  %v9703_v54 = vld [vmem:[#allocation48_spill] sm:$0xff]  ;;  %v6394_v50 = vld [vmem:[#allocation10 + $0x1b0] ss:$8 sps:$4 sm:$0xff]   ;;  %v9704_v49 = vld [vmem:[#allocation51_spill] sm:$0xff] }
 0x365   : > { %v6728_v20 = vpop.eup %6727  ;;  %v8434_v51 = vmul.f32 %v6726_v7, %v8253_v1  ;;  %6747 = vpow2.f32 %v5201_v15  ;;  %v8441_v45 = vadd.f32 %v9703_v54, %v8024_v14  ;;  %v5208_v1 = vmul.f32 -1.442695, %v8239_v25  ;;  %2650 = vmatpush1.bf16.msra.mxu0 %v6394_v50 }
 0x366   : > { %v6730_v57 = vpop.eup %6729  ;;  %6749 = vpow2.f32 %v5203_v16  ;;  %v2099_v38 = vpack.c.bf16 %v2051_v2, %v2047_v29  ;;  %v5210_v16 = vmul.f32 -1.442695, %v8426_v32  ;;  %v5209_v39 = vmul.f32 -1.442695, %v9704_v49  ;;  %v6397_v29 = vld [vmem:[#allocation10 + $0x1c0] ss:$8 sps:$4 sm:$0xff]   ;;  %2651 = vmatprep.subr.bf16.mxu0 %v6399_v10 }
 0x367   : > { %v6732_v9 = vpop.eup %6731  ;;  %6751 = vpow2.f32 %v5204_v30  ;;  %v2054_v30 = vmul.f32 %v6728_v20, %v9705_v41  ;;  %v5211_v4 = vmul.f32 -1.442695, %v8441_v45 }
 0x368   : > { %v8446_v53 = vpop.eup %6733  ;;  %6753 = vpow2.f32 %v5206_v60  ;;  %2576 = vmatprep.mubr.bf16.mxu0 %v2099_v38  ;;  %v8454_v60 = vmul.f32 %v6730_v57, %v8268_v28  ;;  %v2055_v20 = vmul.f32 %v6732_v9, %v8286_v26  ;;  %v6405_v26 = vld [vmem:[#allocation10 + $0x1e4] ss:$8 sps:$4 sm:$0xff]  }
 0x369   : > { %v6736_v34 = vpop.eup %6735  ;;  %6755 = vpow2.f32 %v5205_v44  ;;  %2577 = vmatmul.mubr.bf16.gmra.mrb[44].mxu0 %v2098_v17  ;;  %v6402_v44 = vld [vmem:[#allocation10 + $0x1d4] ss:$8 sps:$4 sm:$0xff]  }
 0x36a   : > { %v6738_v22 = vpop.eup %6737  ;;  %v2058_v7 = vmul.f32 %v6736_v34, %v8299_v42  ;;  %6757 = vpow2.f32 %v5207_v0  ;;  %9706 = vst [vmem:[#allocation42_spill] sm:$0xff] %v8454_v60  ;;  %2652 = vmatpush1.bf16.msra.mxu0 %v6397_v29 }
 0x36b   : > { %v6740_v2 = vpop.eup %6739  ;;  %v8457_v54 = vmul.f32 %v6738_v22, %v8306_v5  ;;  %6759 = vpow2.f32 %v5208_v1  ;;  %v6400_v1 = vld [vmem:[#allocation10 + $0x1d0] ss:$8 sps:$4 sm:$0xff]   ;;  %2653 = vmatprep.subr.bf16.mxu0 %v6402_v44 }
 0x36c   : > { %v6742_v17 = vpop.eup %6741  ;;  %v2059_v42 = vmul.f32 %v6740_v2, %v8310_v8  ;;  %6761 = vpow2.f32 %v5210_v16  ;;  %v2102_v0 = vpack.c.bf16 %v2058_v7, %v2054_v30  ;;  %v6403_v7 = vld [vmem:[#allocation10 + $0x1e0] ss:$8 sps:$4 sm:$0xff]   ;;  %v6408_v2 = vld [vmem:[#allocation10 + $0x1f4] ss:$8 sps:$4 sm:$0xff]  }
 0x36d   : > { %v6744_v38 = vpop.eup %6743  ;;  %v1869_v50 = vadd.f32 1.0, %v6742_v17  ;;  %6763 = vpow2.f32 %v5209_v39 }
 0x36e   : > { %v6746_v57 = vpop.eup %6745  ;;  %v1870_v34 = vadd.f32 1.0, %v6744_v38  ;;  %6765 = vpow2.f32 %v5211_v4  ;;  %v2103_v5 = vpack.c.bf16 %v2059_v42, %v2055_v20  ;;  %2654 = vmatpush1.bf16.msra.mxu0 %v6400_v1  ;;  %v9707_v20 = vld [vmem:[#allocation49_spill] sm:$0xff] }
 0x36f   : > { %v6748_v10 = vpop.eup %6747  ;;  %6767 = vrcp.f32 %v1869_v50  ;;  %v1872_v22 = vadd.f32 1.0, %v6746_v57  ;;  %2655 = vmatprep.subr.bf16.mxu0 %v6405_v26  ;;  %v8465_v42 = vadd.f32 %v9707_v20, %v8017_v40 }
 0x370   : > { %v6750_v8 = vpop.eup %6749  ;;  %6769 = vrcp.f32 %v1870_v34  ;;  %v1871_v9 = vadd.f32 1.0, %v6748_v10  ;;  %2586 = vmatprep.mubr.bf16.mxu0 %v2103_v5  ;;  %v6406_v34 = vld [vmem:[#allocation10 + $0x1f0] ss:$8 sps:$4 sm:$0xff]  }
 0x371   : > { %v6752_v16 = vpop.eup %6751  ;;  %6771 = vrcp.f32 %v1872_v22  ;;  %v1873_v39 = vadd.f32 1.0, %v6750_v8  ;;  %2587 = vmatmul.mubr.bf16.gmra.mrb[48].mxu0 %v2102_v0  ;;  %v9708_v10 = vld [vmem:[#allocation50_spill] sm:$0xff] }
 0x372   : > { %v6754_v41 = vpop.eup %6753  ;;  %6773 = vrcp.f32 %v1871_v9  ;;  %v1874_v30 = vadd.f32 1.0, %v6752_v16  ;;  %2656 = vmatpush1.bf16.msra.mxu0 %v6403_v7  ;;  %v8469_v22 = vadd.f32 %v9708_v10, %v8024_v14  ;;  %v9709_v9 = vld [vmem:[#allocation53_spill] sm:$0xff]  ;;  %v9711_v7 = vld [vmem:[#allocation55_spill] sm:$0xff] }
 0x373   : > { %v6756_v4 = vpop.eup %6755  ;;  %6775 = vrcp.f32 %v1873_v39  ;;  %v1876_v29 = vadd.f32 1.0, %v6754_v41  ;;  %2657 = vmatprep.subr.bf16.mxu0 %v6408_v2  ;;  %v5212_v16 = vmul.f32 -1.442695, %v9709_v9  ;;  %v5214_v39 = vmul.f32 -1.442695, %v8465_v42  ;;  %v9713_v2 = vld [vmem:[#allocation56_spill] sm:$0xff] }
 0x374   : > { %v6758_v44 = vpop.eup %6757  ;;  %6777 = vrcp.f32 %v1874_v30  ;;  %v1875_v17 = vadd.f32 1.0, %v6756_v4  ;;  %v9710_v30 = vld [vmem:[#allocation54_spill] sm:$0xff]  ;;  %v5215_v10 = vmul.f32 -1.442695, %v8469_v22 }
 0x375   : > { %v6760_v38 = vpop.eup %6759  ;;  %6779 = vrcp.f32 %v1876_v29  ;;  %v1877_v0 = vadd.f32 1.0, %v6758_v44  ;;  %v5213_v4 = vmul.f32 -1.442695, %v9710_v30  ;;  %v8476_v29 = vadd.f32 %v9711_v7, %v8017_v40  ;;  %v9712_v44 = vld [vmem:[#allocation57_spill] sm:$0xff] }
 0x376   : > { %v6762_v50 = vpop.eup %6761  ;;  %6781 = vrcp.f32 %v1875_v17  ;;  %v1878_v57 = vadd.f32 1.0, %v6760_v38  ;;  %v8480_v17 = vadd.f32 %v9712_v44, %v8024_v14  ;;  %v8484_v38 = vmul.f32 %v8446_v53, %v9713_v2  ;;  %2658 = vmatpush1.bf16.msra.mxu0 %v6406_v34  ;;  %v9715_v44 = vld [vmem:[#allocation60_spill] sm:$0xff] }
 0x377   : > { %v6764_v5 = vpop.eup %6763  ;;  %6783 = vrcp.f32 %v1877_v0  ;;  %v1880_v1 = vadd.f32 1.0, %v6762_v50  ;;  %v9714_v50 = vld [vmem:[#allocation58_spill] sm:$0xff]  ;;  %v5216_v28 = vmul.f32 -1.442695, %v9715_v44 }
 0x378   : > { %v6766_v26 = vpop.eup %6765  ;;  %v1879_v8 = vadd.f32 1.0, %v6764_v5  ;;  %6785 = vrcp.f32 %v1878_v57  ;;  %v8491_v57 = vadd.f32 %v9714_v50, %v8017_v40  ;;  %v5219_v34 = vmul.f32 -1.442695, %v8480_v17 }
 0x379   : > { %v6768_v41 = vpop.eup %6767  ;;  %6787 = vrcp.f32 %v1880_v1  ;;  %v5217_v1 = vmul.f32 -1.442695, %v8328_v43 }
 0x37a   : > { %v6770_v20 = vpop.eup %6769  ;;  %v8487_v0 = vmul.f32 %v6768_v41, %v8388_v6  ;;  %6789 = vrcp.f32 %v1879_v8  ;;  %v5218_v6 = vmul.f32 -1.442695, %v8476_v29  ;;  %v5220_v8 = vmul.f32 -1.442695, %v8338_v36 }
 0x37b   : > { %v6772_v5 = vpop.eup %6771  ;;  %6791 = vpow2.f32 %v5212_v16  ;;  %v5222_v41 = vmul.f32 -1.442695, %v8491_v57  ;;  %v2062_v50 = vmul.f32 %v6770_v20, %v8191_v31 }
 0x37c   : > { %v6774_v7 = vpop.eup %6773  ;;  %6793 = vpow2.f32 %v5214_v39  ;;  %v9716_v39 = vld [vmem:[#allocation59_spill] sm:$0xff]  ;;  %v8509_v37 = vmul.f32 %v6772_v5, %v8392_v35 }
 0x37d   : > { %v6776_v2 = vpop.eup %6775  ;;  %6795 = vpow2.f32 %v5213_v4  ;;  %v8506_v53 = vadd.f32 %v9716_v39, %v8024_v14  ;;  %v2063_v31 = vmul.f32 %v6774_v7, %v8198_v61  ;;  %v1881_v7 = vadd.f32 1.0, %v6766_v26 }
 0x37e   : > { %v6778_v40 = vpop.eup %6777  ;;  %6797 = vpow2.f32 %v5215_v10  ;;  %v8518_v14 = vmul.f32 %v6776_v2, %v8396_v12 }
 0x37f   : > { %v6780_v16 = vpop.eup %6779  ;;  %v2066_v52 = vmul.f32 %v6778_v40, %v8208_v18  ;;  %6799 = vpow2.f32 %v5216_v28  ;;  %v5223_v28 = vmul.f32 -1.442695, %v8506_v53 }
 0x380   : > { %v6782_v15 = vpop.eup %6781  ;;  %v8512_v4 = vmul.f32 %v6780_v16, %v8400_v46  ;;  %6801 = vpow2.f32 %v5218_v6 }
 0x381   : > { %v6784_v60 = vpop.eup %6783  ;;  %v2067_v18 = vmul.f32 %v6782_v15, %v9699_v55  ;;  %v2106_v20 = vpack.c.bf16 %v2066_v52, %v2062_v50  ;;  %6803 = vpow2.f32 %v5217_v1 }
 0x382   : > { %v8521_v10 = vmul.f32 %v6784_v60, %v8411_v19  ;;  %v2108_v35 = vpack.c.bf16 %v8512_v4, %v8509_v37  ;;  %v6786_v46 = vpop.eup %6785  ;;  %6805 = vpow2.f32 %v5219_v34 }
 0x383   : > { %v2107_v5 = vpack.c.bf16 %v2067_v18, %v2063_v31  ;;  %v6788_v61 = vpop.eup %6787  ;;  %6807 = vpow2.f32 %v5220_v8 }
 0x384   : > { %v2109_v55 = vpack.c.bf16 %v8521_v10, %v8518_v14  ;;  %v6790_v12 = vpop.eup %6789  ;;  %6809 = vpow2.f32 %v5222_v41  ;;  %v6873_v10 = vld [vmem:[%s7585_s1] sm:$0xff] }
 0x385   : > { %2596 = vmatprep.mubr.bf16.mxu0 %v2107_v5  ;;  %v6792_v19 = vpop.eup %6791  ;;  %6811 = vpow2.f32 %v5221_v11 }
 0x386   : > { %2597 = vmatmul.mubr.bf16.gmra.mrb[52].mxu0 %v2106_v20  ;;  %v6794_v52 = vpop.eup %6793  ;;  %v1882_v15 = vadd.f32 1.0, %v6792_v19  ;;  %6813 = vpow2.f32 %v5223_v28 }
 0x387   : > { %v6796_v60 = vpop.eup %6795  ;;  %6815 = vrcp.f32 %v1881_v7  ;;  %v1884_v2 = vadd.f32 1.0, %v6794_v52 }
 0x388   : > { %v6798_v6 = vpop.eup %6797  ;;  %6817 = vrcp.f32 %v1882_v15  ;;  %v1883_v1 = vadd.f32 1.0, %v6796_v60 }
 0x389   : > { %v6800_v26 = vpop.eup %6799  ;;  %6819 = vrcp.f32 %v1884_v2  ;;  %v1885_v40 = vadd.f32 1.0, %v6798_v6  ;;  %v2070_v6 = vmul.f32 %v6786_v46, %v8239_v25 }
 0x38a   : > { %v6802_v34 = vpop.eup %6801  ;;  %6821 = vrcp.f32 %v1883_v1  ;;  %v1886_v8 = vadd.f32 1.0, %v6800_v26 }
 0x38b   : > { %v6804_v41 = vpop.eup %6803  ;;  %6823 = vrcp.f32 %v1885_v40  ;;  %v1888_v16 = vadd.f32 1.0, %v6802_v34  ;;  %v2072_v40 = vmul.f32 %v6788_v61, %v8426_v32 }
 0x38c   : > { %v6806_v11 = vpop.eup %6805  ;;  %6825 = vrcp.f32 %v1886_v8  ;;  %v1887_v50 = vadd.f32 1.0, %v6804_v41  ;;  %v2071_v41 = vmul.f32 %v6790_v12, %v9704_v49 }
 0x38d   : > { %v6808_v39 = vpop.eup %6807  ;;  %6827 = vrcp.f32 %v1888_v16  ;;  %v1889_v31 = vadd.f32 1.0, %v6806_v11 }
 0x38e   : > { %v6810_v18 = vpop.eup %6809  ;;  %6829 = vrcp.f32 %v1887_v50  ;;  %v1890_v20 = vadd.f32 1.0, %v6808_v39 }
 0x38f   : > { %v6812_v28 = vpop.eup %6811  ;;  %6831 = vrcp.f32 %v1889_v31  ;;  %v1892_v5 = vadd.f32 1.0, %v6810_v18 }
 0x390   : > { %v6814_v7 = vpop.eup %6813  ;;  %6833 = vrcp.f32 %v1890_v20  ;;  %v1891_v19 = vadd.f32 1.0, %v6812_v28 }
 0x391   : > { %v6816_v52 = vpop.eup %6815  ;;  %6835 = vrcp.f32 %v1892_v5  ;;  %v1893_v15 = vadd.f32 1.0, %v6814_v7 }
 0x392   : > { %v6818_v60 = vpop.eup %6817  ;;  %6837 = vrcp.f32 %v1891_v19  ;;  %v2073_v39 = vmul.f32 %v6816_v52, %v8441_v45 }
 0x393   : > { %v6820_v2 = vpop.eup %6819  ;;  %v2074_v1 = vmul.f32 %v6818_v60, %v9709_v9  ;;  %6839 = vrcp.f32 %v1893_v15 }
 0x394   : > { %v6822_v26 = vpop.eup %6821  ;;  %v2076_v34 = vmul.f32 %v6820_v2, %v8465_v42 }
 0x395   : > { %v6824_v8 = vpop.eup %6823  ;;  %v2075_v16 = vmul.f32 %v6822_v26, %v9710_v30  ;;  %v2110_v11 = vpack.c.bf16 %v2074_v1, %v2070_v6  ;;  %v6874_v1 = vld [vmem:[%s7585_s1 + $0x8] sm:$0xff] }
 0x396   : > { %v6826_v50 = vpop.eup %6825  ;;  %v2077_v31 = vmul.f32 %v6824_v8, %v8469_v22  ;;  %v2112_v25 = vpack.c.bf16 %v2076_v34, %v2072_v40  ;;  %v6875_v34 = vld [vmem:[%s7585_s1 + $0x10] sm:$0xff] }
 0x397   : > { %v6828_v46 = vpop.eup %6827  ;;  %v2111_v9 = vpack.c.bf16 %v2075_v16, %v2071_v41  ;;  %v2078_v49 = vmul.f32 %v6826_v50, %v9715_v44  ;;  %v6876_v41 = vld [vmem:[%s7585_s1 + $0x18] sm:$0xff] }
 0x398   : > { %v6830_v18 = vpop.eup %6829  ;;  %v2113_v20 = vpack.c.bf16 %v2077_v31, %v2073_v39  ;;  %v2080_v12 = vmul.f32 %v6828_v46, %v8476_v29  ;;  %v9718_v29 = vld [vmem:[#allocation39_spill] sm:$0xff] }
 0x399   : > { %v6832_v28 = vpop.eup %6831  ;;  %2606 = vmatprep.mubr.bf16.mxu0 %v2111_v9  ;;  %v2079_v5 = vmul.f32 %v6830_v18, %v8328_v43  ;;  %v9721_v43 = vpack.c.bf16 %v8348_v48, %v8364_v33  ;;  %v9726_v48 = vpack.c.bf16 %v8422_v24, %v8419_v62  ;;  %v2182_v33 = vld [vmem:[%s9578_s6] sm:$0x3] }
 0x39a   : > { %v6834_v32 = vpop.eup %6833  ;;  %2607 = vmatmul.mubr.bf16.gmra.mrb[56].mxu0 %v2110_v11  ;;  %v2081_v52 = vmul.f32 %v6832_v28, %v8480_v17  ;;  %v9723_v17 = vpack.c.bf16 %v8360_v47, %v8374_v59  ;;  %v9731_v59 = vld [vmem:[#allocation37_spill] sm:$0xff] }
 0x39b   : > { %v6836_v42 = vpop.eup %6835  ;;  %v2082_v30 = vmul.f32 %v6834_v32, %v8338_v36  ;;  %v9717_v36 = vpack.c.bf16 %v8316_v3, %v8259_v21  ;;  %v9724_v21 = vpack.c.bf16 %v8371_v23, %v8368_v56  ;;  %v9725_v3 = vpack.c.bf16 %v8434_v51, %v8431_v63  ;;  %v9730_v56 = vld [vmem:[#allocation36_spill] sm:$0xff] }
 0x39c   : > { %v6838_v61 = vpop.eup %6837  ;;  %v2084_v45 = vmul.f32 %v6836_v42, %v8491_v57  ;;  %v9719_v57 = vld [vmem:[#allocation38_spill] sm:$0xff]  ;;  %v8584_v23 = vrot.slane %v2182_v33, %v9730_v56  ;;  %v8587_v63 = vrot.slane %v2182_v33, %v9731_v59 }
 0x39d   : > { %v6840_v22 = vpop.eup %6839  ;;  %v2083_v7 = vmul.f32 %v6838_v61, %v8351_v13  ;;  %v2114_v19 = vpack.c.bf16 %v2082_v30, %v2078_v49  ;;  %v9720_v6 = vpack.c.bf16 %v9718_v29, %v9719_v57  ;;  %v9722_v13 = vpack.c.bf16 %v8344_v27, %v8357_v58  ;;  %v9728_v58 = vld [vmem:[#allocation42_spill] sm:$0xff] }
 0x39e   : > { %v2085_v15 = vmul.f32 %v6840_v22, %v8506_v53  ;;  %v2116_v60 = vpack.c.bf16 %v2084_v45, %v2080_v12  ;;  %v9727_v27 = vpack.c.bf16 %v8487_v0, %v8484_v38  ;;  %v9729_v47 = vpack.c.bf16 %v8457_v54, %v9728_v58  ;;  %v6877_v49 = vld [vmem:[%s7585_s1 + $0x20] sm:$0xff]  ;;  %v6878_v12 = vld [vmem:[%s7585_s1 + $0x28] sm:$0xff] }
 0x39f   : > { %v2115_v2 = vpack.c.bf16 %v2083_v7, %v2079_v5  ;;  %v6879_v5 = vld [vmem:[%s7585_s1 + $0x30] sm:$0xff]  ;;  %v6882_v58 = vld [vmem:[%s7585_s1 + $0x48] sm:$0xff] }
 0x3a0   : > { %v2117_v44 = vpack.c.bf16 %v2085_v15, %v2081_v52 }
 0x3a1   : > { %2616 = vmatprep.mubr.bf16.mxu0 %v2115_v2 }
 0x3a2   : > { %2617 = vmatmul.mubr.bf16.gmra.mrb[60].mxu0 %v2114_v19  ;;  %v6880_v19 = vld [vmem:[%s7585_s1 + $0x38] sm:$0xff] }
 0x3a3   : > { %2659 = vmatprep.mubr.bf16.mxu0 %v9717_v36 }
 0x3aa   : > { %2660 = vmatmul.mubr.bf16.vlgmr.msra.gmra.mrb[32].mxu0 %v9720_v6 }
 0x3ab   : > { %2669 = vmatprep.mubr.bf16.mxu0 %v9721_v43 }
 0x3b2   : > { %2670 = vmatmul.mubr.bf16.gmra.mrb[36].mxu0 %v9722_v13 }
 0x3b3   : > { %2679 = vmatprep.mubr.bf16.mxu0 %v9723_v17 }
 0x3ba   : > { %2680 = vmatmul.mubr.bf16.gmra.mrb[40].mxu0 %v9724_v21 }
 0x3bb   : > { %2689 = vmatprep.mubr.bf16.mxu0 %v9725_v3  ;;  %v6881_v3 = vld [vmem:[%s7585_s1 + $0x40] sm:$0xff] }
 0x3c2   : > { %2690 = vmatmul.mubr.bf16.gmra.mrb[44].mxu0 %v9726_v48 }
 0x3c3   : > { %2699 = vmatprep.mubr.bf16.mxu0 %v9727_v27 }
 0x3ca   : > { %2700 = vmatmul.mubr.bf16.gmra.mrb[48].mxu0 %v9729_v47 }
 0x3cb   : > { %2709 = vmatprep.mubr.bf16.mxu0 %v2109_v55 }
 0x3d2   : > { %2710 = vmatmul.mubr.bf16.gmra.mrb[52].mxu0 %v2108_v35 }
 0x3d3   : > { %2719 = vmatprep.mubr.bf16.mxu0 %v2113_v20 }
 0x3da   : > { %2720 = vmatmul.mubr.bf16.gmra.mrb[56].mxu0 %v2112_v25 }
 0x3db   : > { %2729 = vmatprep.mubr.bf16.mxu0 %v2117_v44 }
 0x3e2   : > { %2730 = vmatmul.mubr.bf16.gmra.mrb[60].mxu0 %v2116_v60 }
 0x47d   : > { %v2661_v62 = vpop.f32.mrb[32].mxu0 }
 0x47e   : > { %v5962_v37 = vadd.f32 %v2661_v62, %v8584_v23  ;;  %v2663_v24 = vpop.f32.mrb[33].mxu0  ;;  %v6883_v62 = vld [vmem:[%s7585_s1 + $0x50] sm:$0xff] }
 0x47f   : > { %v5963_v51 = vadd.f32 %v2663_v24, %v8587_v63  ;;  %v2665_v54 = vpop.f32.mrb[34].mxu0  ;;  %v6884_v24 = vld [vmem:[%s7585_s1 + $0x58] sm:$0xff] }
 0x480   : > { %v2740_v38 = vmul.f32 0.5, %v5962_v37  ;;  %v5964_v0 = vadd.f32 %v2665_v54, %v8584_v23  ;;  %v2667_v53 = vpop.f32.mrb[35].mxu0 }
 0x481   : > { %v2741_v4 = vmul.f32 0.5, %v5963_v51  ;;  %v5965_v14 = vadd.f32 %v2667_v53, %v8587_v63 }
 0x482   : > { %v8594_v35 = vadd.f32 %v6873_v10, %v2740_v38  ;;  %v2742_v55 = vmul.f32 0.5, %v5964_v0 }
 0x483   : > { %v8597_v26 = vadd.f32 %v6874_v1, %v2741_v4  ;;  %v2743_v40 = vmul.f32 0.5, %v5965_v14 }
 0x484   : > { %2804 = vst [vmem:[%s8601_s13] sm:$0xff] %v8594_v35  ;;  %v8606_v8 = vadd.f32 %v6875_v34, %v2742_v55 }
 0x485   : > { %2805 = vst [vmem:[%s8601_s13 + $0x8] sm:$0xff] %v8597_v26  ;;  %v8611_v16 = vadd.f32 %v6876_v41, %v2743_v40  ;;  %v2671_v11 = vpop.f32.mrb[36].mxu0  ;;  %v2838_v50 = vadd.f32 %v8597_v26, %v8594_v35 }
 0x486   : > { %2806 = vst [vmem:[%s8601_s13 + $0x10] sm:$0xff] %v8606_v8  ;;  %v5966_v39 = vadd.f32 %v2671_v11, %v8584_v23  ;;  %v2673_v31 = vpop.f32.mrb[37].mxu0  ;;  %v6885_v11 = vld [vmem:[%s7585_s1 + $0x60] sm:$0xff] }
 0x487   : > { %2807 = vst [vmem:[%s8601_s13 + $0x18] sm:$0xff] %v8611_v16  ;;  %v5967_v25 = vadd.f32 %v2673_v31, %v8587_v63  ;;  %v2675_v46 = vpop.f32.mrb[38].mxu0  ;;  %2839 = vadd.xlane.f32.xlu0 %v2838_v50  ;;  %v2841_v9 = vadd.f32 %v8611_v16, %v8606_v8  ;;  %v6886_v31 = vld [vmem:[%s7585_s1 + $0x68] sm:$0xff] }
 0x488   : > { %v2744_v18 = vmul.f32 0.5, %v5966_v39  ;;  %v5968_v20 = vadd.f32 %v2675_v46, %v8584_v23  ;;  %v2677_v28 = vpop.f32.mrb[39].mxu0 }
 0x489   : > { %v2745_v32 = vmul.f32 0.5, %v5967_v25  ;;  %v5969_v42 = vadd.f32 %v2677_v28, %v8587_v63  ;;  %2842 = vadd.xlane.f32.xlu1 %v2841_v9  ;;  %v6887_v9 = vld [vmem:[%s7585_s1 + $0x70] sm:$0xff] }
 0x48a   : > { %v8626_v30 = vadd.f32 %v6877_v49, %v2744_v18  ;;  %v2746_v61 = vmul.f32 0.5, %v5968_v20  ;;  %v6888_v20 = vld [vmem:[%s7585_s1 + $0x78] sm:$0xff] }
 0x48b   : > { %v8629_v45 = vadd.f32 %v6878_v12, %v2745_v32  ;;  %v2747_v22 = vmul.f32 0.5, %v5969_v42 }
 0x48c   : > { %2808 = vst [vmem:[%s8601_s13 + $0x20] sm:$0xff] %v8626_v30  ;;  %v8634_v7 = vadd.f32 %v6879_v5, %v2746_v61 }
 0x48d   : > { %2809 = vst [vmem:[%s8601_s13 + $0x28] sm:$0xff] %v8629_v45  ;;  %v8639_v52 = vadd.f32 %v6880_v19, %v2747_v22  ;;  %v2681_v15 = vpop.f32.mrb[40].mxu0  ;;  %v2844_v60 = vadd.f32 %v8629_v45, %v8626_v30 }
 0x48e   : > { %2810 = vst [vmem:[%s8601_s13 + $0x30] sm:$0xff] %v8634_v7  ;;  %v5970_v2 = vadd.f32 %v2681_v15, %v8584_v23  ;;  %v2683_v44 = vpop.f32.mrb[41].mxu0 }
 0x48f   : > { %2811 = vst [vmem:[%s8601_s13 + $0x38] sm:$0xff] %v8639_v52  ;;  %v5971_v36 = vadd.f32 %v2683_v44, %v8587_v63  ;;  %v2685_v29 = vpop.f32.mrb[42].mxu0  ;;  %2845 = vadd.xlane.f32.xlu0 %v2844_v60  ;;  %v2847_v57 = vadd.f32 %v8639_v52, %v8634_v7 }
 0x490   : > { %v2748_v6 = vmul.f32 0.5, %v5970_v2  ;;  %v5972_v43 = vadd.f32 %v2685_v29, %v8584_v23  ;;  %v2687_v13 = vpop.f32.mrb[43].mxu0 }
 0x491   : > { %v2749_v17 = vmul.f32 0.5, %v5971_v36  ;;  %v5973_v21 = vadd.f32 %v2687_v13, %v8587_v63  ;;  %2848 = vadd.xlane.f32.xlu1 %v2847_v57  ;;  %v6889_v36 = vld [vmem:[%s7585_s1 + $0x80] sm:$0xff] }
 0x492   : > { %v8654_v48 = vadd.f32 %v6881_v3, %v2748_v6  ;;  %v2750_v27 = vmul.f32 0.5, %v5972_v43  ;;  %v6890_v6 = vld [vmem:[%s7585_s1 + $0x88] sm:$0xff]  ;;  %v6892_v3 = vld [vmem:[%s7585_s1 + $0x98] sm:$0xff] }
 0x493   : > { %v8657_v47 = vadd.f32 %v6882_v58, %v2749_v17  ;;  %v2751_v33 = vmul.f32 0.5, %v5973_v21  ;;  %v6891_v17 = vld [vmem:[%s7585_s1 + $0x90] sm:$0xff] }
 0x494   : > { %2812 = vst [vmem:[%s8601_s13 + $0x40] sm:$0xff] %v8654_v48  ;;  %v8662_v37 = vadd.f32 %v6883_v62, %v2750_v27 }
 0x495   : > { %2813 = vst [vmem:[%s8601_s13 + $0x48] sm:$0xff] %v8657_v47  ;;  %v8667_v51 = vadd.f32 %v6884_v24, %v2751_v33  ;;  %v2691_v54 = vpop.f32.mrb[44].mxu0  ;;  %v2850_v38 = vadd.f32 %v8657_v47, %v8654_v48 }
 0x496   : > { %2814 = vst [vmem:[%s8601_s13 + $0x50] sm:$0xff] %v8662_v37  ;;  %v5974_v0 = vadd.f32 %v2691_v54, %v8584_v23  ;;  %v2693_v53 = vpop.f32.mrb[45].mxu0 }
 0x497   : > { %2815 = vst [vmem:[%s8601_s13 + $0x58] sm:$0xff] %v8667_v51  ;;  %v5975_v4 = vadd.f32 %v2693_v53, %v8587_v63  ;;  %v2695_v14 = vpop.f32.mrb[46].mxu0  ;;  %2851 = vadd.xlane.f32.xlu0 %v2850_v38  ;;  %v2853_v10 = vadd.f32 %v8667_v51, %v8662_v37 }
 0x498   : > { %v2752_v55 = vmul.f32 0.5, %v5974_v0  ;;  %v5976_v1 = vadd.f32 %v2695_v14, %v8584_v23  ;;  %v2697_v40 = vpop.f32.mrb[47].mxu0 }
 0x499   : > { %v2753_v34 = vmul.f32 0.5, %v5975_v4  ;;  %v5977_v41 = vadd.f32 %v2697_v40, %v8587_v63  ;;  %2854 = vadd.xlane.f32.xlu1 %v2853_v10 }
 0x49a   : > { %v8682_v50 = vadd.f32 %v6885_v11, %v2752_v55  ;;  %v2754_v39 = vmul.f32 0.5, %v5976_v1  ;;  %v6893_v1 = vld [vmem:[%s7585_s1 + $0xa0] sm:$0xff] }
 0x49b   : > { %v8685_v25 = vadd.f32 %v6886_v31, %v2753_v34  ;;  %v2755_v46 = vmul.f32 0.5, %v5977_v41  ;;  %v6894_v41 = vld [vmem:[%s7585_s1 + $0xa8] sm:$0xff]  ;;  %v6895_v31 = vld [vmem:[%s7585_s1 + $0xb0] sm:$0xff] }
 0x49c   : > { %2816 = vst [vmem:[%s8601_s13 + $0x60] sm:$0xff] %v8682_v50  ;;  %v8690_v18 = vadd.f32 %v6887_v9, %v2754_v39  ;;  %v6896_v9 = vld [vmem:[%s7585_s1 + $0xb8] sm:$0xff] }
 0x49d   : > { %2817 = vst [vmem:[%s8601_s13 + $0x68] sm:$0xff] %v8685_v25  ;;  %v8695_v28 = vadd.f32 %v6888_v20, %v2755_v46  ;;  %v2701_v32 = vpop.f32.mrb[48].mxu0  ;;  %v2856_v42 = vadd.f32 %v8685_v25, %v8682_v50 }
 0x49e   : > { %2818 = vst [vmem:[%s8601_s13 + $0x70] sm:$0xff] %v8690_v18  ;;  %v5978_v49 = vadd.f32 %v2701_v32, %v8584_v23  ;;  %v2703_v61 = vpop.f32.mrb[49].mxu0 }
 0x49f   : > { %2819 = vst [vmem:[%s8601_s13 + $0x78] sm:$0xff] %v8695_v28  ;;  %v5979_v12 = vadd.f32 %v2703_v61, %v8587_v63  ;;  %v2705_v22 = vpop.f32.mrb[50].mxu0  ;;  %2857 = vadd.xlane.f32.xlu0 %v2856_v42  ;;  %v2859_v5 = vadd.f32 %v8695_v28, %v8690_v18 }
 0x4a0   : > { %v2756_v19 = vmul.f32 0.5, %v5978_v49  ;;  %v5980_v15 = vadd.f32 %v2705_v22, %v8584_v23  ;;  %v2707_v60 = vpop.f32.mrb[51].mxu0 }
 0x4a1   : > { %v2757_v2 = vmul.f32 0.5, %v5979_v12  ;;  %v5981_v44 = vadd.f32 %v2707_v60, %v8587_v63  ;;  %2860 = vadd.xlane.f32.xlu1 %v2859_v5 }
 0x4a2   : > { %v8710_v29 = vadd.f32 %v6889_v36, %v2756_v19  ;;  %v2758_v57 = vmul.f32 0.5, %v5980_v15  ;;  %v6897_v36 = vld [vmem:[%s7585_s1 + $0xc0] sm:$0xff] }
 0x4a3   : > { %v8713_v43 = vadd.f32 %v6890_v6, %v2757_v2  ;;  %v2759_v13 = vmul.f32 0.5, %v5981_v44 }
 0x4a4   : > { %2820 = vst [vmem:[%s8601_s13 + $0x80] sm:$0xff] %v8710_v29  ;;  %v8718_v21 = vadd.f32 %v6891_v17, %v2758_v57 }
 0x4a5   : > { %2821 = vst [vmem:[%s8601_s13 + $0x88] sm:$0xff] %v8713_v43  ;;  %v8723_v27 = vadd.f32 %v6892_v3, %v2759_v13  ;;  %v2711_v58 = vpop.f32.mrb[52].mxu0  ;;  %v2862_v33 = vadd.f32 %v8713_v43, %v8710_v29  ;;  %v6898_v13 = vld [vmem:[%s7585_s1 + $0xc8] sm:$0xff] }
 0x4a6   : > { %2822 = vst [vmem:[%s8601_s13 + $0x90] sm:$0xff] %v8718_v21  ;;  %v5982_v62 = vadd.f32 %v2711_v58, %v8584_v23  ;;  %v2713_v24 = vpop.f32.mrb[53].mxu0  ;;  %v6899_v58 = vld [vmem:[%s7585_s1 + $0xd0] sm:$0xff] }
 0x4a7   : > { %2823 = vst [vmem:[%s8601_s13 + $0x98] sm:$0xff] %v8723_v27  ;;  %v5983_v54 = vadd.f32 %v2713_v24, %v8587_v63  ;;  %v2715_v38 = vpop.f32.mrb[54].mxu0  ;;  %2863 = vadd.xlane.f32.xlu0 %v2862_v33  ;;  %v2865_v0 = vadd.f32 %v8723_v27, %v8718_v21 }
 0x4a8   : > { %v2760_v53 = vmul.f32 0.5, %v5982_v62  ;;  %v5984_v4 = vadd.f32 %v2715_v38, %v8584_v23  ;;  %v2717_v14 = vpop.f32.mrb[55].mxu0  ;;  %v6900_v62 = vld [vmem:[%s7585_s1 + $0xd8] sm:$0xff] }
 0x4a9   : > { %v2761_v10 = vmul.f32 0.5, %v5983_v54  ;;  %v5985_v55 = vadd.f32 %v2717_v14, %v8587_v63  ;;  %2866 = vadd.xlane.f32.xlu1 %v2865_v0 }
 0x4aa   : > { %v8738_v40 = vadd.f32 %v6893_v1, %v2760_v53  ;;  %v2762_v34 = vmul.f32 0.5, %v5984_v4 }
 0x4ab   : > { %v8741_v11 = vadd.f32 %v6894_v41, %v2761_v10  ;;  %v2763_v39 = vmul.f32 0.5, %v5985_v55 }
 0x4ac   : > { %2824 = vst [vmem:[%s8601_s13 + $0xa0] sm:$0xff] %v8738_v40  ;;  %v8746_v46 = vadd.f32 %v6895_v31, %v2762_v34  ;;  %v6901_v31 = vld [vmem:[%s7585_s1 + $0xe0] sm:$0xff] }
 0x4ad   : > { %2825 = vst [vmem:[%s8601_s13 + $0xa8] sm:$0xff] %v8741_v11  ;;  %v8751_v20 = vadd.f32 %v6896_v9, %v2763_v39  ;;  %v2721_v32 = vpop.f32.mrb[56].mxu0  ;;  %v2868_v42 = vadd.f32 %v8741_v11, %v8738_v40 }
 0x4ae   : > { %2826 = vst [vmem:[%s8601_s13 + $0xb0] sm:$0xff] %v8746_v46  ;;  %v5986_v49 = vadd.f32 %v2721_v32, %v8584_v23  ;;  %v2723_v61 = vpop.f32.mrb[57].mxu0 }
 0x4af   : > { %2827 = vst [vmem:[%s8601_s13 + $0xb8] sm:$0xff] %v8751_v20  ;;  %v5987_v12 = vadd.f32 %v2723_v61, %v8587_v63  ;;  %v2725_v22 = vpop.f32.mrb[58].mxu0  ;;  %2869 = vadd.xlane.f32.xlu0 %v2868_v42  ;;  %v2871_v5 = vadd.f32 %v8751_v20, %v8746_v46  ;;  %v6902_v42 = vld [vmem:[%s7585_s1 + $0xe8] sm:$0xff] }
 0x4b0   : > { %v2764_v19 = vmul.f32 0.5, %v5986_v49  ;;  %v5988_v15 = vadd.f32 %v2725_v22, %v8584_v23  ;;  %v2727_v60 = vpop.f32.mrb[59].mxu0 }
 0x4b1   : > { %v2765_v2 = vmul.f32 0.5, %v5987_v12  ;;  %v5989_v44 = vadd.f32 %v2727_v60, %v8587_v63  ;;  %2872 = vadd.xlane.f32.xlu1 %v2871_v5  ;;  %v6903_v12 = vld [vmem:[%s7585_s1 + $0xf0] sm:$0xff]  ;;  %v6411_v60 = vld [vmem:[#allocation11 + $0x4] ss:$24 sps:$4 sm:$0xff]  }
 0x4b2   : > { %v8766_v57 = vadd.f32 %v6897_v36, %v2764_v19  ;;  %v2766_v6 = vmul.f32 0.5, %v5988_v15  ;;  %v6409_v15 = vld [vmem:[#allocation11] ss:$24 sps:$4 sm:$0xff]   ;;  %v6417_v36 = vld [vmem:[#allocation11 + $0x34] ss:$24 sps:$4 sm:$0xff]   ;;  %3804 = vmatprep.subr.bf16.mxu1 %v6411_v60 }
 0x4b3   : > { %v8769_v17 = vadd.f32 %v6898_v13, %v2765_v2  ;;  %v2767_v3 = vmul.f32 0.5, %v5989_v44  ;;  %v6412_v2 = vld [vmem:[#allocation11 + $0x10] ss:$24 sps:$4 sm:$0xff]   ;;  %v6414_v44 = vld [vmem:[#allocation11 + $0x14] ss:$24 sps:$4 sm:$0xff]   ;;  %3805 = vmatpush1.bf16.msra.mxu1 %v6409_v15 }
 0x4b4   : > { %2828 = vst [vmem:[%s8601_s13 + $0xc0] sm:$0xff] %v8766_v57  ;;  %v8774_v33 = vadd.f32 %v6899_v58, %v2766_v6  ;;  %v6420_v6 = vld [vmem:[#allocation11 + $0x44] ss:$24 sps:$4 sm:$0xff]   ;;  %4030 = vmatprep.subr.bf16.mxu0 %v6414_v44  ;;  %v6415_v13 = vld [vmem:[#allocation11 + $0x30] ss:$24 sps:$4 sm:$0xff]   ;;  %3806 = vmatprep.subr.bf16.mxu1 %v6417_v36 }
 0x4b5   : > { %2829 = vst [vmem:[%s8601_s13 + $0xc8] sm:$0xff] %v8769_v17  ;;  %v8779_v24 = vadd.f32 %v6900_v62, %v2767_v3  ;;  %v2731_v54 = vpop.f32.mrb[60].mxu0  ;;  %v2874_v38 = vadd.f32 %v8769_v17, %v8766_v57  ;;  %4031 = vmatpush1.bf16.msra.mxu0 %v6412_v2  ;;  %v6418_v3 = vld [vmem:[#allocation11 + $0x40] ss:$24 sps:$4 sm:$0xff]   ;;  %v6423_v58 = vld [vmem:[#allocation11 + $0x64] ss:$24 sps:$4 sm:$0xff]  }
 0x4b6   : > { %2830 = vst [vmem:[%s8601_s13 + $0xd0] sm:$0xff] %v8774_v33  ;;  %v5990_v0 = vadd.f32 %v2731_v54, %v8584_v23  ;;  %v2733_v53 = vpop.f32.mrb[61].mxu0  ;;  %4032 = vmatprep.subr.bf16.mxu0 %v6420_v6  ;;  %v6426_v62 = vld [vmem:[#allocation11 + $0x74] ss:$24 sps:$4 sm:$0xff]   ;;  %v6421_v54 = vld [vmem:[#allocation11 + $0x60] ss:$24 sps:$4 sm:$0xff]  }
 0x4b7   : > { %2831 = vst [vmem:[%s8601_s13 + $0xd8] sm:$0xff] %v8779_v24  ;;  %v5991_v4 = vadd.f32 %v2733_v53, %v8587_v63  ;;  %v2735_v14 = vpop.f32.mrb[62].mxu0  ;;  %2875 = vadd.xlane.f32.xlu0 %v2874_v38  ;;  %v2877_v10 = vadd.f32 %v8779_v24, %v8774_v33  ;;  %3807 = vmatpush1.bf16.msra.mxu1 %v6415_v13  ;;  %v6424_v38 = vld [vmem:[#allocation11 + $0x70] ss:$24 sps:$4 sm:$0xff]   ;;  %v6432_v53 = vld [vmem:[#allocation11 + $0xa4] ss:$24 sps:$4 sm:$0xff]  }
 0x4b8   : > { %v2768_v55 = vmul.f32 0.5, %v5990_v0  ;;  %v5992_v1 = vadd.f32 %v2735_v14, %v8584_v23  ;;  %v2737_v34 = vpop.f32.mrb[63].mxu0  ;;  %v6904_v23 = vld [vmem:[%s7585_s1 + $0xf8] sm:$0xff]  ;;  %3808 = vmatprep.subr.bf16.mxu1 %v6423_v58  ;;  %v6451_v15 = vld [vmem:[#allocation11 + $0x150] ss:$24 sps:$4 sm:$0xff]   ;;  %s9280_s1 = scalar_lea.vmem [#allocation17], %s9270_s9 }
 0x4b9   : > { %v2769_v41 = vmul.f32 0.5, %v5991_v4  ;;  %v5993_v39 = vadd.f32 %v2737_v34, %v8587_v63  ;;  %2878 = vadd.xlane.f32.xlu1 %v2877_v10  ;;  %4033 = vmatpush1.bf16.msra.mxu0 %v6418_v3  ;;  %v6429_v0 = vld [vmem:[#allocation11 + $0x94] ss:$24 sps:$4 sm:$0xff]   ;;  %v6427_v4 = vld [vmem:[#allocation11 + $0x90] ss:$24 sps:$4 sm:$0xff]  }
 0x4ba   : > { %v8794_v9 = vadd.f32 %v6901_v31, %v2768_v55  ;;  %v2770_v32 = vmul.f32 0.5, %v5992_v1  ;;  %4034 = vmatprep.subr.bf16.mxu0 %v6426_v62  ;;  %v6430_v14 = vld [vmem:[#allocation11 + $0xa0] ss:$24 sps:$4 sm:$0xff]   ;;  %v6435_v10 = vld [vmem:[#allocation11 + $0xc4] ss:$24 sps:$4 sm:$0xff]  }
 0x4bb   : > { %v8797_v49 = vadd.f32 %v6902_v42, %v2769_v41  ;;  %v2771_v61 = vmul.f32 0.5, %v5993_v39  ;;  %3809 = vmatpush1.bf16.msra.mxu1 %v6421_v54  ;;  %v6438_v55 = vld [vmem:[#allocation11 + $0xd4] ss:$24 sps:$4 sm:$0xff]   ;;  %v6433_v1 = vld [vmem:[#allocation11 + $0xc0] ss:$24 sps:$4 sm:$0xff]  }
 0x4bc   : > { %2832 = vst [vmem:[%s8601_s13 + $0xe0] sm:$0xff] %v8794_v9  ;;  %v8802_v22 = vadd.f32 %v6903_v12, %v2770_v32  ;;  %3810 = vmatprep.subr.bf16.mxu1 %v6429_v0  ;;  %v6436_v34 = vld [vmem:[#allocation11 + $0xd0] ss:$24 sps:$4 sm:$0xff]   ;;  %v6441_v41 = vld [vmem:[#allocation11 + $0xf4] ss:$24 sps:$4 sm:$0xff]  }
 0x4bd   : > { %2833 = vst [vmem:[%s8601_s13 + $0xe8] sm:$0xff] %v8797_v49  ;;  %v8807_v5 = vadd.f32 %v6904_v23, %v2771_v61  ;;  %v2880_v63 = vadd.f32 %v8797_v49, %v8794_v9  ;;  %4035 = vmatpush1.bf16.msra.mxu0 %v6424_v38  ;;  %v6444_v39 = vld [vmem:[#allocation11 + $0x104] ss:$24 sps:$4 sm:$0xff]   ;;  %v6439_v31 = vld [vmem:[#allocation11 + $0xf0] ss:$24 sps:$4 sm:$0xff]  }
 0x4be   : > { %2834 = vst [vmem:[%s8601_s13 + $0xf0] sm:$0xff] %v8802_v22  ;;  %4036 = vmatprep.subr.bf16.mxu0 %v6432_v53  ;;  %v6442_v32 = vld [vmem:[#allocation11 + $0x100] ss:$24 sps:$4 sm:$0xff]   ;;  %v6447_v42 = vld [vmem:[#allocation11 + $0x124] ss:$24 sps:$4 sm:$0xff]  }
 0x4bf   : > { %2835 = vst [vmem:[%s8601_s13 + $0xf8] sm:$0xff] %v8807_v5  ;;  %2881 = vadd.xlane.f32.xlu0 %v2880_v63  ;;  %v2883_v19 = vadd.f32 %v8807_v5, %v8802_v22  ;;  %3811 = vmatpush1.bf16.msra.mxu1 %v6427_v4  ;;  %v6450_v61 = vld [vmem:[#allocation11 + $0x134] ss:$24 sps:$4 sm:$0xff]   ;;  %v6445_v12 = vld [vmem:[#allocation11 + $0x120] ss:$24 sps:$4 sm:$0xff]  }
 0x4c0   : > { %3812 = vmatprep.subr.bf16.mxu1 %v6435_v10  ;;  %v8817_v23 = vld [vmem:[#allocation11 + $0x130] ss:$24 sps:$4 sm:$0xff]   ;;  %v6453_v63 = vld [vmem:[#allocation11 + $0x154] ss:$24 sps:$4 sm:$0xff]   ;;  %v8822_v60 = vld [vmem:[#allocation11 + $0x160] ss:$24 sps:$4 sm:$0xff]  }
 0x4c1   : > { %2884 = vadd.xlane.f32.xlu1 %v2883_v19  ;;  %4037 = vmatpush1.bf16.msra.mxu0 %v6430_v14  ;;  %v8819_v19 = vld [vmem:[#allocation11 + $0x164] ss:$24 sps:$4 sm:$0xff]   ;;  %v8825_v44 = vld [vmem:[#allocation11 + $0x194] ss:$24 sps:$4 sm:$0xff]   ;;  %v6457_v36 = vld [vmem:[#allocation11 + $0x180] ss:$24 sps:$4 sm:$0xff]  }
 0x4c2   : > { %4038 = vmatprep.subr.bf16.mxu0 %v6438_v55  ;;  %v6459_v2 = vld [vmem:[#allocation11 + $0x184] ss:$24 sps:$4 sm:$0xff]   ;;  %v8828_v6 = vld [vmem:[#allocation11 + $0x190] ss:$24 sps:$4 sm:$0xff]   ;;  %v6465_v13 = vld [vmem:[#allocation11 + $0x1b4] ss:$24 sps:$4 sm:$0xff]  }
 0x4c3   : > { %3813 = vmatpush1.bf16.msra.mxu1 %v6433_v1  ;;  %v8831_v3 = vld [vmem:[#allocation11 + $0x1c4] ss:$24 sps:$4 sm:$0xff]   ;;  %v6463_v58 = vld [vmem:[#allocation11 + $0x1b0] ss:$24 sps:$4 sm:$0xff]   ;;  %v8834_v62 = vld [vmem:[#allocation11 + $0x1c0] ss:$24 sps:$4 sm:$0xff]  }
 0x4c4   : > { %3814 = vmatprep.subr.bf16.mxu1 %v6441_v41 }
 0x4c5   : > { %4039 = vmatpush1.bf16.msra.mxu0 %v6436_v34 }
 0x4c6   : > { %4040 = vmatprep.subr.bf16.mxu0 %v6444_v39 }
 0x4c7   : > { %3815 = vmatpush1.bf16.msra.mxu1 %v6439_v31 }
 0x4c8   : > { %3816 = vmatprep.subr.bf16.mxu1 %v6447_v42 }
 0x4c9   : > { %4041 = vmatpush1.bf16.msra.mxu0 %v6442_v32 }
 0x4ca   : > { %4042 = vmatprep.subr.bf16.mxu0 %v6450_v61 }
 0x4cb   : > { %3817 = vmatpush1.bf16.msra.mxu1 %v6445_v12 }
 0x4cc   : > { %3818 = vmatprep.subr.bf16.mxu1 %v6453_v63 }
 0x4cd   : > { %4043 = vmatpush1.bf16.msra.mxu0 %v8817_v23 }
 0x4ce   : > { %4044 = vmatprep.subr.bf16.mxu0 %v8819_v19 }
 0x4cf   : > { %3819 = vmatpush1.bf16.msra.mxu1 %v6451_v15 }
 0x4d0   : > { %3820 = vmatprep.subr.bf16.mxu1 %v6459_v2 }
 0x4d1   : > { %4045 = vmatpush1.bf16.msra.mxu0 %v8822_v60 }
 0x4d2   : > { %4046 = vmatprep.subr.bf16.mxu0 %v8825_v44 }
 0x4d3   : > { %3821 = vmatpush1.bf16.msra.mxu1 %v6457_v36 }
 0x4d4   : > { %3822 = vmatprep.subr.bf16.mxu1 %v6465_v13 }
 0x4d5   : > { %4047 = vmatpush1.bf16.msra.mxu0 %v8828_v6 }
 0x4d6   : > { %4048 = vmatprep.subr.bf16.mxu0 %v8831_v3 }
 0x4d7   : > { %3823 = vmatpush1.bf16.msra.mxu1 %v6463_v58 }
 0x4d9   : > { %4049 = vmatpush1.bf16.msra.mxu0 %v8834_v62 }
 0x514   : > { %v2840_v54 = vpop.xlane.xlu0 %2839 }
 0x515   : > { %v2886_v38 = vmul.f32 0.00390625, %v2840_v54 }
 0x516   : > { %v2843_v0 = vpop.xlane.xlu1 %2842 }
 0x517   : > { %v8839_v53 = vsub.f32 %v8594_v35, %v2886_v38  ;;  %v8842_v4 = vsub.f32 %v8597_v26, %v2886_v38  ;;  %v2887_v14 = vmul.f32 0.00390625, %v2843_v0 }
 0x519   : > { %v8845_v10 = vsub.f32 %v8606_v8, %v2887_v14  ;;  %v8848_v55 = vsub.f32 %v8611_v16, %v2887_v14  ;;  %v2934_v1 = vmul.f32 %v8839_v53, %v8839_v53  ;;  %v2935_v34 = vmul.f32 %v8842_v4, %v8842_v4 }
 0x51b   : > { %v2966_v41 = vadd.f32 %v2935_v34, %v2934_v1  ;;  %v2936_v35 = vmul.f32 %v8845_v10, %v8845_v10  ;;  %v2937_v26 = vmul.f32 %v8848_v55, %v8848_v55 }
 0x51c   : > { %v2846_v39 = vpop.xlane.xlu0 %2845 }
 0x51d   : > { %v2888_v31 = vmul.f32 0.00390625, %v2846_v39  ;;  %2967 = vadd.xlane.f32.xlu0 %v2966_v41  ;;  %v2969_v8 = vadd.f32 %v2937_v26, %v2936_v35  ;;  %v6471_v39 = vld [vmem:[#allocation11 + $0x1e4] ss:$24 sps:$4 sm:$0xff]  }
 0x51e   : > { %v2849_v32 = vpop.xlane.xlu1 %2848  ;;  %3824 = vmatprep.subr.bf16.mxu1 %v6471_v39  ;;  %v8932_v39 = vld [vmem:[#allocation11 + $0x250] ss:$24 sps:$4 sm:$0xff]  }
 0x51f   : > { %v8859_v16 = vsub.f32 %v8626_v30, %v2888_v31  ;;  %v8862_v42 = vsub.f32 %v8629_v45, %v2888_v31  ;;  %v2889_v61 = vmul.f32 0.00390625, %v2849_v32  ;;  %2970 = vadd.xlane.f32.xlu1 %v2969_v8  ;;  %v6469_v8 = vld [vmem:[#allocation11 + $0x1e0] ss:$24 sps:$4 sm:$0xff]   ;;  %v8900_v32 = vld [vmem:[#allocation11 + $0x1f0] ss:$24 sps:$4 sm:$0xff]  }
 0x520   : > { %3825 = vmatpush1.bf16.msra.mxu1 %v6469_v8 }
 0x521   : > { %v8865_v12 = vsub.f32 %v8634_v7, %v2889_v61  ;;  %v8868_v63 = vsub.f32 %v8639_v52, %v2889_v61  ;;  %v2938_v15 = vmul.f32 %v8859_v16, %v8859_v16  ;;  %v2939_v2 = vmul.f32 %v8862_v42, %v8862_v42 }
 0x523   : > { %v2972_v36 = vadd.f32 %v2939_v2, %v2938_v15  ;;  %v2940_v30 = vmul.f32 %v8865_v12, %v8865_v12  ;;  %v2941_v45 = vmul.f32 %v8868_v63, %v8868_v63 }
 0x524   : > { %v2852_v13 = vpop.xlane.xlu0 %2851 }
 0x525   : > { %v2890_v58 = vmul.f32 0.00390625, %v2852_v13  ;;  %2973 = vadd.xlane.f32.xlu0 %v2972_v36  ;;  %v2975_v7 = vadd.f32 %v2941_v45, %v2940_v30  ;;  %v6477_v30 = vld [vmem:[#allocation11 + $0x214] ss:$24 sps:$4 sm:$0xff]   ;;  %v8910_v45 = vld [vmem:[#allocation11 + $0x224] ss:$24 sps:$4 sm:$0xff]  }
 0x526   : > { %v2855_v54 = vpop.xlane.xlu1 %2854  ;;  %3826 = vmatprep.subr.bf16.mxu1 %v6477_v30  ;;  %v8942_v30 = vld [vmem:[#allocation11 + $0x284] ss:$24 sps:$4 sm:$0xff]  }
 0x527   : > { %v8879_v52 = vsub.f32 %v8654_v48, %v2890_v58  ;;  %v8882_v38 = vsub.f32 %v8657_v47, %v2890_v58  ;;  %v2891_v0 = vmul.f32 0.00390625, %v2855_v54  ;;  %2976 = vadd.xlane.f32.xlu1 %v2975_v7  ;;  %v6475_v7 = vld [vmem:[#allocation11 + $0x210] ss:$24 sps:$4 sm:$0xff]   ;;  %v8922_v54 = vld [vmem:[#allocation11 + $0x220] ss:$24 sps:$4 sm:$0xff]   ;;  %9732 = vst [vmem:[#allocation43_spill] sm:$0xff] %v8942_v30 }
 0x528   : > { %3827 = vmatpush1.bf16.msra.mxu1 %v6475_v7  ;;  %v6487_v7 = vld [vmem:[#allocation11 + $0x270] ss:$24 sps:$4 sm:$0xff]  }
 0x529   : > { %v8885_v14 = vsub.f32 %v8662_v37, %v2891_v0  ;;  %v8888_v1 = vsub.f32 %v8667_v51, %v2891_v0  ;;  %v2942_v34 = vmul.f32 %v8879_v52, %v8879_v52  ;;  %v2943_v41 = vmul.f32 %v8882_v38, %v8882_v38  ;;  %v8898_v37 = vld [vmem:[#allocation11 + $0x1f4] ss:$24 sps:$4 sm:$0xff]  }
 0x52a   : > { %4050 = vmatprep.subr.bf16.mxu0 %v8898_v37 }
 0x52b   : > { %v2978_v35 = vadd.f32 %v2943_v41, %v2942_v34  ;;  %v2944_v48 = vmul.f32 %v8885_v14, %v8885_v14  ;;  %v2945_v47 = vmul.f32 %v8888_v1, %v8888_v1  ;;  %4051 = vmatpush1.bf16.msra.mxu0 %v8900_v32  ;;  %v6483_v41 = vld [vmem:[#allocation11 + $0x244] ss:$24 sps:$4 sm:$0xff]  }
 0x52c   : > { %v2858_v26 = vpop.xlane.xlu0 %2857  ;;  %4052 = vmatprep.subr.bf16.mxu0 %v8910_v45  ;;  %3828 = vmatprep.subr.bf16.mxu1 %v6483_v41  ;;  %v8962_v41 = vld [vmem:[#allocation11 + $0x2b4] ss:$24 sps:$4 sm:$0xff]  }
 0x52d   : > { %v2892_v31 = vmul.f32 0.00390625, %v2858_v26  ;;  %2979 = vadd.xlane.f32.xlu0 %v2978_v35  ;;  %v2981_v51 = vadd.f32 %v2945_v47, %v2944_v48  ;;  %v8930_v35 = vld [vmem:[#allocation11 + $0x254] ss:$24 sps:$4 sm:$0xff]   ;;  %v6481_v26 = vld [vmem:[#allocation11 + $0x240] ss:$24 sps:$4 sm:$0xff]   ;;  %9734 = vst [vmem:[#allocation40_spill] sm:$0xff] %v8962_v41 }
 0x52e   : > { %v2861_v61 = vpop.xlane.xlu1 %2860  ;;  %3829 = vmatpush1.bf16.msra.mxu1 %v6481_v26  ;;  %v6493_v26 = vld [vmem:[#allocation11 + $0x2a0] ss:$24 sps:$4 sm:$0xff]  }
 0x52f   : > { %v8904_v15 = vsub.f32 %v8682_v50, %v2892_v31  ;;  %v8907_v2 = vsub.f32 %v8685_v25, %v2892_v31  ;;  %v2893_v36 = vmul.f32 0.00390625, %v2861_v61  ;;  %2982 = vadd.xlane.f32.xlu1 %v2981_v51  ;;  %4053 = vmatpush1.bf16.msra.mxu0 %v8922_v54 }
 0x530   : > { %4054 = vmatprep.subr.bf16.mxu0 %v8930_v35 }
 0x531   : > { %v8913_v13 = vsub.f32 %v8690_v18, %v2893_v36  ;;  %v8916_v58 = vsub.f32 %v8695_v28, %v2893_v36  ;;  %v2946_v50 = vmul.f32 %v8904_v15, %v8904_v15  ;;  %v2947_v25 = vmul.f32 %v8907_v2, %v8907_v2  ;;  %v6489_v36 = vld [vmem:[#allocation11 + $0x274] ss:$24 sps:$4 sm:$0xff]  }
 0x532   : > { %3830 = vmatprep.subr.bf16.mxu1 %v6489_v36 }
 0x533   : > { %v2984_v0 = vadd.f32 %v2947_v25, %v2946_v50  ;;  %v2948_v18 = vmul.f32 %v8913_v13, %v8913_v13  ;;  %v2949_v28 = vmul.f32 %v8916_v58, %v8916_v58  ;;  %4055 = vmatpush1.bf16.msra.mxu0 %v8932_v39  ;;  %3831 = vmatpush1.bf16.msra.mxu1 %v6487_v7  ;;  %v6501_v7 = vld [vmem:[#allocation11 + $0x2d4] ss:$24 sps:$4 sm:$0xff]  }
 0x534   : > { %v2864_v34 = vpop.xlane.xlu0 %2863  ;;  %4056 = vmatprep.subr.bf16.mxu0 %v8942_v30 }
 0x535   : > { %v2894_v48 = vmul.f32 0.00390625, %v2864_v34  ;;  %2985 = vadd.xlane.f32.xlu0 %v2984_v0  ;;  %v2987_v47 = vadd.f32 %v2949_v28, %v2948_v18  ;;  %v8954_v0 = vld [vmem:[#allocation11 + $0x280] ss:$24 sps:$4 sm:$0xff]   ;;  %v6495_v34 = vld [vmem:[#allocation11 + $0x2a4] ss:$24 sps:$4 sm:$0xff]  }
 0x536   : > { %v2867_v31 = vpop.xlane.xlu1 %2866  ;;  %9733 = vst [vmem:[#allocation44_spill] sm:$0xff] %v8954_v0  ;;  %3832 = vmatprep.subr.bf16.mxu1 %v6495_v34  ;;  %v8986_v34 = vld [vmem:[#allocation11 + $0x2e0] ss:$24 sps:$4 sm:$0xff]  }
 0x537   : > { %v8936_v51 = vsub.f32 %v8710_v29, %v2894_v48  ;;  %v8939_v8 = vsub.f32 %v8713_v43, %v2894_v48  ;;  %v2895_v61 = vmul.f32 0.00390625, %v2867_v31  ;;  %2988 = vadd.xlane.f32.xlu1 %v2987_v47  ;;  %4057 = vmatpush1.bf16.msra.mxu0 %v8954_v0  ;;  %v8964_v31 = vld [vmem:[#allocation11 + $0x2b0] ss:$24 sps:$4 sm:$0xff]   ;;  %9737 = vst [vmem:[#allocation47_spill] sm:$0xff] %v8986_v34 }
 0x538   : > { %9735 = vst [vmem:[#allocation46_spill] sm:$0xff] %v8964_v31  ;;  %4058 = vmatprep.subr.bf16.mxu0 %v8962_v41  ;;  %3833 = vmatpush1.bf16.msra.mxu1 %v6493_v26  ;;  %v6507_v26 = vld [vmem:[#allocation11 + $0xc] ss:$24 sps:$4 sm:$0xff]  }
 0x539   : > { %v8945_v50 = vsub.f32 %v8718_v21, %v2895_v61  ;;  %v8948_v25 = vsub.f32 %v8723_v27, %v2895_v61  ;;  %v2950_v29 = vmul.f32 %v8936_v51, %v8936_v51  ;;  %v2951_v43 = vmul.f32 %v8939_v8, %v8939_v8  ;;  %3834 = vmatprep.subr.bf16.mxu1 %v6501_v7 }
 0x53b   : > { %v2990_v18 = vadd.f32 %v2951_v43, %v2950_v29  ;;  %v2952_v21 = vmul.f32 %v8945_v50, %v8945_v50  ;;  %v2953_v27 = vmul.f32 %v8948_v25, %v8948_v25  ;;  %4059 = vmatpush1.bf16.msra.mxu0 %v8964_v31 }
 0x53c   : > { %v2870_v28 = vpop.xlane.xlu0 %2869 }
 0x53d   : > { %v2896_v48 = vmul.f32 0.00390625, %v2870_v28  ;;  %2991 = vadd.xlane.f32.xlu0 %v2990_v18  ;;  %v2993_v47 = vadd.f32 %v2953_v27, %v2952_v21  ;;  %v8974_v18 = vld [vmem:[#allocation11 + $0x2e4] ss:$24 sps:$4 sm:$0xff]   ;;  %v6499_v28 = vld [vmem:[#allocation11 + $0x2d0] ss:$24 sps:$4 sm:$0xff]  }
 0x53e   : > { %v2873_v61 = vpop.xlane.xlu1 %2872  ;;  %9736 = vst [vmem:[#allocation41_spill] sm:$0xff] %v8974_v18  ;;  %4060 = vmatprep.subr.bf16.mxu0 %v8974_v18  ;;  %3835 = vmatpush1.bf16.msra.mxu1 %v6499_v28 }
 0x53f   : > { %v8968_v36 = vsub.f32 %v8738_v40, %v2896_v48  ;;  %v8971_v29 = vsub.f32 %v8741_v11, %v2896_v48  ;;  %v2897_v43 = vmul.f32 0.00390625, %v2873_v61  ;;  %2994 = vadd.xlane.f32.xlu1 %v2993_v47  ;;  %4061 = vmatpush1.bf16.msra.mxu0 %v8986_v34 }
 0x540   : > { %3917 = vmatprep.subr.bf16.mxu1 %v6507_v26 }
 0x541   : > { %v8977_v21 = vsub.f32 %v8746_v46, %v2897_v43  ;;  %v8980_v27 = vsub.f32 %v8751_v20, %v2897_v43  ;;  %v2954_v40 = vmul.f32 %v8968_v36, %v8968_v36  ;;  %v2955_v11 = vmul.f32 %v8971_v29, %v8971_v29 }
 0x543   : > { %v2996_v48 = vadd.f32 %v2955_v11, %v2954_v40  ;;  %v2956_v46 = vmul.f32 %v8977_v21, %v8977_v21  ;;  %v2957_v20 = vmul.f32 %v8980_v27, %v8980_v27 }
 0x544   : > { %v2876_v47 = vpop.xlane.xlu0 %2875 }
 0x545   : > { %v2898_v61 = vmul.f32 0.00390625, %v2876_v47  ;;  %2997 = vadd.xlane.f32.xlu0 %v2996_v48  ;;  %v2999_v43 = vadd.f32 %v2957_v20, %v2956_v46 }
 0x546   : > { %v2879_v31 = vpop.xlane.xlu1 %2878 }
 0x547   : > { %v8995_v7 = vsub.f32 %v8766_v57, %v2898_v61  ;;  %v8998_v40 = vsub.f32 %v8769_v17, %v2898_v61  ;;  %v2899_v11 = vmul.f32 0.00390625, %v2879_v31  ;;  %3000 = vadd.xlane.f32.xlu1 %v2999_v43 }
 0x549   : > { %v9001_v18 = vsub.f32 %v8774_v33, %v2899_v11  ;;  %v9004_v28 = vsub.f32 %v8779_v24, %v2899_v11  ;;  %v2958_v48 = vmul.f32 %v8995_v7, %v8995_v7  ;;  %v2959_v46 = vmul.f32 %v8998_v40, %v8998_v40 }
 0x54b   : > { %v3002_v20 = vadd.f32 %v2959_v46, %v2958_v48  ;;  %v2960_v57 = vmul.f32 %v9001_v18, %v9001_v18  ;;  %v2961_v17 = vmul.f32 %v9004_v28, %v9004_v28 }
 0x54c   : > { %v2882_v31 = vpop.xlane.xlu0 %2881 }
 0x54d   : > { %v2900_v47 = vmul.f32 0.00390625, %v2882_v31  ;;  %3003 = vadd.xlane.f32.xlu0 %v3002_v20  ;;  %v3005_v33 = vadd.f32 %v2961_v17, %v2960_v57 }
 0x54e   : > { %v2885_v26 = vpop.xlane.xlu1 %2884 }
 0x54f   : > { %v9015_v24 = vsub.f32 %v8794_v9, %v2900_v47  ;;  %v9018_v61 = vsub.f32 %v8797_v49, %v2900_v47  ;;  %v2901_v43 = vmul.f32 0.00390625, %v2885_v26  ;;  %3006 = vadd.xlane.f32.xlu1 %v3005_v33 }
 0x551   : > { %v9021_v11 = vsub.f32 %v8802_v22, %v2901_v43  ;;  %v9024_v48 = vsub.f32 %v8807_v5, %v2901_v43  ;;  %v2962_v46 = vmul.f32 %v9015_v24, %v9015_v24  ;;  %v2963_v20 = vmul.f32 %v9018_v61, %v9018_v61 }
 0x553   : > { %v3008_v57 = vadd.f32 %v2963_v20, %v2962_v46  ;;  %v2964_v9 = vmul.f32 %v9021_v11, %v9021_v11  ;;  %v2965_v49 = vmul.f32 %v9024_v48, %v9024_v48  ;;  %v2836_v20 = vld [vmem:[%s9579_s7] sm:$0x3] }
 0x555   : > { %3009 = vadd.xlane.f32.xlu0 %v3008_v57  ;;  %v3011_v17 = vadd.f32 %v2965_v49, %v2964_v9  ;;  %v9038_v9 = vrot.slane %v2836_v20, %v9730_v56  ;;  %v2837_v49 = vld [vmem:[%s9738_s24] sm:$0x3] }
 0x557   : > { %3012 = vadd.xlane.f32.xlu1 %v3011_v17  ;;  %v9044_v17 = vrot.slane %v2836_v20, %v9731_v59 }
 0x5aa   : > { %v2968_v22 = vpop.xlane.xlu0 %2967 }
 0x5ab   : > { %v3014_v31 = vmul.f32 0.00390625, %v2968_v22 }
 0x5ac   : > { %v2971_v5 = vpop.xlane.xlu1 %2970 }
 0x5ad   : > { %v3030_v47 = vadd.f32 1e-05, %v3014_v31  ;;  %v3015_v33 = vmul.f32 0.00390625, %v2971_v5 }
 0x5af   : > { %6841 = vrsqrt.f32 %v3030_v47  ;;  %v3031_v26 = vadd.f32 1e-05, %v3015_v33  ;;  %v9052_v33 = vrot.slane %v2837_v49, %v9731_v59 }
 0x5b1   : > { %6843 = vrsqrt.f32 %v3031_v26 }
 0x5b2   : > { %v2974_v43 = vpop.xlane.xlu0 %2973 }
 0x5b3   : > { %v3016_v34 = vmul.f32 0.00390625, %v2974_v43 }
 0x5b4   : > { %v2977_v46 = vpop.xlane.xlu1 %2976 }
 0x5b5   : > { %v3032_v41 = vadd.f32 1e-05, %v3016_v34  ;;  %v3017_v0 = vmul.f32 0.00390625, %v2977_v46 }
 0x5b7   : > { %6845 = vrsqrt.f32 %v3032_v41  ;;  %v3033_v57 = vadd.f32 1e-05, %v3017_v0  ;;  %v9049_v0 = vrot.slane %v2837_v49, %v9730_v56 }
 0x5b9   : > { %v6842_v22 = vpop.eup %6841  ;;  %6847 = vrsqrt.f32 %v3033_v57 }
 0x5ba   : > { %v3062_v31 = vmul.f32 %v6842_v22, %v8839_v53  ;;  %v2980_v5 = vpop.xlane.xlu0 %2979  ;;  %v3063_v34 = vmul.f32 %v6842_v22, %v8842_v4 }
 0x5bb   : > { %v6844_v47 = vpop.eup %6843  ;;  %v3018_v41 = vmul.f32 0.00390625, %v2980_v5 }
 0x5bc   : > { %v3105_v26 = vmul.f32 %v9038_v9, %v3062_v31  ;;  %v3064_v43 = vmul.f32 %v6844_v47, %v8845_v10  ;;  %v2983_v46 = vpop.xlane.xlu1 %2982  ;;  %v3065_v20 = vmul.f32 %v6844_v47, %v8848_v55  ;;  %v3106_v53 = vmul.f32 %v9044_v17, %v3063_v34  ;;  %v6505_v34 = vld [vmem:[#allocation11 + $0x8] ss:$24 sps:$4 sm:$0xff]  }
 0x5bd   : > { %v3034_v57 = vadd.f32 1e-05, %v3018_v41  ;;  %v3019_v30 = vmul.f32 0.00390625, %v2983_v46 }
 0x5be   : > { %v3107_v4 = vmul.f32 %v9038_v9, %v3064_v43  ;;  %v3108_v22 = vmul.f32 %v9044_v17, %v3065_v20  ;;  %v3149_v49 = vadd.f32 %v9052_v33, %v3106_v53  ;;  %v3148_v31 = vadd.f32 %v9049_v0, %v3105_v26  ;;  %v6510_v53 = vld [vmem:[#allocation11 + $0x3c] ss:$24 sps:$4 sm:$0xff]  }
 0x5bf   : > { %6849 = vrsqrt.f32 %v3034_v57  ;;  %v3035_v5 = vadd.f32 1e-05, %v3019_v30 }
 0x5c0   : > { %v3151_v59 = vadd.f32 %v9052_v33, %v3108_v22  ;;  %v3150_v10 = vadd.f32 %v9049_v0, %v3107_v4 }
 0x5c1   : > { %v6846_v56 = vpop.eup %6845  ;;  %6851 = vrsqrt.f32 %v3035_v5 }
 0x5c2   : > { %v2986_v55 = vpop.xlane.xlu0 %2985  ;;  %v9064_v47 = vpack.c.bf16 %v3151_v59, %v3149_v49  ;;  %v9066_v41 = vpack.c.bf16 %v3150_v10, %v3148_v31  ;;  %v3067_v43 = vmul.f32 %v6846_v56, %v8862_v42  ;;  %v3066_v30 = vmul.f32 %v6846_v56, %v8859_v16  ;;  %v6508_v16 = vld [vmem:[#allocation11 + $0x38] ss:$24 sps:$4 sm:$0xff]   ;;  %v6513_v31 = vld [vmem:[#allocation11 + $0x6c] ss:$24 sps:$4 sm:$0xff]  }
 0x5c3   : > { %v6848_v46 = vpop.eup %6847  ;;  %v3020_v20 = vmul.f32 0.00390625, %v2986_v55 }
 0x5c4   : > { %v2989_v57 = vpop.xlane.xlu1 %2988  ;;  %3836 = vmatprep.mubr.bf16.mxu1 %v9064_v47  ;;  %4062 = vmatprep.mubr.bf16.mxu0 %v9064_v47  ;;  %v3069_v26 = vmul.f32 %v6848_v46, %v8868_v63  ;;  %v3110_v4 = vmul.f32 %v9044_v17, %v3067_v43  ;;  %v3068_v59 = vmul.f32 %v6848_v46, %v8865_v12 }
 0x5c5   : > { %v3036_v22 = vadd.f32 1e-05, %v3020_v20  ;;  %v3021_v5 = vmul.f32 0.00390625, %v2989_v57  ;;  %3837 = vmatmul.mubr.bf16.vlgmr.msra.gmra.mrb[32].mxu1 %v9066_v41  ;;  %4063 = vmatmul.mubr.bf16.vlgmr.msra.gmra.mrb[64].mxu0 %v9066_v41  ;;  %v3109_v56 = vmul.f32 %v9038_v9, %v3066_v30  ;;  %v6511_v20 = vld [vmem:[#allocation11 + $0x68] ss:$24 sps:$4 sm:$0xff]  }
 0x5c6   : > { %3918 = vmatpush1.bf16.msra.mxu1 %v6505_v34  ;;  %v3112_v42 = vmul.f32 %v9044_v17, %v3069_v26  ;;  %v3111_v49 = vmul.f32 %v9038_v9, %v3068_v59  ;;  %v3153_v12 = vadd.f32 %v9052_v33, %v3110_v4 }
 0x5c7   : > { %6853 = vrsqrt.f32 %v3036_v22  ;;  %v3037_v63 = vadd.f32 1e-05, %v3021_v5  ;;  %3919 = vmatprep.subr.bf16.mxu1 %v6510_v53  ;;  %v3152_v55 = vadd.f32 %v9049_v0, %v3109_v56  ;;  %v6516_v22 = vld [vmem:[#allocation11 + $0x9c] ss:$24 sps:$4 sm:$0xff]  }
 0x5c8   : > { %v3155_v10 = vadd.f32 %v9052_v33, %v3112_v42  ;;  %v3154_v43 = vadd.f32 %v9049_v0, %v3111_v49 }
 0x5c9   : > { %v6850_v46 = vpop.eup %6849  ;;  %6855 = vrsqrt.f32 %v3037_v63 }
 0x5ca   : > { %3920 = vmatpush1.bf16.msra.mxu1 %v6508_v16  ;;  %v2992_v34 = vpop.xlane.xlu0 %2991  ;;  %v9084_v30 = vpack.c.bf16 %v3155_v10, %v3153_v12  ;;  %v9086_v57 = vpack.c.bf16 %v3154_v43, %v3152_v55  ;;  %v3071_v53 = vmul.f32 %v6850_v46, %v8882_v38  ;;  %v3070_v26 = vmul.f32 %v6850_v46, %v8879_v52  ;;  %v6514_v38 = vld [vmem:[#allocation11 + $0x98] ss:$24 sps:$4 sm:$0xff]   ;;  %v6519_v10 = vld [vmem:[#allocation11 + $0xcc] ss:$24 sps:$4 sm:$0xff]  }
 0x5cb   : > { %v6852_v4 = vpop.eup %6851  ;;  %v3022_v59 = vmul.f32 0.00390625, %v2992_v34  ;;  %3921 = vmatprep.subr.bf16.mxu1 %v6513_v31 }
 0x5cc   : > { %v2995_v5 = vpop.xlane.xlu1 %2994  ;;  %3846 = vmatprep.mubr.bf16.mxu1 %v9084_v30  ;;  %4072 = vmatprep.mubr.bf16.mxu0 %v9084_v30  ;;  %v3073_v56 = vmul.f32 %v6852_v4, %v8888_v1  ;;  %v3114_v16 = vmul.f32 %v9044_v17, %v3071_v53  ;;  %v3072_v42 = vmul.f32 %v6852_v4, %v8885_v14 }
 0x5cd   : > { %v3038_v49 = vadd.f32 1e-05, %v3022_v59  ;;  %v3023_v63 = vmul.f32 0.00390625, %v2995_v5  ;;  %3847 = vmatmul.mubr.bf16.gmra.mrb[36].mxu1 %v9086_v57  ;;  %4073 = vmatmul.mubr.bf16.gmra.mrb[68].mxu0 %v9086_v57  ;;  %v3113_v52 = vmul.f32 %v9038_v9, %v3070_v26  ;;  %v6517_v26 = vld [vmem:[#allocation11 + $0xc8] ss:$24 sps:$4 sm:$0xff]  }
 0x5ce   : > { %3922 = vmatpush1.bf16.msra.mxu1 %v6511_v20  ;;  %v3116_v31 = vmul.f32 %v9044_v17, %v3073_v56  ;;  %v3115_v12 = vmul.f32 %v9038_v9, %v3072_v42  ;;  %v3157_v14 = vadd.f32 %v9052_v33, %v3114_v16  ;;  %v6522_v16 = vld [vmem:[#allocation11 + $0xfc] ss:$24 sps:$4 sm:$0xff]  }
 0x5cf   : > { %6857 = vrsqrt.f32 %v3038_v49  ;;  %v3039_v1 = vadd.f32 1e-05, %v3023_v63  ;;  %3923 = vmatprep.subr.bf16.mxu1 %v6516_v22  ;;  %v3156_v43 = vadd.f32 %v9049_v0, %v3113_v52 }
 0x5d0   : > { %v3159_v55 = vadd.f32 %v9052_v33, %v3116_v31  ;;  %v3158_v46 = vadd.f32 %v9049_v0, %v3115_v12 }
 0x5d1   : > { %v6854_v34 = vpop.eup %6853  ;;  %6859 = vrsqrt.f32 %v3039_v1 }
 0x5d2   : > { %3924 = vmatpush1.bf16.msra.mxu1 %v6514_v38  ;;  %v2998_v20 = vpop.xlane.xlu0 %2997  ;;  %v9104_v53 = vpack.c.bf16 %v3159_v55, %v3157_v14  ;;  %v9106_v4 = vpack.c.bf16 %v3158_v46, %v3156_v43  ;;  %v3075_v59 = vmul.f32 %v6854_v34, %v8907_v2  ;;  %v3074_v22 = vmul.f32 %v6854_v34, %v8904_v15  ;;  %v6520_v2 = vld [vmem:[#allocation11 + $0xf8] ss:$24 sps:$4 sm:$0xff]  }
 0x5d3   : > { %v6856_v5 = vpop.eup %6855  ;;  %v3024_v56 = vmul.f32 0.00390625, %v2998_v20  ;;  %3925 = vmatprep.subr.bf16.mxu1 %v6519_v10  ;;  %v6525_v10 = vld [vmem:[#allocation11 + $0x12c] ss:$24 sps:$4 sm:$0xff]  }
 0x5d4   : > { %v3001_v42 = vpop.xlane.xlu1 %3000  ;;  %3856 = vmatprep.mubr.bf16.mxu1 %v9104_v53  ;;  %4082 = vmatprep.mubr.bf16.mxu0 %v9104_v53  ;;  %v3077_v49 = vmul.f32 %v6856_v5, %v8916_v58  ;;  %v3118_v63 = vmul.f32 %v9044_v17, %v3075_v59  ;;  %v3076_v52 = vmul.f32 %v6856_v5, %v8913_v13 }
 0x5d5   : > { %v3040_v38 = vadd.f32 1e-05, %v3024_v56  ;;  %v3025_v31 = vmul.f32 0.00390625, %v3001_v42  ;;  %3857 = vmatmul.mubr.bf16.gmra.mrb[40].mxu1 %v9106_v4  ;;  %4083 = vmatmul.mubr.bf16.gmra.mrb[72].mxu0 %v9106_v4  ;;  %v3117_v15 = vmul.f32 %v9038_v9, %v3074_v22  ;;  %v6528_v42 = vld [vmem:[#allocation11 + $0x15c] ss:$24 sps:$4 sm:$0xff]  }
 0x5d6   : > { %3926 = vmatpush1.bf16.msra.mxu1 %v6517_v26  ;;  %v3120_v12 = vmul.f32 %v9044_v17, %v3077_v49  ;;  %v3119_v1 = vmul.f32 %v9038_v9, %v3076_v52  ;;  %v3161_v13 = vadd.f32 %v9052_v33, %v3118_v63  ;;  %v6523_v26 = vld [vmem:[#allocation11 + $0x128] ss:$24 sps:$4 sm:$0xff]  }
 0x5d7   : > { %6861 = vrsqrt.f32 %v3040_v38  ;;  %v3041_v58 = vadd.f32 1e-05, %v3025_v31  ;;  %3927 = vmatprep.subr.bf16.mxu1 %v6522_v16  ;;  %v3160_v55 = vadd.f32 %v9049_v0, %v3117_v15 }
 0x5d8   : > { %v3163_v14 = vadd.f32 %v9052_v33, %v3120_v12  ;;  %v3162_v43 = vadd.f32 %v9049_v0, %v3119_v1  ;;  %v6531_v1 = vld [vmem:[#allocation11 + $0x18c] ss:$24 sps:$4 sm:$0xff]  }
 0x5d9   : > { %v6858_v46 = vpop.eup %6857  ;;  %6863 = vrsqrt.f32 %v3041_v58 }
 0x5da   : > { %3928 = vmatpush1.bf16.msra.mxu1 %v6520_v2  ;;  %v3004_v34 = vpop.xlane.xlu0 %3003  ;;  %v9124_v20 = vpack.c.bf16 %v3163_v14, %v3161_v13  ;;  %v9126_v59 = vpack.c.bf16 %v3162_v43, %v3160_v55  ;;  %v3079_v22 = vmul.f32 %v6858_v46, %v8939_v8  ;;  %v3078_v5 = vmul.f32 %v6858_v46, %v8936_v51  ;;  %v6526_v8 = vld [vmem:[#allocation11 + $0x158] ss:$24 sps:$4 sm:$0xff]   ;;  %v6529_v46 = vld [vmem:[#allocation11 + $0x188] ss:$24 sps:$4 sm:$0xff]  }
 0x5db   : > { %v6860_v56 = vpop.eup %6859  ;;  %v3026_v16 = vmul.f32 0.00390625, %v3004_v34  ;;  %3929 = vmatprep.subr.bf16.mxu1 %v6525_v10 }
 0x5dc   : > { %v3007_v49 = vpop.xlane.xlu1 %3006  ;;  %3866 = vmatprep.mubr.bf16.mxu1 %v9124_v20  ;;  %4092 = vmatprep.mubr.bf16.mxu0 %v9124_v20  ;;  %v3081_v63 = vmul.f32 %v6860_v56, %v8948_v25  ;;  %v3122_v52 = vmul.f32 %v9044_v17, %v3079_v22  ;;  %v3080_v38 = vmul.f32 %v6860_v56, %v8945_v50 }
 0x5dd   : > { %v3042_v31 = vadd.f32 1e-05, %v3026_v16  ;;  %v3027_v15 = vmul.f32 0.00390625, %v3007_v49  ;;  %3867 = vmatmul.mubr.bf16.gmra.mrb[44].mxu1 %v9126_v59  ;;  %4093 = vmatmul.mubr.bf16.gmra.mrb[76].mxu0 %v9126_v59  ;;  %v3121_v51 = vmul.f32 %v9038_v9, %v3078_v5  ;;  %v6534_v16 = vld [vmem:[#allocation11 + $0x1bc] ss:$24 sps:$4 sm:$0xff]  }
 0x5de   : > { %3930 = vmatpush1.bf16.msra.mxu1 %v6523_v26  ;;  %v3124_v2 = vmul.f32 %v9044_v17, %v3081_v63  ;;  %v3123_v12 = vmul.f32 %v9038_v9, %v3080_v38  ;;  %v3165_v50 = vadd.f32 %v9052_v33, %v3122_v52 }
 0x5df   : > { %6865 = vrsqrt.f32 %v3042_v31  ;;  %v3043_v25 = vadd.f32 1e-05, %v3027_v15  ;;  %3931 = vmatprep.subr.bf16.mxu1 %v6528_v42  ;;  %v3164_v10 = vadd.f32 %v9049_v0, %v3121_v51 }
 0x5e0   : > { %v3167_v58 = vadd.f32 %v9052_v33, %v3124_v2  ;;  %v3166_v13 = vadd.f32 %v9049_v0, %v3123_v12 }
 0x5e1   : > { %v6862_v14 = vpop.eup %6861  ;;  %6867 = vrsqrt.f32 %v3043_v25 }
 0x5e2   : > { %3932 = vmatpush1.bf16.msra.mxu1 %v6526_v8  ;;  %v3010_v55 = vpop.xlane.xlu0 %3009  ;;  %v9144_v43 = vpack.c.bf16 %v3167_v58, %v3165_v50  ;;  %v9146_v34 = vpack.c.bf16 %v3166_v13, %v3164_v10  ;;  %v3083_v26 = vmul.f32 %v6862_v14, %v8971_v29  ;;  %v3082_v22 = vmul.f32 %v6862_v14, %v8968_v36  ;;  %v6532_v36 = vld [vmem:[#allocation11 + $0x1b8] ss:$24 sps:$4 sm:$0xff]   ;;  %v6535_v58 = vld [vmem:[#allocation11 + $0x1e8] ss:$24 sps:$4 sm:$0xff]  }
 0x5e3   : > { %v6864_v5 = vpop.eup %6863  ;;  %v3028_v56 = vmul.f32 0.00390625, %v3010_v55  ;;  %3933 = vmatprep.subr.bf16.mxu1 %v6531_v1 }
 0x5e4   : > { %v3013_v42 = vpop.xlane.xlu1 %3012  ;;  %3876 = vmatprep.mubr.bf16.mxu1 %v9144_v43  ;;  %v3085_v49 = vmul.f32 %v6864_v5, %v8980_v27  ;;  %v3126_v63 = vmul.f32 %v9044_v17, %v3083_v26  ;;  %v3084_v52 = vmul.f32 %v6864_v5, %v8977_v21  ;;  %v3125_v38 = vmul.f32 %v9038_v9, %v3082_v22  ;;  %v6537_v27 = vld [vmem:[#allocation11 + $0x1ec] ss:$24 sps:$4 sm:$0xff]  }
 0x5e5   : > { %v3044_v31 = vadd.f32 1e-05, %v3028_v56  ;;  %v3029_v15 = vmul.f32 0.00390625, %v3013_v42  ;;  %3877 = vmatmul.mubr.bf16.gmra.mrb[48].mxu1 %v9146_v34  ;;  %v6543_v42 = vld [vmem:[#allocation11 + $0x24c] ss:$24 sps:$4 sm:$0xff]  }
 0x5e6   : > { %3934 = vmatpush1.bf16.msra.mxu1 %v6529_v46  ;;  %v3128_v29 = vmul.f32 %v9044_v17, %v3085_v49  ;;  %v3127_v51 = vmul.f32 %v9038_v9, %v3084_v52  ;;  %v3169_v2 = vadd.f32 %v9052_v33, %v3126_v63  ;;  %v3168_v12 = vadd.f32 %v9049_v0, %v3125_v38  ;;  %v6540_v46 = vld [vmem:[#allocation11 + $0x21c] ss:$24 sps:$4 sm:$0xff]  }
 0x5e7   : > { %6869 = vrsqrt.f32 %v3044_v31  ;;  %v3045_v8 = vadd.f32 1e-05, %v3029_v15  ;;  %3935 = vmatprep.subr.bf16.mxu1 %v6534_v16  ;;  %v6538_v16 = vld [vmem:[#allocation11 + $0x218] ss:$24 sps:$4 sm:$0xff]   ;;  %v6541_v31 = vld [vmem:[#allocation11 + $0x248] ss:$24 sps:$4 sm:$0xff]  }
 0x5e8   : > { %v3171_v21 = vadd.f32 %v9052_v33, %v3128_v29  ;;  %v3170_v25 = vadd.f32 %v9049_v0, %v3127_v51 }
 0x5e9   : > { %v6866_v1 = vpop.eup %6865  ;;  %6871 = vrsqrt.f32 %v3045_v8  ;;  %v6546_v8 = vld [vmem:[#allocation11 + $0x27c] ss:$24 sps:$4 sm:$0xff]  }
 0x5ea   : > { %3936 = vmatpush1.bf16.msra.mxu1 %v6532_v36  ;;  %v9162_v50 = vpack.c.bf16 %v3171_v21, %v3169_v2  ;;  %v9164_v10 = vpack.c.bf16 %v3170_v25, %v3168_v12  ;;  %v3087_v13 = vmul.f32 %v6866_v1, %v8998_v40  ;;  %v3086_v14 = vmul.f32 %v6866_v1, %v8995_v7  ;;  %v6544_v25 = vld [vmem:[#allocation11 + $0x278] ss:$24 sps:$4 sm:$0xff]   ;;  %v6549_v1 = vld [vmem:[#allocation11 + $0x2ac] ss:$24 sps:$4 sm:$0xff]  }
 0x5eb   : > { %v6868_v55 = vpop.eup %6867  ;;  %3937 = vmatprep.subr.bf16.mxu1 %v6537_v27 }
 0x5ec   : > { %3886 = vmatprep.mubr.bf16.mxu1 %v9162_v50  ;;  %v3089_v26 = vmul.f32 %v6868_v55, %v9004_v28  ;;  %v3130_v22 = vmul.f32 %v9044_v17, %v3087_v13  ;;  %v3088_v5 = vmul.f32 %v6868_v55, %v9001_v18  ;;  %v3129_v56 = vmul.f32 %v9038_v9, %v3086_v14  ;;  %v6547_v55 = vld [vmem:[#allocation11 + $0x2a8] ss:$24 sps:$4 sm:$0xff]  }
 0x5ed   : > { %3887 = vmatmul.mubr.bf16.gmra.mrb[52].mxu1 %v9164_v10 }
 0x5ee   : > { %3938 = vmatpush1.bf16.msra.mxu1 %v6535_v58  ;;  %v3132_v40 = vmul.f32 %v9044_v17, %v3089_v26  ;;  %v3131_v7 = vmul.f32 %v9038_v9, %v3088_v5  ;;  %v3173_v49 = vadd.f32 %v9052_v33, %v3130_v22  ;;  %v3172_v63 = vadd.f32 %v9049_v0, %v3129_v56  ;;  %v6907_v26 = vld [vmem:[#allocation11 + $0x44] ss:$24 sps:$4 sm:$0xff]   ;;  %v6908_v22 = vld [vmem:[#allocation11 + $0x40] ss:$24 sps:$4 sm:$0xff]   ;;  %v6909_v5 = vld [vmem:[#allocation11 + $0x74] ss:$24 sps:$4 sm:$0xff]  }
 0x5ef   : > { %3939 = vmatprep.subr.bf16.mxu1 %v6540_v46  ;;  %v6911_v56 = vld [vmem:[#allocation11 + $0xa4] ss:$24 sps:$4 sm:$0xff]  }
 0x5f0   : > { %v3175_v28 = vadd.f32 %v9052_v33, %v3132_v40  ;;  %v3174_v18 = vadd.f32 %v9049_v0, %v3131_v7  ;;  %v6915_v40 = vld [vmem:[#allocation11 + $0x104] ss:$24 sps:$4 sm:$0xff]   ;;  %v6916_v7 = vld [vmem:[#allocation11 + $0x100] ss:$24 sps:$4 sm:$0xff]  }
 0x5f1   : > { %v6870_v52 = vpop.eup %6869 }
 0x5f2   : > { %3940 = vmatpush1.bf16.msra.mxu1 %v6538_v16  ;;  %v9180_v38 = vpack.c.bf16 %v3175_v28, %v3173_v49  ;;  %v9182_v15 = vpack.c.bf16 %v3174_v18, %v3172_v63  ;;  %v3091_v36 = vmul.f32 %v6870_v52, %v9018_v61  ;;  %v3090_v29 = vmul.f32 %v6870_v52, %v9015_v24  ;;  %v6912_v16 = vld [vmem:[#allocation11 + $0xa0] ss:$24 sps:$4 sm:$0xff]  }
 0x5f3   : > { %v6872_v51 = vpop.eup %6871  ;;  %3941 = vmatprep.subr.bf16.mxu1 %v6543_v42 }
 0x5f4   : > { %3896 = vmatprep.mubr.bf16.mxu1 %v9180_v38  ;;  %v3093_v27 = vmul.f32 %v6872_v51, %v9024_v48  ;;  %v3134_v2 = vmul.f32 %v9044_v17, %v3091_v36  ;;  %v3092_v21 = vmul.f32 %v6872_v51, %v9021_v11  ;;  %v3133_v12 = vmul.f32 %v9038_v9, %v3090_v29 }
 0x5f5   : > { %3897 = vmatmul.mubr.bf16.gmra.mrb[56].mxu1 %v9182_v15 }
 0x5f6   : > { %3942 = vmatpush1.bf16.msra.mxu1 %v6541_v31  ;;  %v3136_v61 = vmul.f32 %v9044_v17, %v3093_v27  ;;  %v3135_v24 = vmul.f32 %v9038_v9, %v3092_v21  ;;  %v3177_v58 = vadd.f32 %v9052_v33, %v3134_v2  ;;  %v3176_v13 = vadd.f32 %v9049_v0, %v3133_v12  ;;  %v6552_v17 = vld [vmem:[#allocation11 + $0x2dc] ss:$24 sps:$4 sm:$0xff]   ;;  %v6550_v9 = vld [vmem:[#allocation11 + $0x2d8] ss:$24 sps:$4 sm:$0xff]  }
 0x5f7   : > { %3943 = vmatprep.subr.bf16.mxu1 %v6546_v8 }
 0x5f8   : > { %v3179_v48 = vadd.f32 %v9052_v33, %v3136_v61  ;;  %v3178_v11 = vadd.f32 %v9049_v0, %v3135_v24  ;;  %v6905_v33 = vld [vmem:[#allocation11 + $0x14] ss:$24 sps:$4 sm:$0xff]   ;;  %v6906_v0 = vld [vmem:[#allocation11 + $0x10] ss:$24 sps:$4 sm:$0xff]  }
 0x5fa   : > { %3944 = vmatpush1.bf16.msra.mxu1 %v6544_v25  ;;  %v9198_v14 = vpack.c.bf16 %v3179_v48, %v3177_v58  ;;  %v9200_v46 = vpack.c.bf16 %v3178_v11, %v3176_v13 }
 0x5fb   : > { %3945 = vmatprep.subr.bf16.mxu1 %v6549_v1 }
 0x5fc   : > { %3906 = vmatprep.mubr.bf16.mxu1 %v9198_v14 }
 0x5fd   : > { %3907 = vmatmul.mubr.bf16.gmra.mrb[60].mxu1 %v9200_v46 }
 0x5fe   : > { %3946 = vmatpush1.bf16.msra.mxu1 %v6547_v55  ;;  %3949 = vmatprep.mubr.bf16.mxu1 %v9064_v47  ;;  %v6910_v47 = vld [vmem:[#allocation11 + $0x70] ss:$24 sps:$4 sm:$0xff]  }
 0x5ff   : > { %3947 = vmatprep.subr.bf16.mxu1 %v6552_v17 }
 0x602   : > { %3948 = vmatpush1.bf16.msra.mxu1 %v6550_v9 }
 0x603   : > { %5930 = vmatprep.subr.bf16.mxu1 %v6905_v33 }
 0x605   : > { %3950 = vmatmul.mubr.bf16.vlgmr.msra.gmra.mrb[64].mxu1 %v9066_v41  ;;  %v6913_v41 = vld [vmem:[#allocation11 + $0xd4] ss:$24 sps:$4 sm:$0xff]  }
 0x606   : > { %5946 = vmatpush1.bf16.msra.mxu1 %v6906_v0  ;;  %3959 = vmatprep.mubr.bf16.mxu1 %v9084_v30  ;;  %v6914_v30 = vld [vmem:[#allocation11 + $0xd0] ss:$24 sps:$4 sm:$0xff]  }
 0x607   : > { %5931 = vmatprep.subr.bf16.mxu1 %v6907_v26 }
 0x60a   : > { %5947 = vmatpush1.bf16.msra.mxu1 %v6908_v22 }
 0x60b   : > { %5932 = vmatprep.subr.bf16.mxu1 %v6909_v5 }
 0x60d   : > { %3960 = vmatmul.mubr.bf16.gmra.mrb[68].mxu1 %v9086_v57  ;;  %v6917_v57 = vld [vmem:[#allocation11 + $0x134] ss:$24 sps:$4 sm:$0xff]  }
 0x60e   : > { %5948 = vmatpush1.bf16.msra.mxu1 %v6910_v47  ;;  %3969 = vmatprep.mubr.bf16.mxu1 %v9104_v53 }
 0x60f   : > { %5933 = vmatprep.subr.bf16.mxu1 %v6911_v56 }
 0x612   : > { %5949 = vmatpush1.bf16.msra.mxu1 %v6912_v16 }
 0x613   : > { %5934 = vmatprep.subr.bf16.mxu1 %v6913_v41 }
 0x615   : > { %3970 = vmatmul.mubr.bf16.gmra.mrb[72].mxu1 %v9106_v4 }
 0x616   : > { %5950 = vmatpush1.bf16.msra.mxu1 %v6914_v30  ;;  %3979 = vmatprep.mubr.bf16.mxu1 %v9124_v20 }
 0x617   : > { %5935 = vmatprep.subr.bf16.mxu1 %v6915_v40 }
 0x61a   : > { %5951 = vmatpush1.bf16.msra.mxu1 %v6916_v7 }
 0x61b   : > { %5936 = vmatprep.subr.bf16.mxu1 %v6917_v57 }
 0x61d   : > { %3980 = vmatmul.mubr.bf16.gmra.mrb[76].mxu1 %v9126_v59 }
 0x61e   : > { %5952 = vmatpush1.bf16.msra.mxu1 %v8817_v23  ;;  %3989 = vmatprep.mubr.bf16.mxu1 %v9144_v43  ;;  %v9739_v23 = vld [vmem:[#allocation43_spill] sm:$0xff] }
 0x61f   : > { %5937 = vmatprep.subr.bf16.mxu1 %v8819_v19  ;;  %v9740_v19 = vld [vmem:[#allocation44_spill] sm:$0xff] }
 0x622   : > { %5953 = vmatpush1.bf16.msra.mxu1 %v8822_v60  ;;  %v9741_v60 = vld [vmem:[#allocation40_spill] sm:$0xff] }
 0x623   : > { %5938 = vmatprep.subr.bf16.mxu1 %v8825_v44  ;;  %v9742_v44 = vld [vmem:[#allocation46_spill] sm:$0xff] }
 0x625   : > { %3990 = vmatmul.mubr.bf16.gmra.mrb[80].mxu1 %v9146_v34 }
 0x626   : > { %5954 = vmatpush1.bf16.msra.mxu1 %v8828_v6  ;;  %3999 = vmatprep.mubr.bf16.mxu1 %v9162_v50  ;;  %v9743_v6 = vld [vmem:[#allocation41_spill] sm:$0xff] }
 0x627   : > { %5939 = vmatprep.subr.bf16.mxu1 %v8831_v3  ;;  %v9744_v3 = vld [vmem:[#allocation47_spill] sm:$0xff] }
 0x62a   : > { %5955 = vmatpush1.bf16.msra.mxu1 %v8834_v62  ;;  %v9250_v62 = vld [vmem:[%s9745_s26] sm:$0x3f]  ;;  %s9751_s26 = sld [smem:[#allocation70_spill]] }
 0x62b   : > { %5940 = vmatprep.subr.bf16.mxu1 %v8898_v37  ;;  %v9746_v37 = vld [vmem:[#allocation35_spill] sm:$0xff] }
 0x62d   : > { %4000 = vmatmul.mubr.bf16.gmra.mrb[84].mxu1 %v9164_v10 }
 0x62e   : > { %5956 = vmatpush1.bf16.msra.mxu1 %v8900_v32  ;;  %4009 = vmatprep.mubr.bf16.mxu1 %v9180_v38  ;;  %v3312_v32 = vsub.s32 4, %v9746_v37 }
 0x62f   : > { %5941 = vmatprep.subr.bf16.mxu1 %v8910_v45  ;;  %v3316_v45 = vsub.s32 5, %v9746_v37 }
 0x630   : > { %v9263_v4 = vrot.slane %v9250_v62, %v3312_v32  ;;  %s9336_s17 = scalar_lea.hbm %s9751_s26, %s5535_s8  ;;  %s7094_s8 = scalar_lea.vmem %s7093_s14, 8192 }
 0x631   : > { %p7096_p3 = scmp.lt.s32.totalorder %s7094_s8, %s7088_s16 }
 0x632   : > { %5957 = vmatpush1.bf16.msra.mxu1 %v8922_v54  ;;  %v9747_v54 = vld [vmem:[#allocation36_spill] sm:$0xff] }
 0x633   : > { %5942 = vmatprep.subr.bf16.mxu1 %v8930_v35  ;;  %v9256_v35 = vrot.slane %v9250_v62, %v9747_v54  ;;  %p7097_p10 = por %p7096_p3, %p7095_p1 }
 0x635   : > { %4010 = vmatmul.mubr.bf16.gmra.mrb[88].mxu1 %v9182_v15  ;;  %p7098_p8 = pnand %p7097_p10, %p7091_p9 }
 0x636   : > { %5958 = vmatpush1.bf16.msra.mxu1 %v8932_v39  ;;  %4019 = vmatprep.mubr.bf16.mxu1 %v9198_v14  ;;  %v9748_v39 = vld [vmem:[#allocation37_spill] sm:$0xff] }
 0x637   : > { %5943 = vmatprep.subr.bf16.mxu1 %v9739_v23  ;;  %v9260_v53 = vrot.slane %v9250_v62, %v9748_v39 }
 0x63a   : > { %5959 = vmatpush1.bf16.msra.mxu1 %v9740_v19 }
 0x63b   : > { %5944 = vmatprep.subr.bf16.mxu1 %v9741_v60 }
 0x63d   : > { %4020 = vmatmul.mubr.bf16.gmra.mrb[92].mxu1 %v9200_v46 }
 0x63e   : > { %5960 = vmatpush1.bf16.msra.mxu1 %v9742_v44  ;;  %4102 = vmatprep.mubr.bf16.mxu1 %v9144_v43  ;;  %v9266_v43 = vrot.slane %v9250_v62, %v3316_v45 }
 0x63f   : > { %5945 = vmatprep.subr.bf16.mxu1 %v9743_v6 }
 0x642   : > { %5961 = vmatpush1.bf16.msra.mxu1 %v9744_v3 }
 0x645   : > { %4103 = vmatmul.mubr.bf16.vlgmr.msra.gmra.mrb[96].mxu1 %v9146_v34 }
 0x646   : > { %4112 = vmatprep.mubr.bf16.mxu1 %v9162_v50 }
 0x64d   : > { %4113 = vmatmul.mubr.bf16.gmra.mrb[100].mxu1 %v9164_v10 }
 0x64e   : > { %4122 = vmatprep.mubr.bf16.mxu1 %v9180_v38 }
 0x655   : > { %4123 = vmatmul.mubr.bf16.gmra.mrb[104].mxu1 %v9182_v15 }
 0x656   : > { %4132 = vmatprep.mubr.bf16.mxu1 %v9198_v14 }
 0x65d   : > { %4133 = vmatmul.mubr.bf16.gmra.mrb[108].mxu1 %v9200_v46 }
 0x698   : > { %v3838_v20 = vpop.f32.mrb[32].mxu1  ;;  %v4064_v59 = vpop.f32.mrb[64].mxu0 }
 0x699   : > { %v3839_v34 = vadd.f32 %v3838_v20, %v9256_v35  ;;  %v3840_v50 = vpop.f32.mrb[33].mxu1  ;;  %v4066_v10 = vpop.f32.mrb[65].mxu0  ;;  %v4065_v63 = vadd.f32 %v4064_v59, %v9263_v4 }
 0x69a   : > { %v3841_v42 = vadd.f32 %v3840_v50, %v9260_v53  ;;  %v3842_v49 = vpop.f32.mrb[34].mxu1  ;;  %v4068_v28 = vpop.f32.mrb[66].mxu0  ;;  %v4067_v15 = vadd.f32 %v4066_v10, %v9266_v43 }
 0x69b   : > { %v3843_v18 = vadd.f32 %v3842_v49, %v9256_v35  ;;  %v4069_v52 = vadd.f32 %v4068_v28, %v9263_v4  ;;  %v3844_v38 = vpop.f32.mrb[35].mxu1  ;;  %v4070_v31 = vpop.f32.mrb[67].mxu0  ;;  %v4143_v51 = vmul.f32 0.088388346, %v3839_v34 }
 0x69c   : > { %v3845_v36 = vadd.f32 %v3844_v38, %v9260_v53  ;;  %v4071_v29 = vadd.f32 %v4070_v31, %v9266_v43  ;;  %v4144_v2 = vmul.f32 0.088388346, %v3841_v42 }
 0x69d   : > { %v4145_v8 = vmul.f32 0.088388346, %v3843_v18  ;;  %v5728_v27 = vpack.c.bf16 %v4069_v52, %v4065_v63 }
 0x69e   : > { %v4146_v21 = vmul.f32 0.088388346, %v3845_v36  ;;  %v5848_v12 = vpack.c.bf16 %v4071_v29, %v4067_v15 }
 0x69f   : > { %v5648_v25 = vpack.c.bf16 %v4145_v8, %v4143_v51  ;;  %5729 = vst [vmem:[%s9280_s1] sm:$0xff] %v5728_v27  }
 0x6a0   : > { %v5768_v61 = vpack.c.bf16 %v4146_v21, %v4144_v2  ;;  %5922 = vst [vmem:[%s9280_s1 + $0x40] sm:$0xff] %v5848_v12   ;;  %v3848_v24 = vpop.f32.mrb[36].mxu1  ;;  %v4074_v1 = vpop.f32.mrb[68].mxu0 }
 0x6a1   : > { %5649 = vst [vmem:[%s9285_s3] sm:$0xff] %v5648_v25   ;;  %v3849_v58 = vadd.f32 %v3848_v24, %v9256_v35  ;;  %v3850_v48 = vpop.f32.mrb[37].mxu1  ;;  %v4076_v13 = vpop.f32.mrb[69].mxu0  ;;  %v4075_v46 = vadd.f32 %v4074_v1, %v9263_v4 }
 0x6a2   : > { %5906 = vst [vmem:[%s9285_s3 + $0x40] sm:$0xff] %v5768_v61   ;;  %v3851_v11 = vadd.f32 %v3850_v48, %v9260_v53  ;;  %v3852_v14 = vpop.f32.mrb[38].mxu1  ;;  %v4078_v55 = vpop.f32.mrb[70].mxu0  ;;  %v4077_v26 = vadd.f32 %v4076_v13, %v9266_v43 }
 0x6a3   : > { %v3853_v17 = vadd.f32 %v3852_v14, %v9256_v35  ;;  %v4079_v9 = vadd.f32 %v4078_v55, %v9263_v4  ;;  %v3854_v33 = vpop.f32.mrb[39].mxu1  ;;  %v4080_v0 = vpop.f32.mrb[71].mxu0  ;;  %v4147_v47 = vmul.f32 0.088388346, %v3849_v58 }
 0x6a4   : > { %v3855_v22 = vadd.f32 %v3854_v33, %v9260_v53  ;;  %v4081_v5 = vadd.f32 %v4080_v0, %v9266_v43  ;;  %v4148_v41 = vmul.f32 0.088388346, %v3851_v11 }
 0x6a5   : > { %v4149_v56 = vmul.f32 0.088388346, %v3853_v17  ;;  %v5733_v16 = vpack.c.bf16 %v4079_v9, %v4075_v46 }
 0x6a6   : > { %v4150_v30 = vmul.f32 0.088388346, %v3855_v22  ;;  %v5853_v40 = vpack.c.bf16 %v4081_v5, %v4077_v26 }
 0x6a7   : > { %v5653_v7 = vpack.c.bf16 %v4149_v56, %v4147_v47  ;;  %5899 = vst [vmem:[%s9280_s1 + $0x8] sm:$0xff] %v5733_v16  }
 0x6a8   : > { %v5773_v57 = vpack.c.bf16 %v4150_v30, %v4148_v41  ;;  %5923 = vst [vmem:[%s9280_s1 + $0x48] sm:$0xff] %v5853_v40   ;;  %v3858_v23 = vpop.f32.mrb[40].mxu1  ;;  %v4084_v19 = vpop.f32.mrb[72].mxu0 }
 0x6a9   : > { %5885 = vst [vmem:[%s9285_s3 + $0x8] sm:$0xff] %v5653_v7   ;;  %v3859_v60 = vadd.f32 %v3858_v23, %v9256_v35  ;;  %v3860_v44 = vpop.f32.mrb[41].mxu1  ;;  %v4086_v6 = vpop.f32.mrb[73].mxu0  ;;  %v4085_v54 = vadd.f32 %v4084_v19, %v9263_v4 }
 0x6aa   : > { %5907 = vst [vmem:[%s9285_s3 + $0x48] sm:$0xff] %v5773_v57   ;;  %v3861_v3 = vadd.f32 %v3860_v44, %v9260_v53  ;;  %v3862_v32 = vpop.f32.mrb[42].mxu1  ;;  %v4088_v45 = vpop.f32.mrb[74].mxu0  ;;  %v4087_v50 = vadd.f32 %v4086_v6, %v9266_v43 }
 0x6ab   : > { %v3863_v39 = vadd.f32 %v3862_v32, %v9256_v35  ;;  %v4089_v20 = vadd.f32 %v4088_v45, %v9263_v4  ;;  %v3864_v59 = vpop.f32.mrb[43].mxu1  ;;  %v4090_v34 = vpop.f32.mrb[75].mxu0  ;;  %v4151_v49 = vmul.f32 0.088388346, %v3859_v60 }
 0x6ac   : > { %v3865_v10 = vadd.f32 %v3864_v59, %v9260_v53  ;;  %v4091_v42 = vadd.f32 %v4090_v34, %v9266_v43  ;;  %v4152_v18 = vmul.f32 0.088388346, %v3861_v3 }
 0x6ad   : > { %v4153_v28 = vmul.f32 0.088388346, %v3863_v39  ;;  %v5738_v63 = vpack.c.bf16 %v4089_v20, %v4085_v54 }
 0x6ae   : > { %v4154_v52 = vmul.f32 0.088388346, %v3865_v10  ;;  %v5858_v38 = vpack.c.bf16 %v4091_v42, %v4087_v50 }
 0x6af   : > { %v5658_v31 = vpack.c.bf16 %v4153_v28, %v4151_v49  ;;  %5900 = vst [vmem:[%s9280_s1 + $0x10] sm:$0xff] %v5738_v63  }
 0x6b0   : > { %v5778_v15 = vpack.c.bf16 %v4154_v52, %v4152_v18  ;;  %5924 = vst [vmem:[%s9280_s1 + $0x50] sm:$0xff] %v5858_v38   ;;  %v3868_v36 = vpop.f32.mrb[44].mxu1  ;;  %v4094_v29 = vpop.f32.mrb[76].mxu0 }
 0x6b1   : > { %5886 = vst [vmem:[%s9285_s3 + $0x10] sm:$0xff] %v5658_v31   ;;  %v3869_v51 = vadd.f32 %v3868_v36, %v9256_v35  ;;  %v3870_v8 = vpop.f32.mrb[45].mxu1  ;;  %v4096_v27 = vpop.f32.mrb[77].mxu0  ;;  %v4095_v25 = vadd.f32 %v4094_v29, %v9263_v4 }
 0x6b2   : > { %5908 = vst [vmem:[%s9285_s3 + $0x50] sm:$0xff] %v5778_v15   ;;  %v3871_v2 = vadd.f32 %v3870_v8, %v9260_v53  ;;  %v3872_v21 = vpop.f32.mrb[46].mxu1  ;;  %v4098_v12 = vpop.f32.mrb[78].mxu0  ;;  %v4097_v48 = vadd.f32 %v4096_v27, %v9266_v43 }
 0x6b3   : > { %v3873_v61 = vadd.f32 %v3872_v21, %v9256_v35  ;;  %v4099_v24 = vadd.f32 %v4098_v12, %v9263_v4  ;;  %v3874_v1 = vpop.f32.mrb[47].mxu1  ;;  %v4100_v58 = vpop.f32.mrb[79].mxu0  ;;  %v4155_v14 = vmul.f32 0.088388346, %v3869_v51 }
 0x6b4   : > { %v3875_v13 = vadd.f32 %v3874_v1, %v9260_v53  ;;  %v4101_v11 = vadd.f32 %v4100_v58, %v9266_v43  ;;  %v4156_v17 = vmul.f32 0.088388346, %v3871_v2 }
 0x6b5   : > { %v4157_v55 = vmul.f32 0.088388346, %v3873_v61  ;;  %v5743_v46 = vpack.c.bf16 %v4099_v24, %v4095_v25 }
 0x6b6   : > { %v4158_v9 = vmul.f32 0.088388346, %v3875_v13  ;;  %v5863_v33 = vpack.c.bf16 %v4101_v11, %v4097_v48 }
 0x6b7   : > { %v5663_v0 = vpack.c.bf16 %v4157_v55, %v4155_v14  ;;  %5901 = vst [vmem:[%s9280_s1 + $0x18] sm:$0xff] %v5743_v46  }
 0x6b8   : > { %v5783_v26 = vpack.c.bf16 %v4158_v9, %v4156_v17  ;;  %5925 = vst [vmem:[%s9280_s1 + $0x58] sm:$0xff] %v5863_v33   ;;  %v3878_v22 = vpop.f32.mrb[48].mxu1 }
 0x6b9   : > { %5887 = vst [vmem:[%s9285_s3 + $0x18] sm:$0xff] %v5663_v0   ;;  %v3879_v5 = vadd.f32 %v3878_v22, %v9256_v35  ;;  %v3880_v47 = vpop.f32.mrb[49].mxu1 }
 0x6ba   : > { %5909 = vst [vmem:[%s9285_s3 + $0x58] sm:$0xff] %v5783_v26   ;;  %v3881_v56 = vadd.f32 %v3880_v47, %v9260_v53  ;;  %v3882_v16 = vpop.f32.mrb[50].mxu1 }
 0x6bb   : > { %v3883_v41 = vadd.f32 %v3882_v16, %v9256_v35  ;;  %v3884_v30 = vpop.f32.mrb[51].mxu1 }
 0x6bc   : > { %v3885_v40 = vadd.f32 %v3884_v30, %v9260_v53 }
 0x6bd   : > { %7101 = shalt.err (!%p7098_p8)
}
 0x6be   : > { %s7102_s5 = scalar_lea.hbm %s9336_s17, 4096  ;;  %s7106_s25 = scalar_lea.hbm %s9751_s26, 16384 }
 0x6bf   : > { %p7103_p13 = scmp.ne.s32.totalorder %s9336_s17, %s7102_s5  ;;  %p7107_p5 = scmp.lt.u32.totalorder %s9336_s17, %s9751_s26 }
 0x6c0   : > { %p7108_p11 = scmp.lt.u32.totalorder %s7106_s25, %s7102_s5  ;;  %p7110_p12 = scmp.lt.u32.totalorder %s7102_s5, %s9336_s17 }
 0x6c1   : > { %p7104_p0 = pnand %p7103_p13, %p9752_p4 }
 0x6c2   : > { %p7109_p2 = por %p7108_p11, %p7107_p5 }
 0x6c3   : > { %p7105_p7 = pneg %p7104_p0 }
 0x6c4   : > { %p7111_p6 = por %p7110_p12, %p7109_p2 }
 0x6c6   : > { %p7112_p9 = pnand %p7111_p6, %p7105_p7 }
 0x6c8   : > { %7115 = shalt.err (!%p7112_p9)
}
 0x6c9   : > { %s7221_s16 = smov 256   ;;  %s7222_s8 = smov 16   ;;  %v4159_v7 = vmul.f32 0.088388346, %v3879_v5  ;;  %v4161_v57 = vmul.f32 0.088388346, %v3883_v41 }
 0x6ca   : > { %s9753_s24 = scalar_lea.sflag [#allocation4], %s7579_s28  ;;  %v4160_v23 = vmul.f32 0.088388346, %v3881_v56  ;;  %v4162_v19 = vmul.f32 0.088388346, %v3885_v40  ;;  %v3888_v6 = vpop.f32.mrb[52].mxu1 }
 0x6cb   : > { %6048 = dma.vmem_to_hbm [thread:$0]  (%p9752_p4), %s9338_s27, 4096, %s9336_s17, %s9753_s24, %s7221_s16, %s7221_s16, %s7222_s8   ;;  %v5668_v60 = vpack.c.bf16 %v4161_v57, %v4159_v7  ;;  %v3889_v3 = vadd.f32 %v3888_v6, %v9256_v35  ;;  %v3890_v32 = vpop.f32.mrb[53].mxu1  ;;  %v9754_v33 = vsub.s32 2, %v9746_v37  ;;  %v9755_v5 = vsub.s32 3, %v9746_v37 }
 0x6cc   : > { %v5788_v44 = vpack.c.bf16 %v4162_v19, %v4160_v23  ;;  %v3891_v45 = vadd.f32 %v3890_v32, %v9260_v53  ;;  %v3892_v54 = vpop.f32.mrb[54].mxu1  ;;  %s9401_s0 = scalar_lea.vmem [#allocation16], %s9270_s9  ;;  %s9756_s9 = sand.u32 1, %s7360_s21  }
 0x6cd   : > { %5888 = vst [vmem:[%s9285_s3 + $0x20] sm:$0xff] %v5668_v60   ;;  %v3893_v39 = vadd.f32 %v3892_v54, %v9256_v35  ;;  %v3894_v20 = vpop.f32.mrb[55].mxu1  ;;  %v4163_v34 = vmul.f32 0.088388346, %v3889_v3  ;;  %v9387_v0 = vrot.slane %v9250_v62, %v9754_v33  ;;  %s9473_s27 = scalar_lea.sflag [#allocation15], %s9756_s9 }
 0x6ce   : > { %5910 = vst [vmem:[%s9285_s3 + $0x60] sm:$0xff] %v5788_v44   ;;  %v3895_v59 = vadd.f32 %v3894_v20, %v9260_v53  ;;  %v4164_v10 = vmul.f32 0.088388346, %v3891_v45  ;;  %v3898_v63 = vpop.f32.mrb[56].mxu1 }
 0x6cf   : > { %v4165_v50 = vmul.f32 0.088388346, %v3893_v39  ;;  %v3899_v18 = vadd.f32 %v3898_v63, %v9256_v35  ;;  %v3900_v52 = vpop.f32.mrb[57].mxu1 }
 0x6d0   : > { %v4166_v42 = vmul.f32 0.088388346, %v3895_v59  ;;  %v3901_v38 = vadd.f32 %v3900_v52, %v9260_v53  ;;  %v3902_v31 = vpop.f32.mrb[58].mxu1 }
 0x6d1   : > { %v5673_v49 = vpack.c.bf16 %v4165_v50, %v4163_v34  ;;  %v3903_v15 = vadd.f32 %v3902_v31, %v9256_v35  ;;  %v3904_v36 = vpop.f32.mrb[59].mxu1  ;;  %v4167_v51 = vmul.f32 0.088388346, %v3899_v18 }
 0x6d2   : > { %v5793_v28 = vpack.c.bf16 %v4166_v42, %v4164_v10  ;;  %v3905_v29 = vadd.f32 %v3904_v36, %v9260_v53  ;;  %v4168_v27 = vmul.f32 0.088388346, %v3901_v38  ;;  %v3908_v25 = vpop.f32.mrb[60].mxu1 }
 0x6d3   : > { %5889 = vst [vmem:[%s9285_s3 + $0x28] sm:$0xff] %v5673_v49   ;;  %v4169_v8 = vmul.f32 0.088388346, %v3903_v15  ;;  %v3909_v61 = vadd.f32 %v3908_v25, %v9256_v35  ;;  %v3910_v24 = vpop.f32.mrb[61].mxu1 }
 0x6d4   : > { %5911 = vst [vmem:[%s9285_s3 + $0x68] sm:$0xff] %v5793_v28   ;;  %v4170_v2 = vmul.f32 0.088388346, %v3905_v29  ;;  %v3911_v1 = vadd.f32 %v3910_v24, %v9260_v53  ;;  %v3912_v58 = vpop.f32.mrb[62].mxu1 }
 0x6d5   : > { %v5678_v21 = vpack.c.bf16 %v4169_v8, %v4167_v51  ;;  %v3913_v48 = vadd.f32 %v3912_v58, %v9256_v35  ;;  %v3914_v13 = vpop.f32.mrb[63].mxu1  ;;  %v4171_v14 = vmul.f32 0.088388346, %v3909_v61  ;;  %v9392_v35 = vrot.slane %v9250_v62, %v9755_v5 }
 0x6d6   : > { %v5798_v12 = vpack.c.bf16 %v4170_v2, %v4168_v27  ;;  %v3915_v11 = vadd.f32 %v3914_v13, %v9260_v53  ;;  %v4172_v46 = vmul.f32 0.088388346, %v3911_v1 }
 0x6d7   : > { %5890 = vst [vmem:[%s9285_s3 + $0x30] sm:$0xff] %v5678_v21   ;;  %v4173_v55 = vmul.f32 0.088388346, %v3913_v48 }
 0x6d8   : > { %5912 = vst [vmem:[%s9285_s3 + $0x70] sm:$0xff] %v5798_v12   ;;  %v4174_v17 = vmul.f32 0.088388346, %v3915_v11  ;;  %v3951_v22 = vpop.f32.mrb[64].mxu1 }
 0x6d9   : > { %v5683_v9 = vpack.c.bf16 %v4173_v55, %v4171_v14  ;;  %v3953_v53 = vpop.f32.mrb[65].mxu1  ;;  %v3952_v56 = vadd.f32 %v3951_v22, %v9387_v0 }
 0x6da   : > { %v5803_v26 = vpack.c.bf16 %v4174_v17, %v4172_v46  ;;  %v3955_v47 = vpop.f32.mrb[66].mxu1  ;;  %v3954_v30 = vadd.f32 %v3953_v53, %v9392_v35 }
 0x6db   : > { %5891 = vst [vmem:[%s9285_s3 + $0x38] sm:$0xff] %v5683_v9   ;;  %v3956_v16 = vadd.f32 %v3955_v47, %v9387_v0  ;;  %v3957_v41 = vpop.f32.mrb[67].mxu1 }
 0x6dc   : > { %5913 = vst [vmem:[%s9285_s3 + $0x78] sm:$0xff] %v5803_v26   ;;  %v3958_v40 = vadd.f32 %v3957_v41, %v9392_v35 }
 0x6dd   : > { %v5688_v7 = vpack.c.bf16 %v3956_v16, %v3952_v56 }
 0x6de   : > { %v5808_v57 = vpack.c.bf16 %v3958_v40, %v3954_v30 }
 0x6df   : > { %5689 = vst [vmem:[%s9401_s0] sm:$0xff] %v5688_v7  }
 0x6e0   : > { %5914 = vst [vmem:[%s9401_s0 + $0x40] sm:$0xff] %v5808_v57   ;;  %v3961_v62 = vpop.f32.mrb[68].mxu1 }
 0x6e1   : > { %v3963_v37 = vpop.f32.mrb[69].mxu1  ;;  %v3962_v19 = vadd.f32 %v3961_v62, %v9387_v0 }
 0x6e2   : > { %v3965_v23 = vpop.f32.mrb[70].mxu1  ;;  %v3964_v6 = vadd.f32 %v3963_v37, %v9392_v35 }
 0x6e3   : > { %v3966_v60 = vadd.f32 %v3965_v23, %v9387_v0  ;;  %v3967_v44 = vpop.f32.mrb[71].mxu1 }
 0x6e4   : > { %v3968_v3 = vadd.f32 %v3967_v44, %v9392_v35 }
 0x6e5   : > { %v5693_v32 = vpack.c.bf16 %v3966_v60, %v3962_v19 }
 0x6e6   : > { %v5813_v45 = vpack.c.bf16 %v3968_v3, %v3964_v6 }
 0x6e7   : > { %5892 = vst [vmem:[%s9401_s0 + $0x8] sm:$0xff] %v5693_v32  }
 0x6e8   : > { %5915 = vst [vmem:[%s9401_s0 + $0x48] sm:$0xff] %v5813_v45   ;;  %v3971_v54 = vpop.f32.mrb[72].mxu1 }
 0x6e9   : > { %v3973_v39 = vpop.f32.mrb[73].mxu1  ;;  %v3972_v59 = vadd.f32 %v3971_v54, %v9387_v0 }
 0x6ea   : > { %v3975_v20 = vpop.f32.mrb[74].mxu1  ;;  %v3974_v10 = vadd.f32 %v3973_v39, %v9392_v35 }
 0x6eb   : > { %v3976_v34 = vadd.f32 %v3975_v20, %v9387_v0  ;;  %v3977_v50 = vpop.f32.mrb[75].mxu1 }
 0x6ec   : > { %v3978_v42 = vadd.f32 %v3977_v50, %v9392_v35 }
 0x6ed   : > { %v5698_v49 = vpack.c.bf16 %v3976_v34, %v3972_v59 }
 0x6ee   : > { %v5818_v28 = vpack.c.bf16 %v3978_v42, %v3974_v10 }
 0x6ef   : > { %5893 = vst [vmem:[%s9401_s0 + $0x10] sm:$0xff] %v5698_v49  }
 0x6f0   : > { %5916 = vst [vmem:[%s9401_s0 + $0x50] sm:$0xff] %v5818_v28   ;;  %v3981_v63 = vpop.f32.mrb[76].mxu1 }
 0x6f1   : > { %v3983_v18 = vpop.f32.mrb[77].mxu1  ;;  %v3982_v38 = vadd.f32 %v3981_v63, %v9387_v0 }
 0x6f2   : > { %v3985_v52 = vpop.f32.mrb[78].mxu1  ;;  %v3984_v36 = vadd.f32 %v3983_v18, %v9392_v35 }
 0x6f3   : > { %v3986_v31 = vadd.f32 %v3985_v52, %v9387_v0  ;;  %v3987_v15 = vpop.f32.mrb[79].mxu1 }
 0x6f4   : > { %v3988_v29 = vadd.f32 %v3987_v15, %v9392_v35 }
 0x6f5   : > { %v5703_v51 = vpack.c.bf16 %v3986_v31, %v3982_v38 }
 0x6f6   : > { %v5823_v8 = vpack.c.bf16 %v3988_v29, %v3984_v36 }
 0x6f7   : > { %5894 = vst [vmem:[%s9401_s0 + $0x18] sm:$0xff] %v5703_v51  }
 0x6f8   : > { %5917 = vst [vmem:[%s9401_s0 + $0x58] sm:$0xff] %v5823_v8   ;;  %v3991_v27 = vpop.f32.mrb[80].mxu1 }
 0x6f9   : > { %v3993_v2 = vpop.f32.mrb[81].mxu1  ;;  %v3992_v12 = vadd.f32 %v3991_v27, %v9387_v0 }
 0x6fa   : > { %v3995_v21 = vpop.f32.mrb[82].mxu1  ;;  %v3994_v24 = vadd.f32 %v3993_v2, %v9392_v35 }
 0x6fb   : > { %v3996_v25 = vadd.f32 %v3995_v21, %v9387_v0  ;;  %v3997_v61 = vpop.f32.mrb[83].mxu1 }
 0x6fc   : > { %v3998_v1 = vadd.f32 %v3997_v61, %v9392_v35 }
 0x6fd   : > { %v5708_v58 = vpack.c.bf16 %v3996_v25, %v3992_v12 }
 0x6fe   : > { %v5828_v48 = vpack.c.bf16 %v3998_v1, %v3994_v24 }
 0x6ff   : > { %5895 = vst [vmem:[%s9401_s0 + $0x20] sm:$0xff] %v5708_v58  }
 0x700   : > { %5918 = vst [vmem:[%s9401_s0 + $0x60] sm:$0xff] %v5828_v48   ;;  %v4001_v13 = vpop.f32.mrb[84].mxu1 }
 0x701   : > { %v4003_v11 = vpop.f32.mrb[85].mxu1  ;;  %v4002_v55 = vadd.f32 %v4001_v13, %v9387_v0 }
 0x702   : > { %v4005_v14 = vpop.f32.mrb[86].mxu1  ;;  %v4004_v9 = vadd.f32 %v4003_v11, %v9392_v35 }
 0x703   : > { %v4006_v46 = vadd.f32 %v4005_v14, %v9387_v0  ;;  %v4007_v17 = vpop.f32.mrb[87].mxu1 }
 0x704   : > { %v4008_v33 = vadd.f32 %v4007_v17, %v9392_v35 }
 0x705   : > { %v5713_v26 = vpack.c.bf16 %v4006_v46, %v4002_v55 }
 0x706   : > { %v5833_v22 = vpack.c.bf16 %v4008_v33, %v4004_v9 }
 0x707   : > { %5896 = vst [vmem:[%s9401_s0 + $0x28] sm:$0xff] %v5713_v26  }
 0x708   : > { %5919 = vst [vmem:[%s9401_s0 + $0x68] sm:$0xff] %v5833_v22   ;;  %v4011_v5 = vpop.f32.mrb[88].mxu1 }
 0x709   : > { %v4013_v53 = vpop.f32.mrb[89].mxu1  ;;  %v4012_v56 = vadd.f32 %v4011_v5, %v9387_v0 }
 0x70a   : > { %v4015_v47 = vpop.f32.mrb[90].mxu1  ;;  %v4014_v30 = vadd.f32 %v4013_v53, %v9392_v35 }
 0x70b   : > { %v4016_v16 = vadd.f32 %v4015_v47, %v9387_v0  ;;  %v4017_v41 = vpop.f32.mrb[91].mxu1 }
 0x70c   : > { %v4018_v40 = vadd.f32 %v4017_v41, %v9392_v35 }
 0x70d   : > { %v5718_v7 = vpack.c.bf16 %v4016_v16, %v4012_v56 }
 0x70e   : > { %v5838_v57 = vpack.c.bf16 %v4018_v40, %v4014_v30 }
 0x70f   : > { %5897 = vst [vmem:[%s9401_s0 + $0x30] sm:$0xff] %v5718_v7  }
 0x710   : > { %5920 = vst [vmem:[%s9401_s0 + $0x70] sm:$0xff] %v5838_v57   ;;  %v4021_v62 = vpop.f32.mrb[92].mxu1 }
 0x711   : > { %v4023_v37 = vpop.f32.mrb[93].mxu1  ;;  %v4022_v19 = vadd.f32 %v4021_v62, %v9387_v0 }
 0x712   : > { %v4025_v23 = vpop.f32.mrb[94].mxu1  ;;  %v4024_v6 = vadd.f32 %v4023_v37, %v9392_v35 }
 0x713   : > { %v4026_v60 = vadd.f32 %v4025_v23, %v9387_v0  ;;  %v4027_v44 = vpop.f32.mrb[95].mxu1 }
 0x714   : > { %v4028_v3 = vadd.f32 %v4027_v44, %v9392_v35 }
 0x715   : > { %v5723_v32 = vpack.c.bf16 %v4026_v60, %v4022_v19 }
 0x716   : > { %v5843_v45 = vpack.c.bf16 %v4028_v3, %v4024_v6 }
 0x717   : > { %5898 = vst [vmem:[%s9401_s0 + $0x38] sm:$0xff] %v5723_v32  }
 0x718   : > { %5921 = vst [vmem:[%s9401_s0 + $0x78] sm:$0xff] %v5843_v45   ;;  %v4104_v54 = vpop.f32.mrb[96].mxu1 }
 0x719   : > { %v4106_v39 = vpop.f32.mrb[97].mxu1  ;;  %v4105_v59 = vadd.f32 %v4104_v54, %v9263_v4 }
 0x71a   : > { %v4108_v20 = vpop.f32.mrb[98].mxu1  ;;  %v4107_v0 = vadd.f32 %v4106_v39, %v9266_v43 }
 0x71b   : > { %v4109_v34 = vadd.f32 %v4108_v20, %v9263_v4  ;;  %v4110_v50 = vpop.f32.mrb[99].mxu1 }
 0x71c   : > { %v4111_v10 = vadd.f32 %v4110_v50, %v9266_v43 }
 0x71d   : > { %v5748_v35 = vpack.c.bf16 %v4109_v34, %v4105_v59 }
 0x71e   : > { %v5868_v42 = vpack.c.bf16 %v4111_v10, %v4107_v0 }
 0x71f   : > { %5902 = vst [vmem:[%s9280_s1 + $0x20] sm:$0xff] %v5748_v35  }
 0x720   : > { %5926 = vst [vmem:[%s9280_s1 + $0x60] sm:$0xff] %v5868_v42   ;;  %v4114_v49 = vpop.f32.mrb[100].mxu1 }
 0x721   : > { %v4116_v28 = vpop.f32.mrb[101].mxu1  ;;  %v4115_v18 = vadd.f32 %v4114_v49, %v9263_v4 }
 0x722   : > { %v4118_v63 = vpop.f32.mrb[102].mxu1  ;;  %v4117_v31 = vadd.f32 %v4116_v28, %v9266_v43 }
 0x723   : > { %v4119_v52 = vadd.f32 %v4118_v63, %v9263_v4  ;;  %v4120_v38 = vpop.f32.mrb[103].mxu1 }
 0x724   : > { %v4121_v15 = vadd.f32 %v4120_v38, %v9266_v43 }
 0x725   : > { %v5753_v36 = vpack.c.bf16 %v4119_v52, %v4115_v18 }
 0x726   : > { %v5873_v29 = vpack.c.bf16 %v4121_v15, %v4117_v31 }
 0x727   : > { %5903 = vst [vmem:[%s9280_s1 + $0x28] sm:$0xff] %v5753_v36  }
 0x728   : > { %5927 = vst [vmem:[%s9280_s1 + $0x68] sm:$0xff] %v5873_v29   ;;  %v4124_v51 = vpop.f32.mrb[104].mxu1 }
 0x729   : > { %v4126_v8 = vpop.f32.mrb[105].mxu1  ;;  %v4125_v2 = vadd.f32 %v4124_v51, %v9263_v4 }
 0x72a   : > { %v4128_v27 = vpop.f32.mrb[106].mxu1  ;;  %v4127_v25 = vadd.f32 %v4126_v8, %v9266_v43 }
 0x72b   : > { %v4129_v21 = vadd.f32 %v4128_v27, %v9263_v4  ;;  %v4130_v12 = vpop.f32.mrb[107].mxu1 }
 0x72c   : > { %v4131_v61 = vadd.f32 %v4130_v12, %v9266_v43 }
 0x72d   : > { %v5758_v24 = vpack.c.bf16 %v4129_v21, %v4125_v2 }
 0x72e   : > { %v5878_v1 = vpack.c.bf16 %v4131_v61, %v4127_v25 }
 0x72f   : > { %5904 = vst [vmem:[%s9280_s1 + $0x30] sm:$0xff] %v5758_v24  }
 0x730   : > { %5928 = vst [vmem:[%s9280_s1 + $0x70] sm:$0xff] %v5878_v1   ;;  %v4134_v58 = vpop.f32.mrb[108].mxu1 }
 0x731   : > { %v4136_v48 = vpop.f32.mrb[109].mxu1  ;;  %v4135_v11 = vadd.f32 %v4134_v58, %v9263_v4 }
 0x732   : > { %v4138_v13 = vpop.f32.mrb[110].mxu1  ;;  %v4137_v46 = vadd.f32 %v4136_v48, %v9266_v43 }
 0x733   : > { %v4139_v14 = vadd.f32 %v4138_v13, %v9263_v4  ;;  %v4140_v55 = vpop.f32.mrb[111].mxu1 }
 0x734   : > { %v4141_v17 = vadd.f32 %v4140_v55, %v9266_v43 }
 0x735   : > { %v5763_v9 = vpack.c.bf16 %v4139_v14, %v4135_v11 }
 0x736   : > { %v5883_v33 = vpack.c.bf16 %v4141_v17, %v4137_v46 }
 0x737   : > { %5905 = vst [vmem:[%s9280_s1 + $0x38] sm:$0xff] %v5763_v9  }
 0x738   : > { %5929 = vst [vmem:[%s9280_s1 + $0x78] sm:$0xff] %v5883_v33  }
 0x739   : > { %s5536_s13 = sshll.u32 %s9749_s22, 4  ;;  %s4724_s5 = sshll.u32 %s9285_s3, 4  ;;  %s4725_s5 = int_to_ptr.vmem [resolvable:$true] %s4724_s5 }
 0x73a   : > { %s9757_s25 = sshll.u32 %s9750_s23, 6  ;;  %s9758_s24 = sld [smem:[#allocation71_spill]] }
 0x73b   : > { %s4705_s14 = sadd.s32 %s5536_s13, %s9757_s25  ;;  %s7223_s17 = smov 1024  }
 0x73c   : > { %s9480_s21 = sshll.u32 %s4705_s14, 6  ;;  %6049 = sst [smem:[#allocation20]] (%p9752_p4), %s7223_s17 }
 0x73d   : > { %s7224_s4 = smov 2048   ;;  %s7225_s22 = smov 16  }
 0x73e   : > { %6050 = sst [smem:[#allocation20 + $0x1]] (%p9752_p4), %s7224_s4  ;;  %s7226_s3 = smov 64  }
 0x73f   : > { %6051 = sst [smem:[#allocation20 + $0x2]] (%p9752_p4), %s7225_s22  ;;  %s7227_s23 = smov 4  }
 0x740   : > { %s4707_s9 = scalar_lea.hbm %s9758_s24, %s9480_s21  ;;  %6052 = sst [smem:[#allocation20 + $0x3]] (%p9752_p4), %s7226_s3 }
 0x741   : > { %6053 = sst [smem:[#allocation20 + $0x4]] (%p9752_p4), %s7226_s3  ;;  %s7228_s13 = smov [#allocation19]  }
 0x742   : > { %6054 = sst [smem:[#allocation20 + $0x5]] (%p9752_p4), %s7227_s23  ;;  %s7229_s25 = smov 0  }
 0x743   : > { %6055 = dma.general (%p9752_p4), %s4725_s5, 2048, %s4707_s9, %s9473_s27, %s7228_s13, [#allocation20], %s7229_s25, 0  }
 0x744   : > { %s9759_s16 = sld [smem:[#allocation72_spill]]  ;;  %s4771_s8 = sshll.u32 %s9401_s0, 4  ;;  %s4772_s8 = int_to_ptr.vmem [resolvable:$true] %s4771_s8 }
 0x745   : > { %s7230_s24 = smov 1024   ;;  %s7231_s5 = smov 2048  }
 0x746   : > { %6056 = sst [smem:[#allocation22]] (%p9752_p4), %s7230_s24  ;;  %s7232_s9 = smov 16  }
 0x747   : > { %6057 = sst [smem:[#allocation22 + $0x1]] (%p9752_p4), %s7231_s5  ;;  %s7233_s22 = smov 64  }
 0x748   : > { %6058 = sst [smem:[#allocation22 + $0x2]] (%p9752_p4), %s7232_s9  ;;  %s7234_s3 = smov 4  }
 0x749   : > { %6059 = sst [smem:[#allocation22 + $0x3]] (%p9752_p4), %s7233_s22  ;;  %s7235_s23 = smov [#allocation21]  }
 0x74a   : > { %s4754_s4 = scalar_lea.hbm %s9759_s16, %s9480_s21  ;;  %6060 = sst [smem:[#allocation22 + $0x4]] (%p9752_p4), %s7233_s22 }
 0x74b   : > { %6061 = sst [smem:[#allocation22 + $0x5]] (%p9752_p4), %s7234_s3  ;;  %s7236_s0 = smov 0  }
 0x74c   : > { %6062 = dma.general (%p9752_p4), %s4772_s8, 2048, %s4754_s4, %s9473_s27, %s7235_s23, [#allocation22], %s7236_s0, 0  }
 0x74d   : > { %s9760_s17 = sld [smem:[#allocation73_spill]]  ;;  %s4818_s16 = sshll.u32 %s9280_s1, 4  ;;  %s4819_s16 = int_to_ptr.vmem [resolvable:$true] %s4818_s16 }
 0x74e   : > { %s7237_s24 = smov 1024   ;;  %s7238_s27 = smov 2048  }
 0x74f   : > { %6063 = sst [smem:[#allocation24]] (%p9752_p4), %s7237_s24  ;;  %s7239_s4 = smov 16  }
 0x750   : > { %6064 = sst [smem:[#allocation24 + $0x1]] (%p9752_p4), %s7238_s27  ;;  %s7240_s8 = smov 64  }
 0x751   : > { %6065 = sst [smem:[#allocation24 + $0x2]] (%p9752_p4), %s7239_s4  ;;  %s7241_s5 = smov 4  }
 0x752   : > { %6066 = sst [smem:[#allocation24 + $0x3]] (%p9752_p4), %s7240_s8  ;;  %s7243_s1 = smov 0  }
 0x753   : > { %s4801_s14 = scalar_lea.hbm %s9760_s17, %s9480_s21  ;;  %6067 = sst [smem:[#allocation24 + $0x4]] (%p9752_p4), %s7240_s8 }
 0x754   : > { %6068 = sst [smem:[#allocation24 + $0x5]] (%p9752_p4), %s7241_s5  ;;  %s7242_s21 = smov [#allocation23]  }
 0x755   : > { %s9761_s9 = scalar_lea.sflag [#allocation18], %s7579_s28 }
 0x756   : > { %6069 = dma.general (%p9752_p4), %s4819_s16, 2048, %s4801_s14, %s9761_s9, %s7242_s21, [#allocation24], %s7243_s1, 0  }
 0x757 PF: > { %p6118_p1 = scmp.ge.s32.totalorder %s7206_s20, 2  ;;  %s4846_s22 = sand.u32 1, %s7178_s29  }
 0x758   : > { %p9762_p3 = scmp.ne.s32.totalorder %s9655_s11, 0  ;;  %s4847_s3 = scalar_lea.sflag [#allocation4], %s4846_s22 }
 0x75a   : > { %p6095_p10 = pnand %p6118_p1, %p9762_p3 }
 0x75c   : > { %7165 = dma.done.wait (!%p6095_p10), %s4847_s3, 4096  }
 0x75d   : > { %7167 = vsyncadd (!%p6095_p10), %s4847_s3, 4294963200  ;;  %s9763_s23 = sadd.s32 4294967294, %s7206_s20  }
 0x75e   : > { %s4855_s0 = sand.u32 1, %s9763_s23  }
 0x75f   : > { %s4856_s13 = scalar_lea.sflag [#allocation15], %s4855_s0 }
 0x760   : > { %7169 = dma.done.wait (!%p6095_p10), %s4856_s13, 4096  }
 0x761   : > { %7171 = vsyncadd (!%p6095_p10), %s4856_s13, 4294963200  ;;  %s4874_s12 = scalar_lea.sflag [#allocation18], %s4846_s22 }
 0x762   : > { %7173 = dma.done.wait (!%p6095_p10), %s4874_s12, 2048  }
 0x763   : > { %7175 = vsyncadd (!%p6095_p10), %s4874_s12, 4294965248  ;;  %s40_s20 = sadd.s32 1, %s7206_s20   ;;  %s9764_s11 = sld [smem:[#allocation34_spill]] }
 0x764   : > { %p37_p4 = scmp.ge.s32.totalorder %s40_s20, 6   ;;  %s9765_s29 = smov %s7182_s30 }
 0x765   : > { %s9766_s30 = smov %s7186_s15  ;;  %s9767_s15 = smov %s7528_s2 }
 0x766   : > { %s9768_s16 = smov %s7198_s18  ;;  %s9769_s17 = smov %s7202_s19 }
 0x767   : > { %s9770_s18 = smov %s9773_s10  ;;  %39 = sbr.rel (!%p37_p4) target bundleno = 28 (0x1c), region = 196 }
 0x769   : > { %s9771_s19 = smov %s9764_s11 }
 0x76e   :  { %4879 = vsyncpa [#allocation3], 1 }
 0x76f   :  { %4881 = vsyncpa [#allocation3 + $0x1], 1 }
 0x770   :  { %4882 = vsyncpa [#allocation6], 1 }
 0x771   :  { %4883 = vsyncpa [#allocation9], 1 }
 0x772   :  { %4884 = vsyncpa [#allocation12], 1 }
 0x773   :  { %4885 = vsyncpa [#allocation4], 1 }
 0x774   :  { %4887 = vsyncpa [#allocation4 + $0x1], 1 }
 0x775   :  { %4888 = vsyncpa [#allocation15], 1 }
 0x776   :  { %4890 = vsyncpa [#allocation15 + $0x1], 1 }
 0x777   :  { %4891 = vsyncpa [#allocation18], 1 }
 0x778   :  { %4893 = vsyncpa [#allocation18 + $0x1], 1 }

</bundles_post_ra>
